<compile_context>
chip_gen: v7x
topology: tpu7x:2x2x1
jax: 0.10.0
libtpu: 0.0.40
codegen_flags: <defaults>
</compile_context>

<pallas_src>
import functools

import jax
import jax.numpy as jnp
from jax.experimental import pallas as pl
from jax.experimental.pallas import tpu as pltpu

# bf16 MXU operands (f32 accumulation, f32 epilogue).  None -> exact f32.
MXU_DTYPE = jnp.bfloat16

_LANE = 128

# Conv stack of the PyTorch module: Conv(8,4) -> Conv(4,2) -> Conv(3,1).
_K1, _S1 = 8, 4
_K2, _S2 = 4, 2
_K3, _S3 = 3, 1


def _round_up(x, m):
    return (x + m - 1) // m * m


def _conv_out(n, k, s):
    return (n - k) // s + 1


# ----------------------------------------------------------------------------
# Fused per-pair kernel: conv1 + conv2 + conv3 + fused FC heads.
# One grid step = one (obs, next_obs) image pair; everything stays in VMEM.
# ----------------------------------------------------------------------------
def _icm_pair_kernel(p1_ref, act_ref, w1_ref, b1_ref, w2_ref, b2_ref,
                     w3_ref, b3_ref, wfc_ref, bfc_ref, o_ref, h1_ref,
                     *, W1, R1, H2, W2, KH2, KW2, S2, C1, C2, C3, cdtype):
    f32 = jnp.float32
    # Contiguous window of conv1 rows that contains every stride-S2 tap
    # position; conv2 output pixel (ph, pw) sits at offset S2*(W1*ph + pw).
    L2 = S2 * (W1 * (H2 - 1) + (W2 - 1)) + 1

    b1 = b1_ref[...]
    b2 = b2_ref[...]
    b3 = b3_ref[...]

    # conv1: both images of the pair in one MXU pass; park result in VMEM.
    h1 = jnp.dot(p1_ref[0], w1_ref[...], preferred_element_type=f32)
    h1_ref[...] = jnp.maximum(h1 + b1, 0.0)            # (2*R1, C1) f32

    feats = []
    for n in range(2):                                  # 0 = obs, 1 = next_obs
        # conv2: accumulate the KH2*KW2 taps over a contiguous row window.
        acc = jnp.zeros((L2, C2), f32)
        for i in range(KH2):
            for j in range(KW2):
                rows = h1_ref[pl.ds(n * R1 + i * W1 + j, L2), :]
                tap = w2_ref[pl.ds((i * KW2 + j) * C1, C1), :]
                acc = acc + jnp.dot(rows.astype(cdtype), tap,
                                    preferred_element_type=f32)
        # conv3 (1x1 output): bias+ReLU each conv2 pixel, one MXU tap each.
        f = jnp.zeros((1, C3), f32)
        for ph in range(H2):
            for pw in range(W2):
                m = S2 * (W1 * ph + pw)
                h2row = jnp.maximum(acc[m:m + 1, :] + b2, 0.0)
                tap = w3_ref[pl.ds((ph * W2 + pw) * C2, C2), :]
                f = f + jnp.dot(h2row.astype(cdtype), tap,
                                preferred_element_type=f32)
        feats.append(jnp.maximum(f + b3, 0.0))          # (1, C3) f32
    feat_obs, feat_nxt = feats

    # Fused forward_fc / inverse_fc heads (block-structured, lane-dense).
    fc_in = jnp.concatenate(
        [feat_obs.astype(cdtype), feat_nxt.astype(cdtype), act_ref[0]],
        axis=1)                                         # (1, 2F + Ap)
    fc = jnp.dot(fc_in, wfc_ref[...], preferred_element_type=f32) + bfc_ref[...]
    o_ref[0] = jnp.concatenate([feat_nxt, fc], axis=1).astype(o_ref.dtype)


# ----------------------------------------------------------------------------
# XLA glue: conv1 im2col in NHWC (patch feature order (kh, kw, C) matches the
# one-time weight permutation in prepare_params()).
# ----------------------------------------------------------------------------
def im2col_nhwc(x, kh, kw, stride):
    N, H, W, C = x.shape
    OH = _conv_out(H, kh, stride)
    OW = _conv_out(W, kw, stride)
    cols = []
    for i in range(kh):
        for j in range(kw):
            cols.append(
                x[:, i:i + stride * OH:stride, j:j + stride * OW:stride, :])
    p = jnp.stack(cols, axis=3)                         # (N, OH, OW, kh*kw, C)
    return p.reshape(N, OH * OW, kh * kw * C)


# ----------------------------------------------------------------------------
# ICM forward (matches ICM.forward for 5-D obs / next_obs and 3-D action)
# ----------------------------------------------------------------------------
def icm_forward(q, obs, action, next_obs):
    B, S, C, H, W = obs.shape
    BS = B * S
    A = action.shape[-1]
    cdtype = q["w1"].dtype

    H1, W1 = _conv_out(H, _K1, _S1), _conv_out(W, _K1, _S1)
    H2, W2 = _conv_out(H1, _K2, _S2), _conv_out(W1, _K2, _S2)
    H3, W3 = _conv_out(H2, _K3, _S3), _conv_out(W2, _K3, _S3)
    assert H3 == 1 and W3 == 1, "fused kernel assumes a 1x1 conv3 output"
    R1 = H1 * W1

    C1, C2, C3 = q["w1"].shape[1], q["w2"].shape[1], q["w3"].shape[1]
    F = C3
    Kp1 = q["w1"].shape[0]
    Nfc = q["wfc"].shape[1]
    Ap = q["wfc"].shape[0] - 2 * F

    # NCHW -> NHWC once, conv1 im2col, then pair layout [obs_g ; next_g].
    def nhwc(x):
        return x.reshape(BS, C, H, W).transpose(0, 2, 3, 1)

    imgs = jnp.concatenate([nhwc(obs), nhwc(next_obs)], axis=0)   # (2BS,H,W,C)
    patches = im2col_nhwc(imgs, _K1, _K1, _S1)                    # (2BS,R1,K1)
    patches = jnp.pad(patches,
                      ((0, 0), (0, 0), (0, Kp1 - patches.shape[-1])))
    patches = (patches.reshape(2, BS, R1, Kp1).transpose(1, 0, 2, 3)
               .reshape(BS, 2 * R1, Kp1).astype(cdtype))

    act = jnp.zeros((BS, 1, Ap), cdtype)
    act = act.at[:, 0, :A].set(action.reshape(BS, A).astype(cdtype))

    kernel = functools.partial(
        _icm_pair_kernel, W1=W1, R1=R1, H2=H2, W2=W2, KH2=_K2, KW2=_K2,
        S2=_S2, C1=C1, C2=C2, C3=C3, cdtype=cdtype)

    def _resident(arr):      # constant index map -> fetched once, VMEM-resident
        return pl.BlockSpec(arr.shape, lambda g, _nd=arr.ndim: (0,) * _nd)

    bpe = jnp.dtype(cdtype).itemsize
    L2 = _S2 * (W1 * (H2 - 1) + (W2 - 1)) + 1
    wbytes = sum(int(q[k].size) * q[k].dtype.itemsize
                 for k in ("w1", "b1", "w2", "b2", "w3", "b3", "wfc", "bfc"))
    cost = pl.CostEstimate(
        flops=2 * BS * (2 * R1 * Kp1 * C1
                        + 2 * _K2 * _K2 * L2 * C1 * C2
                        + 2 * H2 * W2 * C2 * C3
                        + (2 * F + Ap) * Nfc),
        transcendentals=0,
        bytes_accessed=(int(patches.size) + int(act.size)) * bpe
                       + wbytes + BS * (F + Nfc) * 4)

    out = pl.pallas_call(
        kernel,
        out_shape=jax.ShapeDtypeStruct((BS, 1, F + Nfc), jnp.float32),
        grid=(BS,),
        in_specs=[
            pl.BlockSpec((1, 2 * R1, Kp1), lambda g: (g, 0, 0)),
            pl.BlockSpec((1, 1, Ap), lambda g: (g, 0, 0)),
            _resident(q["w1"]), _resident(q["b1"]),
            _resident(q["w2"]), _resident(q["b2"]),
            _resident(q["w3"]), _resident(q["b3"]),
            _resident(q["wfc"]), _resident(q["bfc"]),
        ],
        out_specs=pl.BlockSpec((1, 1, F + Nfc), lambda g: (g, 0, 0)),
        scratch_shapes=[pltpu.VMEM((2 * R1, C1), jnp.float32)],
        compiler_params=pltpu.CompilerParams(
            dimension_semantics=("parallel",)),
        cost_estimate=cost,
    )(patches, act, q["w1"], q["b1"], q["w2"], q["b2"],
      q["w3"], q["b3"], q["wfc"], q["bfc"])

    out = out.reshape(BS, F + Nfc)
    feat_nxt = out[:, :F].reshape(B, S, F)
    forward_pred = out[:, F:2 * F].reshape(B, S, F)
    inverse_pred = out[:, 2 * F:2 * F + A].reshape(B, S, A)
    return feat_nxt, forward_pred, inverse_pred


# ----------------------------------------------------------------------------
# One-time parameter preparation:
#  * conv weights (OC, IC, kh, kw) -> (kh*kw*IC, OC) matmul layout
#  * forward_fc + inverse_fc fused into one lane-dense block matrix
#  * optional bf16 cast of all matmul operands (biases stay f32)
# ----------------------------------------------------------------------------
def prepare_params(p, mxu_dtype=MXU_DTYPE):
    cd = jnp.float32 if mxu_dtype is None else mxu_dtype

    def conv_mat(w):
        oc, ic, kh, kw = w.shape
        return w.transpose(2, 3, 1, 0).reshape(kh * kw * ic, oc)

    w1 = conv_mat(p["c1w"])
    Kp1 = _round_up(w1.shape[0], _LANE)
    w1 = jnp.pad(w1, ((0, Kp1 - w1.shape[0]), (0, 0)))

    F = p["fw_w"].shape[1]
    A = p["iv_w"].shape[1]
    Ap = _round_up(A, _LANE)
    Nfc = _round_up(F + A, _LANE)
    wfc = jnp.zeros((2 * F + Ap, Nfc), jnp.float32)
    wfc = wfc.at[:F, :F].set(p["fw_w"][:F])                 # feat_obs -> fwd
    wfc = wfc.at[2 * F:2 * F + A, :F].set(p["fw_w"][F:F + A])  # action -> fwd
    wfc = wfc.at[:F, F:F + A].set(p["iv_w"][:F])            # feat_obs -> inv
    wfc = wfc.at[F:2 * F, F:F + A].set(p["iv_w"][F:2 * F])  # feat_nxt -> inv
    bfc = jnp.zeros((1, Nfc), jnp.float32)
    bfc = bfc.at[0, :F].set(p["fw_b"]).at[0, F:F + A].set(p["iv_b"])

    return {
        "w1": w1.astype(cd), "b1": p["c1b"].reshape(1, -1),
        "w2": conv_mat(p["c2w"]).astype(cd), "b2": p["c2b"].reshape(1, -1),
        "w3": conv_mat(p["c3w"]).astype(cd), "b3": p["c3b"].reshape(1, -1),
        "wfc": wfc.astype(cd), "bfc": bfc,
    }


# ----------------------------------------------------------------------------
# Pure-JAX reference (PyTorch semantics).  compute_dtype=None is exact f32;
# compute_dtype=bf16 rounds every matmul operand to bf16 (f32 accumulation),
# i.e. the same rounding points as the Pallas bf16 path.
# ----------------------------------------------------------------------------
def icm_reference(p, obs, action, next_obs, compute_dtype=None):
    cd = jnp.float32 if compute_dtype is None else compute_dtype
    f32 = jnp.float32
    hp = jax.lax.Precision.HIGHEST

    def conv(x, w, b, stride):
        y = jax.lax.conv_general_dilated(
            x.astype(cd), w.astype(cd), (stride, stride), "VALID",
            dimension_numbers=("NCHW", "OIHW", "NCHW"),
            preferred_element_type=f32, precision=hp)
        return jax.nn.relu(y + b[None, :, None, None])

    def cnn_ref(x):
        x = conv(x, p["c1w"], p["c1b"], _S1)
        x = conv(x, p["c2w"], p["c2b"], _S2)
        x = conv(x, p["c3w"], p["c3b"], _S3)
        return x.reshape(x.shape[0], -1)

    def linear(x, w, b):
        return jnp.dot(x.astype(cd), w.astype(cd),
                       preferred_element_type=f32, precision=hp) + b

    B, S = obs.shape[:2]
    fo = cnn_ref(obs.reshape((B * S,) + obs.shape[2:]))
    fn = cnn_ref(next_obs.reshape((B * S,) + next_obs.shape[2:]))
    act = action.reshape(B * S, -1)
    fwd = linear(jnp.concatenate([fo, act], axis=1), p["fw_w"], p["fw_b"])
    inv = linear(jnp.concatenate([fo, fn], axis=1), p["iv_w"], p["iv_b"])
    F = fo.shape[-1]
    return (fn.reshape(B, S, F), fwd.reshape(B, S, F),
            inv.reshape(B, S, act.shape[-1]))


# ----------------------------------------------------------------------------
# Deterministic parameter init (PyTorch-style uniform(-1/sqrt(fan_in), +))
# ----------------------------------------------------------------------------
def _uniform(key, shape, fan_in):
    bound = 1.0 / jnp.sqrt(jnp.asarray(fan_in, jnp.float32))
    return jax.random.uniform(key, shape, jnp.float32, -bound, bound)


def init_params(key, in_ch, act_dim, feature_dim):
    ks = jax.random.split(key, 10)
    p = {}
    p["c1w"] = _uniform(ks[0], (32, in_ch, 8, 8), in_ch * 8 * 8)
    p["c1b"] = _uniform(ks[1], (32,), in_ch * 8 * 8)
    p["c2w"] = _uniform(ks[2], (64, 32, 4, 4), 32 * 4 * 4)
    p["c2b"] = _uniform(ks[3], (64,), 32 * 4 * 4)
    p["c3w"] = _uniform(ks[4], (64, 64, 3, 3), 64 * 3 * 3)
    p["c3b"] = _uniform(ks[5], (64,), 64 * 3 * 3)
    p["fw_w"] = _uniform(ks[6], (feature_dim + act_dim, feature_dim),
                         feature_dim + act_dim)
    p["fw_b"] = _uniform(ks[7], (feature_dim,), feature_dim + act_dim)
    p["iv_w"] = _uniform(ks[8], (feature_dim * 2, act_dim), feature_dim * 2)
    p["iv_b"] = _uniform(ks[9], (act_dim,), feature_dim * 2)
    return p


if __name__ == "__main__":
    # observation_space.shape = (4, 40, 40):
    #   conv1: (40-8)//4+1 = 9 ; conv2: (9-4)//2+1 = 3 ; conv3: 3-3+1 = 1
    #   feature_dim = 64 * 1 * 1 = 64
    B, S, C, H, W = 2, 2, 4, 40, 40
    ACT_DIM = 3
    FEATURE_DIM = 64

    root = jax.random.PRNGKey(0)
    k_obs, k_nxt, k_act, k_par = jax.random.split(root, 4)

    obs = jax.random.uniform(k_obs, (B, S, C, H, W), jnp.float32)
    next_obs = jax.random.uniform(k_nxt, (B, S, C, H, W), jnp.float32)
    action = jax.random.uniform(k_act, (B, S, ACT_DIM), jnp.float32)

    params = init_params(k_par, C, ACT_DIM, FEATURE_DIM)

    # --- default (bf16 MXU) path ---------------------------------------
    q = prepare_params(params, mxu_dtype=MXU_DTYPE)
    icm_jit = jax.jit(icm_forward)
    feat_next, forward_pred, inverse_pred = jax.block_until_ready(
        icm_jit(q, obs, action, next_obs))

    assert feat_next.shape == (B, S, FEATURE_DIM)
    assert forward_pred.shape == (B, S, FEATURE_DIM)
    assert inverse_pred.shape == (B, S, ACT_DIM)
    assert all(bool(jnp.isfinite(x).all()) for x in
               (feat_next, forward_pred, inverse_pred))

    # Check against a reference with the SAME rounding points (bf16 operands,
    # f32 accumulation) -- differences are accumulation-order only.
    ref = icm_reference(params, obs, action, next_obs,
                        compute_dtype=MXU_DTYPE)
    for got, want in zip((feat_next, forward_pred, inverse_pred), ref):
        err = float(jnp.max(jnp.abs(got - want)))
        assert jnp.allclose(got, want, rtol=1e-2, atol=1e-2), err

    # --- exact f32 path vs. f32 PyTorch-semantics reference -------------
    q32 = prepare_params(params, mxu_dtype=None)
    out32 = jax.block_until_ready(
        jax.jit(icm_forward)(q32, obs, action, next_obs))
    ref32 = icm_reference(params, obs, action, next_obs, compute_dtype=None)
    for got, want in zip(out32, ref32):
        err = float(jnp.max(jnp.abs(got - want)))
        assert jnp.allclose(got, want, rtol=1e-2, atol=1e-2), err

    print("KERNEL_OK")
</pallas_src>

<mosaic_0001>
module attributes {stable_mosaic.version = 11 : i64} {
  func.func @_icm_pair_kernel(%arg0: i32, %arg1: memref<1x162x256xbf16, #tpu.memory_space<vmem>>, %arg2: memref<1x1x128xbf16, #tpu.memory_space<vmem>>, %arg3: memref<256x32xbf16, #tpu.memory_space<vmem>>, %arg4: memref<1x32xf32, #tpu.memory_space<vmem>>, %arg5: memref<512x64xbf16, #tpu.memory_space<vmem>>, %arg6: memref<1x64xf32, #tpu.memory_space<vmem>>, %arg7: memref<576x64xbf16, #tpu.memory_space<vmem>>, %arg8: memref<1x64xf32, #tpu.memory_space<vmem>>, %arg9: memref<256x128xbf16, #tpu.memory_space<vmem>>, %arg10: memref<1x128xf32, #tpu.memory_space<vmem>>, %arg11: memref<1x1x192xf32, #tpu.memory_space<vmem>>, %arg12: memref<162x32xf32, #tpu.memory_space<vmem>>) attributes {dimension_semantics = [#tpu.dimension_semantics<parallel>], iteration_bounds = array<i64: 4>, scalar_prefetch = 0 : i64, scratch_operands = 1 : i64, tpu.core_type = #tpu.core_type<tc>, window_params = [{transform_indices = @transform_0, window_bounds = array<i64: 1, 162, 256>}, {transform_indices = @transform_1, window_bounds = array<i64: 1, 1, 128>}, {pipeline_mode = #tpu.pipeline_mode<synchronous>, transform_indices = @transform_2, window_bounds = array<i64: 256, 32>}, {pipeline_mode = #tpu.pipeline_mode<synchronous>, transform_indices = @transform_3, window_bounds = array<i64: 1, 32>}, {pipeline_mode = #tpu.pipeline_mode<synchronous>, transform_indices = @transform_4, window_bounds = array<i64: 512, 64>}, {pipeline_mode = #tpu.pipeline_mode<synchronous>, transform_indices = @transform_5, window_bounds = array<i64: 1, 64>}, {pipeline_mode = #tpu.pipeline_mode<synchronous>, transform_indices = @transform_6, window_bounds = array<i64: 576, 64>}, {pipeline_mode = #tpu.pipeline_mode<synchronous>, transform_indices = @transform_7, window_bounds = array<i64: 1, 64>}, {pipeline_mode = #tpu.pipeline_mode<synchronous>, transform_indices = @transform_8, window_bounds = array<i64: 256, 128>}, {pipeline_mode = #tpu.pipeline_mode<synchronous>, transform_indices = @transform_9, window_bounds = array<i64: 1, 128>}, {transform_indices = @transform_10, window_bounds = array<i64: 1, 1, 192>}]} {
    %c0 = arith.constant 0 : index
    %c0_0 = arith.constant 0 : index
    %0 = vector.load %arg4[%c0, %c0_0] : memref<1x32xf32, #tpu.memory_space<vmem>>, vector<1x32xf32>
    %c0_1 = arith.constant 0 : index
    %c0_2 = arith.constant 0 : index
    %1 = vector.load %arg6[%c0_1, %c0_2] : memref<1x64xf32, #tpu.memory_space<vmem>>, vector<1x64xf32>
    %c0_3 = arith.constant 0 : index
    %c0_4 = arith.constant 0 : index
    %2 = vector.load %arg8[%c0_3, %c0_4] : memref<1x64xf32, #tpu.memory_space<vmem>>, vector<1x64xf32>
    %c0_5 = arith.constant 0 : index
    %c0_6 = arith.constant 0 : index
    %c0_7 = arith.constant 0 : index
    %3 = vector.load %arg1[%c0_5, %c0_6, %c0_7] : memref<1x162x256xbf16, #tpu.memory_space<vmem>>, vector<1x162x256xbf16>
    %4 = vector.shape_cast %3 : vector<1x162x256xbf16> to vector<162x256xbf16>
    %c0_8 = arith.constant 0 : index
    %c0_9 = arith.constant 0 : index
    %5 = vector.load %arg3[%c0_8, %c0_9] : memref<256x32xbf16, #tpu.memory_space<vmem>>, vector<256x32xbf16>
    %cst = arith.constant dense<0.000000e+00> : vector<162x32xf32>
    %6 = tpu.matmul %4, %5, %cst {dimension_numbers = #tpu.dot_dimension_numbers<[1], [0], [0], [1], [0, 0, 1, 1], [], []>} : vector<162x256xbf16>, vector<256x32xbf16>, vector<162x32xf32> -> vector<162x32xf32>
    %7 = vector.broadcast %0 : vector<1x32xf32> to vector<162x32xf32>
    %8 = arith.addf %6, %7 : vector<162x32xf32>
    %cst_10 = arith.constant 0.000000e+00 : f32
    %9 = vector.broadcast %cst_10 : f32 to vector<162x32xf32>
    %10 = arith.maximumf %8, %9 : vector<162x32xf32>
    %c0_11 = arith.constant 0 : index
    %c0_12 = arith.constant 0 : index
    %11 = vector.load %arg12[%c0_11, %c0_12] : memref<162x32xf32, #tpu.memory_space<vmem>>, vector<162x32xf32>
    tpu.vector_store %arg12[%c0_11, %c0_12], %10 {strides = array<i32>} : memref<162x32xf32, #tpu.memory_space<vmem>>, vector<162x32xf32>,
    %cst_13 = arith.constant 0.000000e+00 : f32
    %12 = vector.broadcast %cst_13 : f32 to vector<41x64xf32>
    %c0_14 = arith.constant 0 : index
    %c0_15 = arith.constant 0 : index
    %13 = vector.load %arg12[%c0_14, %c0_15] : memref<162x32xf32, #tpu.memory_space<vmem>>, vector<41x32xf32>
    %c0_16 = arith.constant 0 : index
    %c0_17 = arith.constant 0 : index
    %14 = vector.load %arg5[%c0_16, %c0_17] : memref<512x64xbf16, #tpu.memory_space<vmem>>, vector<32x64xbf16>
    %15 = arith.truncf %13 : vector<41x32xf32> to vector<41x32xbf16>
    %cst_18 = arith.constant dense<0.000000e+00> : vector<41x64xf32>
    %16 = tpu.matmul %15, %14, %cst_18 {dimension_numbers = #tpu.dot_dimension_numbers<[1], [0], [0], [1], [0, 0, 1, 1], [], []>} : vector<41x32xbf16>, vector<32x64xbf16>, vector<41x64xf32> -> vector<41x64xf32>
    %17 = arith.addf %12, %16 : vector<41x64xf32>
    %c1 = arith.constant 1 : index
    %c0_19 = arith.constant 0 : index
    %18 = vector.load %arg12[%c1, %c0_19] : memref<162x32xf32, #tpu.memory_space<vmem>>, vector<41x32xf32>
    %c32 = arith.constant 32 : index
    %c0_20 = arith.constant 0 : index
    %19 = vector.load %arg5[%c32, %c0_20] : memref<512x64xbf16, #tpu.memory_space<vmem>>, vector<32x64xbf16>
    %20 = arith.truncf %18 : vector<41x32xf32> to vector<41x32xbf16>
    %cst_21 = arith.constant dense<0.000000e+00> : vector<41x64xf32>
    %21 = tpu.matmul %20, %19, %cst_21 {dimension_numbers = #tpu.dot_dimension_numbers<[1], [0], [0], [1], [0, 0, 1, 1], [], []>} : vector<41x32xbf16>, vector<32x64xbf16>, vector<41x64xf32> -> vector<41x64xf32>
    %22 = arith.addf %17, %21 : vector<41x64xf32>
    %c2 = arith.constant 2 : index
    %c0_22 = arith.constant 0 : index
    %23 = vector.load %arg12[%c2, %c0_22] : memref<162x32xf32, #tpu.memory_space<vmem>>, vector<41x32xf32>
    %c64 = arith.constant 64 : index
    %c0_23 = arith.constant 0 : index
    %24 = vector.load %arg5[%c64, %c0_23] : memref<512x64xbf16, #tpu.memory_space<vmem>>, vector<32x64xbf16>
    %25 = arith.truncf %23 : vector<41x32xf32> to vector<41x32xbf16>
    %cst_24 = arith.constant dense<0.000000e+00> : vector<41x64xf32>
    %26 = tpu.matmul %25, %24, %cst_24 {dimension_numbers = #tpu.dot_dimension_numbers<[1], [0], [0], [1], [0, 0, 1, 1], [], []>} : vector<41x32xbf16>, vector<32x64xbf16>, vector<41x64xf32> -> vector<41x64xf32>
    %27 = arith.addf %22, %26 : vector<41x64xf32>
    %c3 = arith.constant 3 : index
    %c0_25 = arith.constant 0 : index
    %28 = vector.load %arg12[%c3, %c0_25] : memref<162x32xf32, #tpu.memory_space<vmem>>, vector<41x32xf32>
    %c96 = arith.constant 96 : index
    %c0_26 = arith.constant 0 : index
    %29 = vector.load %arg5[%c96, %c0_26] : memref<512x64xbf16, #tpu.memory_space<vmem>>, vector<32x64xbf16>
    %30 = arith.truncf %28 : vector<41x32xf32> to vector<41x32xbf16>
    %cst_27 = arith.constant dense<0.000000e+00> : vector<41x64xf32>
    %31 = tpu.matmul %30, %29, %cst_27 {dimension_numbers = #tpu.dot_dimension_numbers<[1], [0], [0], [1], [0, 0, 1, 1], [], []>} : vector<41x32xbf16>, vector<32x64xbf16>, vector<41x64xf32> -> vector<41x64xf32>
    %32 = arith.addf %27, %31 : vector<41x64xf32>
    %c9 = arith.constant 9 : index
    %c0_28 = arith.constant 0 : index
    %33 = vector.load %arg12[%c9, %c0_28] : memref<162x32xf32, #tpu.memory_space<vmem>>, vector<41x32xf32>
    %c128 = arith.constant 128 : index
    %c0_29 = arith.constant 0 : index
    %34 = vector.load %arg5[%c128, %c0_29] : memref<512x64xbf16, #tpu.memory_space<vmem>>, vector<32x64xbf16>
    %35 = arith.truncf %33 : vector<41x32xf32> to vector<41x32xbf16>
    %cst_30 = arith.constant dense<0.000000e+00> : vector<41x64xf32>
    %36 = tpu.matmul %35, %34, %cst_30 {dimension_numbers = #tpu.dot_dimension_numbers<[1], [0], [0], [1], [0, 0, 1, 1], [], []>} : vector<41x32xbf16>, vector<32x64xbf16>, vector<41x64xf32> -> vector<41x64xf32>
    %37 = arith.addf %32, %36 : vector<41x64xf32>
    %c10 = arith.constant 10 : index
    %c0_31 = arith.constant 0 : index
    %38 = vector.load %arg12[%c10, %c0_31] : memref<162x32xf32, #tpu.memory_space<vmem>>, vector<41x32xf32>
    %c160 = arith.constant 160 : index
    %c0_32 = arith.constant 0 : index
    %39 = vector.load %arg5[%c160, %c0_32] : memref<512x64xbf16, #tpu.memory_space<vmem>>, vector<32x64xbf16>
    %40 = arith.truncf %38 : vector<41x32xf32> to vector<41x32xbf16>
    %cst_33 = arith.constant dense<0.000000e+00> : vector<41x64xf32>
    %41 = tpu.matmul %40, %39, %cst_33 {dimension_numbers = #tpu.dot_dimension_numbers<[1], [0], [0], [1], [0, 0, 1, 1], [], []>} : vector<41x32xbf16>, vector<32x64xbf16>, vector<41x64xf32> -> vector<41x64xf32>
    %42 = arith.addf %37, %41 : vector<41x64xf32>
    %c11 = arith.constant 11 : index
    %c0_34 = arith.constant 0 : index
    %43 = vector.load %arg12[%c11, %c0_34] : memref<162x32xf32, #tpu.memory_space<vmem>>, vector<41x32xf32>
    %c192 = arith.constant 192 : index
    %c0_35 = arith.constant 0 : index
    %44 = vector.load %arg5[%c192, %c0_35] : memref<512x64xbf16, #tpu.memory_space<vmem>>, vector<32x64xbf16>
    %45 = arith.truncf %43 : vector<41x32xf32> to vector<41x32xbf16>
    %cst_36 = arith.constant dense<0.000000e+00> : vector<41x64xf32>
    %46 = tpu.matmul %45, %44, %cst_36 {dimension_numbers = #tpu.dot_dimension_numbers<[1], [0], [0], [1], [0, 0, 1, 1], [], []>} : vector<41x32xbf16>, vector<32x64xbf16>, vector<41x64xf32> -> vector<41x64xf32>
    %47 = arith.addf %42, %46 : vector<41x64xf32>
    %c12 = arith.constant 12 : index
    %c0_37 = arith.constant 0 : index
    %48 = vector.load %arg12[%c12, %c0_37] : memref<162x32xf32, #tpu.memory_space<vmem>>, vector<41x32xf32>
    %c224 = arith.constant 224 : index
    %c0_38 = arith.constant 0 : index
    %49 = vector.load %arg5[%c224, %c0_38] : memref<512x64xbf16, #tpu.memory_space<vmem>>, vector<32x64xbf16>
    %50 = arith.truncf %48 : vector<41x32xf32> to vector<41x32xbf16>
    %cst_39 = arith.constant dense<0.000000e+00> : vector<41x64xf32>
    %51 = tpu.matmul %50, %49, %cst_39 {dimension_numbers = #tpu.dot_dimension_numbers<[1], [0], [0], [1], [0, 0, 1, 1], [], []>} : vector<41x32xbf16>, vector<32x64xbf16>, vector<41x64xf32> -> vector<41x64xf32>
    %52 = arith.addf %47, %51 : vector<41x64xf32>
    %c18 = arith.constant 18 : index
    %c0_40 = arith.constant 0 : index
    %53 = vector.load %arg12[%c18, %c0_40] : memref<162x32xf32, #tpu.memory_space<vmem>>, vector<41x32xf32>
    %c256 = arith.constant 256 : index
    %c0_41 = arith.constant 0 : index
    %54 = vector.load %arg5[%c256, %c0_41] : memref<512x64xbf16, #tpu.memory_space<vmem>>, vector<32x64xbf16>
    %55 = arith.truncf %53 : vector<41x32xf32> to vector<41x32xbf16>
    %cst_42 = arith.constant dense<0.000000e+00> : vector<41x64xf32>
    %56 = tpu.matmul %55, %54, %cst_42 {dimension_numbers = #tpu.dot_dimension_numbers<[1], [0], [0], [1], [0, 0, 1, 1], [], []>} : vector<41x32xbf16>, vector<32x64xbf16>, vector<41x64xf32> -> vector<41x64xf32>
    %57 = arith.addf %52, %56 : vector<41x64xf32>
    %c19 = arith.constant 19 : index
    %c0_43 = arith.constant 0 : index
    %58 = vector.load %arg12[%c19, %c0_43] : memref<162x32xf32, #tpu.memory_space<vmem>>, vector<41x32xf32>
    %c288 = arith.constant 288 : index
    %c0_44 = arith.constant 0 : index
    %59 = vector.load %arg5[%c288, %c0_44] : memref<512x64xbf16, #tpu.memory_space<vmem>>, vector<32x64xbf16>
    %60 = arith.truncf %58 : vector<41x32xf32> to vector<41x32xbf16>
    %cst_45 = arith.constant dense<0.000000e+00> : vector<41x64xf32>
    %61 = tpu.matmul %60, %59, %cst_45 {dimension_numbers = #tpu.dot_dimension_numbers<[1], [0], [0], [1], [0, 0, 1, 1], [], []>} : vector<41x32xbf16>, vector<32x64xbf16>, vector<41x64xf32> -> vector<41x64xf32>
    %62 = arith.addf %57, %61 : vector<41x64xf32>
    %c20 = arith.constant 20 : index
    %c0_46 = arith.constant 0 : index
    %63 = vector.load %arg12[%c20, %c0_46] : memref<162x32xf32, #tpu.memory_space<vmem>>, vector<41x32xf32>
    %c320 = arith.constant 320 : index
    %c0_47 = arith.constant 0 : index
    %64 = vector.load %arg5[%c320, %c0_47] : memref<512x64xbf16, #tpu.memory_space<vmem>>, vector<32x64xbf16>
    %65 = arith.truncf %63 : vector<41x32xf32> to vector<41x32xbf16>
    %cst_48 = arith.constant dense<0.000000e+00> : vector<41x64xf32>
    %66 = tpu.matmul %65, %64, %cst_48 {dimension_numbers = #tpu.dot_dimension_numbers<[1], [0], [0], [1], [0, 0, 1, 1], [], []>} : vector<41x32xbf16>, vector<32x64xbf16>, vector<41x64xf32> -> vector<41x64xf32>
    %67 = arith.addf %62, %66 : vector<41x64xf32>
    %c21 = arith.constant 21 : index
    %c0_49 = arith.constant 0 : index
    %68 = vector.load %arg12[%c21, %c0_49] : memref<162x32xf32, #tpu.memory_space<vmem>>, vector<41x32xf32>
    %c352 = arith.constant 352 : index
    %c0_50 = arith.constant 0 : index
    %69 = vector.load %arg5[%c352, %c0_50] : memref<512x64xbf16, #tpu.memory_space<vmem>>, vector<32x64xbf16>
    %70 = arith.truncf %68 : vector<41x32xf32> to vector<41x32xbf16>
    %cst_51 = arith.constant dense<0.000000e+00> : vector<41x64xf32>
    %71 = tpu.matmul %70, %69, %cst_51 {dimension_numbers = #tpu.dot_dimension_numbers<[1], [0], [0], [1], [0, 0, 1, 1], [], []>} : vector<41x32xbf16>, vector<32x64xbf16>, vector<41x64xf32> -> vector<41x64xf32>
    %72 = arith.addf %67, %71 : vector<41x64xf32>
    %c27 = arith.constant 27 : index
    %c0_52 = arith.constant 0 : index
    %73 = vector.load %arg12[%c27, %c0_52] : memref<162x32xf32, #tpu.memory_space<vmem>>, vector<41x32xf32>
    %c384 = arith.constant 384 : index
    %c0_53 = arith.constant 0 : index
    %74 = vector.load %arg5[%c384, %c0_53] : memref<512x64xbf16, #tpu.memory_space<vmem>>, vector<32x64xbf16>
    %75 = arith.truncf %73 : vector<41x32xf32> to vector<41x32xbf16>
    %cst_54 = arith.constant dense<0.000000e+00> : vector<41x64xf32>
    %76 = tpu.matmul %75, %74, %cst_54 {dimension_numbers = #tpu.dot_dimension_numbers<[1], [0], [0], [1], [0, 0, 1, 1], [], []>} : vector<41x32xbf16>, vector<32x64xbf16>, vector<41x64xf32> -> vector<41x64xf32>
    %77 = arith.addf %72, %76 : vector<41x64xf32>
    %c28 = arith.constant 28 : index
    %c0_55 = arith.constant 0 : index
    %78 = vector.load %arg12[%c28, %c0_55] : memref<162x32xf32, #tpu.memory_space<vmem>>, vector<41x32xf32>
    %c416 = arith.constant 416 : index
    %c0_56 = arith.constant 0 : index
    %79 = vector.load %arg5[%c416, %c0_56] : memref<512x64xbf16, #tpu.memory_space<vmem>>, vector<32x64xbf16>
    %80 = arith.truncf %78 : vector<41x32xf32> to vector<41x32xbf16>
    %cst_57 = arith.constant dense<0.000000e+00> : vector<41x64xf32>
    %81 = tpu.matmul %80, %79, %cst_57 {dimension_numbers = #tpu.dot_dimension_numbers<[1], [0], [0], [1], [0, 0, 1, 1], [], []>} : vector<41x32xbf16>, vector<32x64xbf16>, vector<41x64xf32> -> vector<41x64xf32>
    %82 = arith.addf %77, %81 : vector<41x64xf32>
    %c29 = arith.constant 29 : index
    %c0_58 = arith.constant 0 : index
    %83 = vector.load %arg12[%c29, %c0_58] : memref<162x32xf32, #tpu.memory_space<vmem>>, vector<41x32xf32>
    %c448 = arith.constant 448 : index
    %c0_59 = arith.constant 0 : index
    %84 = vector.load %arg5[%c448, %c0_59] : memref<512x64xbf16, #tpu.memory_space<vmem>>, vector<32x64xbf16>
    %85 = arith.truncf %83 : vector<41x32xf32> to vector<41x32xbf16>
    %cst_60 = arith.constant dense<0.000000e+00> : vector<41x64xf32>
    %86 = tpu.matmul %85, %84, %cst_60 {dimension_numbers = #tpu.dot_dimension_numbers<[1], [0], [0], [1], [0, 0, 1, 1], [], []>} : vector<41x32xbf16>, vector<32x64xbf16>, vector<41x64xf32> -> vector<41x64xf32>
    %87 = arith.addf %82, %86 : vector<41x64xf32>
    %c30 = arith.constant 30 : index
    %c0_61 = arith.constant 0 : index
    %88 = vector.load %arg12[%c30, %c0_61] : memref<162x32xf32, #tpu.memory_space<vmem>>, vector<41x32xf32>
    %c480 = arith.constant 480 : index
    %c0_62 = arith.constant 0 : index
    %89 = vector.load %arg5[%c480, %c0_62] : memref<512x64xbf16, #tpu.memory_space<vmem>>, vector<32x64xbf16>
    %90 = arith.truncf %88 : vector<41x32xf32> to vector<41x32xbf16>
    %cst_63 = arith.constant dense<0.000000e+00> : vector<41x64xf32>
    %91 = tpu.matmul %90, %89, %cst_63 {dimension_numbers = #tpu.dot_dimension_numbers<[1], [0], [0], [1], [0, 0, 1, 1], [], []>} : vector<41x32xbf16>, vector<32x64xbf16>, vector<41x64xf32> -> vector<41x64xf32>
    %92 = arith.addf %87, %91 : vector<41x64xf32>
    %cst_64 = arith.constant 0.000000e+00 : f32
    %93 = vector.broadcast %cst_64 : f32 to vector<1x64xf32>
    %94 = vector.extract_strided_slice %92 {offsets = [0, 0], sizes = [1, 64], strides = [1, 1]} : vector<41x64xf32> to vector<1x64xf32>
    %95 = arith.addf %94, %1 : vector<1x64xf32>
    %cst_65 = arith.constant 0.000000e+00 : f32
    %96 = vector.broadcast %cst_65 : f32 to vector<1x64xf32>
    %97 = arith.maximumf %95, %96 : vector<1x64xf32>
    %c0_66 = arith.constant 0 : index
    %c0_67 = arith.constant 0 : index
    %98 = vector.load %arg7[%c0_66, %c0_67] : memref<576x64xbf16, #tpu.memory_space<vmem>>, vector<64x64xbf16>
    %99 = arith.truncf %97 : vector<1x64xf32> to vector<1x64xbf16>
    %cst_68 = arith.constant dense<0.000000e+00> : vector<1x64xf32>
    %100 = tpu.matmul %99, %98, %cst_68 {dimension_numbers = #tpu.dot_dimension_numbers<[1], [0], [0], [1], [0, 0, 1, 1], [], []>} : vector<1x64xbf16>, vector<64x64xbf16>, vector<1x64xf32> -> vector<1x64xf32>
    %101 = arith.addf %93, %100 : vector<1x64xf32>
    %102 = vector.extract_strided_slice %92 {offsets = [2, 0], sizes = [1, 64], strides = [1, 1]} : vector<41x64xf32> to vector<1x64xf32>
    %103 = arith.addf %102, %1 : vector<1x64xf32>
    %cst_69 = arith.constant 0.000000e+00 : f32
    %104 = vector.broadcast %cst_69 : f32 to vector<1x64xf32>
    %105 = arith.maximumf %103, %104 : vector<1x64xf32>
    %c64_70 = arith.constant 64 : index
    %c0_71 = arith.constant 0 : index
    %106 = vector.load %arg7[%c64_70, %c0_71] : memref<576x64xbf16, #tpu.memory_space<vmem>>, vector<64x64xbf16>
    %107 = arith.truncf %105 : vector<1x64xf32> to vector<1x64xbf16>
    %cst_72 = arith.constant dense<0.000000e+00> : vector<1x64xf32>
    %108 = tpu.matmul %107, %106, %cst_72 {dimension_numbers = #tpu.dot_dimension_numbers<[1], [0], [0], [1], [0, 0, 1, 1], [], []>} : vector<1x64xbf16>, vector<64x64xbf16>, vector<1x64xf32> -> vector<1x64xf32>
    %109 = arith.addf %101, %108 : vector<1x64xf32>
    %110 = vector.extract_strided_slice %92 {offsets = [4, 0], sizes = [1, 64], strides = [1, 1]} : vector<41x64xf32> to vector<1x64xf32>
    %111 = arith.addf %110, %1 : vector<1x64xf32>
    %cst_73 = arith.constant 0.000000e+00 : f32
    %112 = vector.broadcast %cst_73 : f32 to vector<1x64xf32>
    %113 = arith.maximumf %111, %112 : vector<1x64xf32>
    %c128_74 = arith.constant 128 : index
    %c0_75 = arith.constant 0 : index
    %114 = vector.load %arg7[%c128_74, %c0_75] : memref<576x64xbf16, #tpu.memory_space<vmem>>, vector<64x64xbf16>
    %115 = arith.truncf %113 : vector<1x64xf32> to vector<1x64xbf16>
    %cst_76 = arith.constant dense<0.000000e+00> : vector<1x64xf32>
    %116 = tpu.matmul %115, %114, %cst_76 {dimension_numbers = #tpu.dot_dimension_numbers<[1], [0], [0], [1], [0, 0, 1, 1], [], []>} : vector<1x64xbf16>, vector<64x64xbf16>, vector<1x64xf32> -> vector<1x64xf32>
    %117 = arith.addf %109, %116 : vector<1x64xf32>
    %118 = vector.extract_strided_slice %92 {offsets = [18, 0], sizes = [1, 64], strides = [1, 1]} : vector<41x64xf32> to vector<1x64xf32>
    %119 = arith.addf %118, %1 : vector<1x64xf32>
    %cst_77 = arith.constant 0.000000e+00 : f32
    %120 = vector.broadcast %cst_77 : f32 to vector<1x64xf32>
    %121 = arith.maximumf %119, %120 : vector<1x64xf32>
    %c192_78 = arith.constant 192 : index
    %c0_79 = arith.constant 0 : index
    %122 = vector.load %arg7[%c192_78, %c0_79] : memref<576x64xbf16, #tpu.memory_space<vmem>>, vector<64x64xbf16>
    %123 = arith.truncf %121 : vector<1x64xf32> to vector<1x64xbf16>
    %cst_80 = arith.constant dense<0.000000e+00> : vector<1x64xf32>
    %124 = tpu.matmul %123, %122, %cst_80 {dimension_numbers = #tpu.dot_dimension_numbers<[1], [0], [0], [1], [0, 0, 1, 1], [], []>} : vector<1x64xbf16>, vector<64x64xbf16>, vector<1x64xf32> -> vector<1x64xf32>
    %125 = arith.addf %117, %124 : vector<1x64xf32>
    %126 = vector.extract_strided_slice %92 {offsets = [20, 0], sizes = [1, 64], strides = [1, 1]} : vector<41x64xf32> to vector<1x64xf32>
    %127 = arith.addf %126, %1 : vector<1x64xf32>
    %cst_81 = arith.constant 0.000000e+00 : f32
    %128 = vector.broadcast %cst_81 : f32 to vector<1x64xf32>
    %129 = arith.maximumf %127, %128 : vector<1x64xf32>
    %c256_82 = arith.constant 256 : index
    %c0_83 = arith.constant 0 : index
    %130 = vector.load %arg7[%c256_82, %c0_83] : memref<576x64xbf16, #tpu.memory_space<vmem>>, vector<64x64xbf16>
    %131 = arith.truncf %129 : vector<1x64xf32> to vector<1x64xbf16>
    %cst_84 = arith.constant dense<0.000000e+00> : vector<1x64xf32>
    %132 = tpu.matmul %131, %130, %cst_84 {dimension_numbers = #tpu.dot_dimension_numbers<[1], [0], [0], [1], [0, 0, 1, 1], [], []>} : vector<1x64xbf16>, vector<64x64xbf16>, vector<1x64xf32> -> vector<1x64xf32>
    %133 = arith.addf %125, %132 : vector<1x64xf32>
    %134 = vector.extract_strided_slice %92 {offsets = [22, 0], sizes = [1, 64], strides = [1, 1]} : vector<41x64xf32> to vector<1x64xf32>
    %135 = arith.addf %134, %1 : vector<1x64xf32>
    %cst_85 = arith.constant 0.000000e+00 : f32
    %136 = vector.broadcast %cst_85 : f32 to vector<1x64xf32>
    %137 = arith.maximumf %135, %136 : vector<1x64xf32>
    %c320_86 = arith.constant 320 : index
    %c0_87 = arith.constant 0 : index
    %138 = vector.load %arg7[%c320_86, %c0_87] : memref<576x64xbf16, #tpu.memory_space<vmem>>, vector<64x64xbf16>
    %139 = arith.truncf %137 : vector<1x64xf32> to vector<1x64xbf16>
    %cst_88 = arith.constant dense<0.000000e+00> : vector<1x64xf32>
    %140 = tpu.matmul %139, %138, %cst_88 {dimension_numbers = #tpu.dot_dimension_numbers<[1], [0], [0], [1], [0, 0, 1, 1], [], []>} : vector<1x64xbf16>, vector<64x64xbf16>, vector<1x64xf32> -> vector<1x64xf32>
    %141 = arith.addf %133, %140 : vector<1x64xf32>
    %142 = vector.extract_strided_slice %92 {offsets = [36, 0], sizes = [1, 64], strides = [1, 1]} : vector<41x64xf32> to vector<1x64xf32>
    %143 = arith.addf %142, %1 : vector<1x64xf32>
    %cst_89 = arith.constant 0.000000e+00 : f32
    %144 = vector.broadcast %cst_89 : f32 to vector<1x64xf32>
    %145 = arith.maximumf %143, %144 : vector<1x64xf32>
    %c384_90 = arith.constant 384 : index
    %c0_91 = arith.constant 0 : index
    %146 = vector.load %arg7[%c384_90, %c0_91] : memref<576x64xbf16, #tpu.memory_space<vmem>>, vector<64x64xbf16>
    %147 = arith.truncf %145 : vector<1x64xf32> to vector<1x64xbf16>
    %cst_92 = arith.constant dense<0.000000e+00> : vector<1x64xf32>
    %148 = tpu.matmul %147, %146, %cst_92 {dimension_numbers = #tpu.dot_dimension_numbers<[1], [0], [0], [1], [0, 0, 1, 1], [], []>} : vector<1x64xbf16>, vector<64x64xbf16>, vector<1x64xf32> -> vector<1x64xf32>
    %149 = arith.addf %141, %148 : vector<1x64xf32>
    %150 = vector.extract_strided_slice %92 {offsets = [38, 0], sizes = [1, 64], strides = [1, 1]} : vector<41x64xf32> to vector<1x64xf32>
    %151 = arith.addf %150, %1 : vector<1x64xf32>
    %cst_93 = arith.constant 0.000000e+00 : f32
    %152 = vector.broadcast %cst_93 : f32 to vector<1x64xf32>
    %153 = arith.maximumf %151, %152 : vector<1x64xf32>
    %c448_94 = arith.constant 448 : index
    %c0_95 = arith.constant 0 : index
    %154 = vector.load %arg7[%c448_94, %c0_95] : memref<576x64xbf16, #tpu.memory_space<vmem>>, vector<64x64xbf16>
    %155 = arith.truncf %153 : vector<1x64xf32> to vector<1x64xbf16>
    %cst_96 = arith.constant dense<0.000000e+00> : vector<1x64xf32>
    %156 = tpu.matmul %155, %154, %cst_96 {dimension_numbers = #tpu.dot_dimension_numbers<[1], [0], [0], [1], [0, 0, 1, 1], [], []>} : vector<1x64xbf16>, vector<64x64xbf16>, vector<1x64xf32> -> vector<1x64xf32>
    %157 = arith.addf %149, %156 : vector<1x64xf32>
    %158 = vector.extract_strided_slice %92 {offsets = [40, 0], sizes = [1, 64], strides = [1, 1]} : vector<41x64xf32> to vector<1x64xf32>
    %159 = arith.addf %158, %1 : vector<1x64xf32>
    %cst_97 = arith.constant 0.000000e+00 : f32
    %160 = vector.broadcast %cst_97 : f32 to vector<1x64xf32>
    %161 = arith.maximumf %159, %160 : vector<1x64xf32>
    %c512 = arith.constant 512 : index
    %c0_98 = arith.constant 0 : index
    %162 = vector.load %arg7[%c512, %c0_98] : memref<576x64xbf16, #tpu.memory_space<vmem>>, vector<64x64xbf16>
    %163 = arith.truncf %161 : vector<1x64xf32> to vector<1x64xbf16>
    %cst_99 = arith.constant dense<0.000000e+00> : vector<1x64xf32>
    %164 = tpu.matmul %163, %162, %cst_99 {dimension_numbers = #tpu.dot_dimension_numbers<[1], [0], [0], [1], [0, 0, 1, 1], [], []>} : vector<1x64xbf16>, vector<64x64xbf16>, vector<1x64xf32> -> vector<1x64xf32>
    %165 = arith.addf %157, %164 : vector<1x64xf32>
    %166 = arith.addf %165, %2 : vector<1x64xf32>
    %cst_100 = arith.constant 0.000000e+00 : f32
    %167 = vector.broadcast %cst_100 : f32 to vector<1x64xf32>
    %168 = arith.maximumf %166, %167 : vector<1x64xf32>
    %cst_101 = arith.constant 0.000000e+00 : f32
    %169 = vector.broadcast %cst_101 : f32 to vector<41x64xf32>
    %c81 = arith.constant 81 : index
    %c0_102 = arith.constant 0 : index
    %170 = vector.load %arg12[%c81, %c0_102] : memref<162x32xf32, #tpu.memory_space<vmem>>, vector<41x32xf32>
    %c0_103 = arith.constant 0 : index
    %c0_104 = arith.constant 0 : index
    %171 = vector.load %arg5[%c0_103, %c0_104] : memref<512x64xbf16, #tpu.memory_space<vmem>>, vector<32x64xbf16>
    %172 = arith.truncf %170 : vector<41x32xf32> to vector<41x32xbf16>
    %cst_105 = arith.constant dense<0.000000e+00> : vector<41x64xf32>
    %173 = tpu.matmul %172, %171, %cst_105 {dimension_numbers = #tpu.dot_dimension_numbers<[1], [0], [0], [1], [0, 0, 1, 1], [], []>} : vector<41x32xbf16>, vector<32x64xbf16>, vector<41x64xf32> -> vector<41x64xf32>
    %174 = arith.addf %169, %173 : vector<41x64xf32>
    %c82 = arith.constant 82 : index
    %c0_106 = arith.constant 0 : index
    %175 = vector.load %arg12[%c82, %c0_106] : memref<162x32xf32, #tpu.memory_space<vmem>>, vector<41x32xf32>
    %c32_107 = arith.constant 32 : index
    %c0_108 = arith.constant 0 : index
    %176 = vector.load %arg5[%c32_107, %c0_108] : memref<512x64xbf16, #tpu.memory_space<vmem>>, vector<32x64xbf16>
    %177 = arith.truncf %175 : vector<41x32xf32> to vector<41x32xbf16>
    %cst_109 = arith.constant dense<0.000000e+00> : vector<41x64xf32>
    %178 = tpu.matmul %177, %176, %cst_109 {dimension_numbers = #tpu.dot_dimension_numbers<[1], [0], [0], [1], [0, 0, 1, 1], [], []>} : vector<41x32xbf16>, vector<32x64xbf16>, vector<41x64xf32> -> vector<41x64xf32>
    %179 = arith.addf %174, %178 : vector<41x64xf32>
    %c83 = arith.constant 83 : index
    %c0_110 = arith.constant 0 : index
    %180 = vector.load %arg12[%c83, %c0_110] : memref<162x32xf32, #tpu.memory_space<vmem>>, vector<41x32xf32>
    %c64_111 = arith.constant 64 : index
    %c0_112 = arith.constant 0 : index
    %181 = vector.load %arg5[%c64_111, %c0_112] : memref<512x64xbf16, #tpu.memory_space<vmem>>, vector<32x64xbf16>
    %182 = arith.truncf %180 : vector<41x32xf32> to vector<41x32xbf16>
    %cst_113 = arith.constant dense<0.000000e+00> : vector<41x64xf32>
    %183 = tpu.matmul %182, %181, %cst_113 {dimension_numbers = #tpu.dot_dimension_numbers<[1], [0], [0], [1], [0, 0, 1, 1], [], []>} : vector<41x32xbf16>, vector<32x64xbf16>, vector<41x64xf32> -> vector<41x64xf32>
    %184 = arith.addf %179, %183 : vector<41x64xf32>
    %c84 = arith.constant 84 : index
    %c0_114 = arith.constant 0 : index
    %185 = vector.load %arg12[%c84, %c0_114] : memref<162x32xf32, #tpu.memory_space<vmem>>, vector<41x32xf32>
    %c96_115 = arith.constant 96 : index
    %c0_116 = arith.constant 0 : index
    %186 = vector.load %arg5[%c96_115, %c0_116] : memref<512x64xbf16, #tpu.memory_space<vmem>>, vector<32x64xbf16>
    %187 = arith.truncf %185 : vector<41x32xf32> to vector<41x32xbf16>
    %cst_117 = arith.constant dense<0.000000e+00> : vector<41x64xf32>
    %188 = tpu.matmul %187, %186, %cst_117 {dimension_numbers = #tpu.dot_dimension_numbers<[1], [0], [0], [1], [0, 0, 1, 1], [], []>} : vector<41x32xbf16>, vector<32x64xbf16>, vector<41x64xf32> -> vector<41x64xf32>
    %189 = arith.addf %184, %188 : vector<41x64xf32>
    %c90 = arith.constant 90 : index
    %c0_118 = arith.constant 0 : index
    %190 = vector.load %arg12[%c90, %c0_118] : memref<162x32xf32, #tpu.memory_space<vmem>>, vector<41x32xf32>
    %c128_119 = arith.constant 128 : index
    %c0_120 = arith.constant 0 : index
    %191 = vector.load %arg5[%c128_119, %c0_120] : memref<512x64xbf16, #tpu.memory_space<vmem>>, vector<32x64xbf16>
    %192 = arith.truncf %190 : vector<41x32xf32> to vector<41x32xbf16>
    %cst_121 = arith.constant dense<0.000000e+00> : vector<41x64xf32>
    %193 = tpu.matmul %192, %191, %cst_121 {dimension_numbers = #tpu.dot_dimension_numbers<[1], [0], [0], [1], [0, 0, 1, 1], [], []>} : vector<41x32xbf16>, vector<32x64xbf16>, vector<41x64xf32> -> vector<41x64xf32>
    %194 = arith.addf %189, %193 : vector<41x64xf32>
    %c91 = arith.constant 91 : index
    %c0_122 = arith.constant 0 : index
    %195 = vector.load %arg12[%c91, %c0_122] : memref<162x32xf32, #tpu.memory_space<vmem>>, vector<41x32xf32>
    %c160_123 = arith.constant 160 : index
    %c0_124 = arith.constant 0 : index
    %196 = vector.load %arg5[%c160_123, %c0_124] : memref<512x64xbf16, #tpu.memory_space<vmem>>, vector<32x64xbf16>
    %197 = arith.truncf %195 : vector<41x32xf32> to vector<41x32xbf16>
    %cst_125 = arith.constant dense<0.000000e+00> : vector<41x64xf32>
    %198 = tpu.matmul %197, %196, %cst_125 {dimension_numbers = #tpu.dot_dimension_numbers<[1], [0], [0], [1], [0, 0, 1, 1], [], []>} : vector<41x32xbf16>, vector<32x64xbf16>, vector<41x64xf32> -> vector<41x64xf32>
    %199 = arith.addf %194, %198 : vector<41x64xf32>
    %c92 = arith.constant 92 : index
    %c0_126 = arith.constant 0 : index
    %200 = vector.load %arg12[%c92, %c0_126] : memref<162x32xf32, #tpu.memory_space<vmem>>, vector<41x32xf32>
    %c192_127 = arith.constant 192 : index
    %c0_128 = arith.constant 0 : index
    %201 = vector.load %arg5[%c192_127, %c0_128] : memref<512x64xbf16, #tpu.memory_space<vmem>>, vector<32x64xbf16>
    %202 = arith.truncf %200 : vector<41x32xf32> to vector<41x32xbf16>
    %cst_129 = arith.constant dense<0.000000e+00> : vector<41x64xf32>
    %203 = tpu.matmul %202, %201, %cst_129 {dimension_numbers = #tpu.dot_dimension_numbers<[1], [0], [0], [1], [0, 0, 1, 1], [], []>} : vector<41x32xbf16>, vector<32x64xbf16>, vector<41x64xf32> -> vector<41x64xf32>
    %204 = arith.addf %199, %203 : vector<41x64xf32>
    %c93 = arith.constant 93 : index
    %c0_130 = arith.constant 0 : index
    %205 = vector.load %arg12[%c93, %c0_130] : memref<162x32xf32, #tpu.memory_space<vmem>>, vector<41x32xf32>
    %c224_131 = arith.constant 224 : index
    %c0_132 = arith.constant 0 : index
    %206 = vector.load %arg5[%c224_131, %c0_132] : memref<512x64xbf16, #tpu.memory_space<vmem>>, vector<32x64xbf16>
    %207 = arith.truncf %205 : vector<41x32xf32> to vector<41x32xbf16>
    %cst_133 = arith.constant dense<0.000000e+00> : vector<41x64xf32>
    %208 = tpu.matmul %207, %206, %cst_133 {dimension_numbers = #tpu.dot_dimension_numbers<[1], [0], [0], [1], [0, 0, 1, 1], [], []>} : vector<41x32xbf16>, vector<32x64xbf16>, vector<41x64xf32> -> vector<41x64xf32>
    %209 = arith.addf %204, %208 : vector<41x64xf32>
    %c99 = arith.constant 99 : index
    %c0_134 = arith.constant 0 : index
    %210 = vector.load %arg12[%c99, %c0_134] : memref<162x32xf32, #tpu.memory_space<vmem>>, vector<41x32xf32>
    %c256_135 = arith.constant 256 : index
    %c0_136 = arith.constant 0 : index
    %211 = vector.load %arg5[%c256_135, %c0_136] : memref<512x64xbf16, #tpu.memory_space<vmem>>, vector<32x64xbf16>
    %212 = arith.truncf %210 : vector<41x32xf32> to vector<41x32xbf16>
    %cst_137 = arith.constant dense<0.000000e+00> : vector<41x64xf32>
    %213 = tpu.matmul %212, %211, %cst_137 {dimension_numbers = #tpu.dot_dimension_numbers<[1], [0], [0], [1], [0, 0, 1, 1], [], []>} : vector<41x32xbf16>, vector<32x64xbf16>, vector<41x64xf32> -> vector<41x64xf32>
    %214 = arith.addf %209, %213 : vector<41x64xf32>
    %c100 = arith.constant 100 : index
    %c0_138 = arith.constant 0 : index
    %215 = vector.load %arg12[%c100, %c0_138] : memref<162x32xf32, #tpu.memory_space<vmem>>, vector<41x32xf32>
    %c288_139 = arith.constant 288 : index
    %c0_140 = arith.constant 0 : index
    %216 = vector.load %arg5[%c288_139, %c0_140] : memref<512x64xbf16, #tpu.memory_space<vmem>>, vector<32x64xbf16>
    %217 = arith.truncf %215 : vector<41x32xf32> to vector<41x32xbf16>
    %cst_141 = arith.constant dense<0.000000e+00> : vector<41x64xf32>
    %218 = tpu.matmul %217, %216, %cst_141 {dimension_numbers = #tpu.dot_dimension_numbers<[1], [0], [0], [1], [0, 0, 1, 1], [], []>} : vector<41x32xbf16>, vector<32x64xbf16>, vector<41x64xf32> -> vector<41x64xf32>
    %219 = arith.addf %214, %218 : vector<41x64xf32>
    %c101 = arith.constant 101 : index
    %c0_142 = arith.constant 0 : index
    %220 = vector.load %arg12[%c101, %c0_142] : memref<162x32xf32, #tpu.memory_space<vmem>>, vector<41x32xf32>
    %c320_143 = arith.constant 320 : index
    %c0_144 = arith.constant 0 : index
    %221 = vector.load %arg5[%c320_143, %c0_144] : memref<512x64xbf16, #tpu.memory_space<vmem>>, vector<32x64xbf16>
    %222 = arith.truncf %220 : vector<41x32xf32> to vector<41x32xbf16>
    %cst_145 = arith.constant dense<0.000000e+00> : vector<41x64xf32>
    %223 = tpu.matmul %222, %221, %cst_145 {dimension_numbers = #tpu.dot_dimension_numbers<[1], [0], [0], [1], [0, 0, 1, 1], [], []>} : vector<41x32xbf16>, vector<32x64xbf16>, vector<41x64xf32> -> vector<41x64xf32>
    %224 = arith.addf %219, %223 : vector<41x64xf32>
    %c102 = arith.constant 102 : index
    %c0_146 = arith.constant 0 : index
    %225 = vector.load %arg12[%c102, %c0_146] : memref<162x32xf32, #tpu.memory_space<vmem>>, vector<41x32xf32>
    %c352_147 = arith.constant 352 : index
    %c0_148 = arith.constant 0 : index
    %226 = vector.load %arg5[%c352_147, %c0_148] : memref<512x64xbf16, #tpu.memory_space<vmem>>, vector<32x64xbf16>
    %227 = arith.truncf %225 : vector<41x32xf32> to vector<41x32xbf16>
    %cst_149 = arith.constant dense<0.000000e+00> : vector<41x64xf32>
    %228 = tpu.matmul %227, %226, %cst_149 {dimension_numbers = #tpu.dot_dimension_numbers<[1], [0], [0], [1], [0, 0, 1, 1], [], []>} : vector<41x32xbf16>, vector<32x64xbf16>, vector<41x64xf32> -> vector<41x64xf32>
    %229 = arith.addf %224, %228 : vector<41x64xf32>
    %c108 = arith.constant 108 : index
    %c0_150 = arith.constant 0 : index
    %230 = vector.load %arg12[%c108, %c0_150] : memref<162x32xf32, #tpu.memory_space<vmem>>, vector<41x32xf32>
    %c384_151 = arith.constant 384 : index
    %c0_152 = arith.constant 0 : index
    %231 = vector.load %arg5[%c384_151, %c0_152] : memref<512x64xbf16, #tpu.memory_space<vmem>>, vector<32x64xbf16>
    %232 = arith.truncf %230 : vector<41x32xf32> to vector<41x32xbf16>
    %cst_153 = arith.constant dense<0.000000e+00> : vector<41x64xf32>
    %233 = tpu.matmul %232, %231, %cst_153 {dimension_numbers = #tpu.dot_dimension_numbers<[1], [0], [0], [1], [0, 0, 1, 1], [], []>} : vector<41x32xbf16>, vector<32x64xbf16>, vector<41x64xf32> -> vector<41x64xf32>
    %234 = arith.addf %229, %233 : vector<41x64xf32>
    %c109 = arith.constant 109 : index
    %c0_154 = arith.constant 0 : index
    %235 = vector.load %arg12[%c109, %c0_154] : memref<162x32xf32, #tpu.memory_space<vmem>>, vector<41x32xf32>
    %c416_155 = arith.constant 416 : index
    %c0_156 = arith.constant 0 : index
    %236 = vector.load %arg5[%c416_155, %c0_156] : memref<512x64xbf16, #tpu.memory_space<vmem>>, vector<32x64xbf16>
    %237 = arith.truncf %235 : vector<41x32xf32> to vector<41x32xbf16>
    %cst_157 = arith.constant dense<0.000000e+00> : vector<41x64xf32>
    %238 = tpu.matmul %237, %236, %cst_157 {dimension_numbers = #tpu.dot_dimension_numbers<[1], [0], [0], [1], [0, 0, 1, 1], [], []>} : vector<41x32xbf16>, vector<32x64xbf16>, vector<41x64xf32> -> vector<41x64xf32>
    %239 = arith.addf %234, %238 : vector<41x64xf32>
    %c110 = arith.constant 110 : index
    %c0_158 = arith.constant 0 : index
    %240 = vector.load %arg12[%c110, %c0_158] : memref<162x32xf32, #tpu.memory_space<vmem>>, vector<41x32xf32>
    %c448_159 = arith.constant 448 : index
    %c0_160 = arith.constant 0 : index
    %241 = vector.load %arg5[%c448_159, %c0_160] : memref<512x64xbf16, #tpu.memory_space<vmem>>, vector<32x64xbf16>
    %242 = arith.truncf %240 : vector<41x32xf32> to vector<41x32xbf16>
    %cst_161 = arith.constant dense<0.000000e+00> : vector<41x64xf32>
    %243 = tpu.matmul %242, %241, %cst_161 {dimension_numbers = #tpu.dot_dimension_numbers<[1], [0], [0], [1], [0, 0, 1, 1], [], []>} : vector<41x32xbf16>, vector<32x64xbf16>, vector<41x64xf32> -> vector<41x64xf32>
    %244 = arith.addf %239, %243 : vector<41x64xf32>
    %c111 = arith.constant 111 : index
    %c0_162 = arith.constant 0 : index
    %245 = vector.load %arg12[%c111, %c0_162] : memref<162x32xf32, #tpu.memory_space<vmem>>, vector<41x32xf32>
    %c480_163 = arith.constant 480 : index
    %c0_164 = arith.constant 0 : index
    %246 = vector.load %arg5[%c480_163, %c0_164] : memref<512x64xbf16, #tpu.memory_space<vmem>>, vector<32x64xbf16>
    %247 = arith.truncf %245 : vector<41x32xf32> to vector<41x32xbf16>
    %cst_165 = arith.constant dense<0.000000e+00> : vector<41x64xf32>
    %248 = tpu.matmul %247, %246, %cst_165 {dimension_numbers = #tpu.dot_dimension_numbers<[1], [0], [0], [1], [0, 0, 1, 1], [], []>} : vector<41x32xbf16>, vector<32x64xbf16>, vector<41x64xf32> -> vector<41x64xf32>
    %249 = arith.addf %244, %248 : vector<41x64xf32>
    %cst_166 = arith.constant 0.000000e+00 : f32
    %250 = vector.broadcast %cst_166 : f32 to vector<1x64xf32>
    %251 = vector.extract_strided_slice %249 {offsets = [0, 0], sizes = [1, 64], strides = [1, 1]} : vector<41x64xf32> to vector<1x64xf32>
    %252 = arith.addf %251, %1 : vector<1x64xf32>
    %cst_167 = arith.constant 0.000000e+00 : f32
    %253 = vector.broadcast %cst_167 : f32 to vector<1x64xf32>
    %254 = arith.maximumf %252, %253 : vector<1x64xf32>
    %c0_168 = arith.constant 0 : index
    %c0_169 = arith.constant 0 : index
    %255 = vector.load %arg7[%c0_168, %c0_169] : memref<576x64xbf16, #tpu.memory_space<vmem>>, vector<64x64xbf16>
    %256 = arith.truncf %254 : vector<1x64xf32> to vector<1x64xbf16>
    %cst_170 = arith.constant dense<0.000000e+00> : vector<1x64xf32>
    %257 = tpu.matmul %256, %255, %cst_170 {dimension_numbers = #tpu.dot_dimension_numbers<[1], [0], [0], [1], [0, 0, 1, 1], [], []>} : vector<1x64xbf16>, vector<64x64xbf16>, vector<1x64xf32> -> vector<1x64xf32>
    %258 = arith.addf %250, %257 : vector<1x64xf32>
    %259 = vector.extract_strided_slice %249 {offsets = [2, 0], sizes = [1, 64], strides = [1, 1]} : vector<41x64xf32> to vector<1x64xf32>
    %260 = arith.addf %259, %1 : vector<1x64xf32>
    %cst_171 = arith.constant 0.000000e+00 : f32
    %261 = vector.broadcast %cst_171 : f32 to vector<1x64xf32>
    %262 = arith.maximumf %260, %261 : vector<1x64xf32>
    %c64_172 = arith.constant 64 : index
    %c0_173 = arith.constant 0 : index
    %263 = vector.load %arg7[%c64_172, %c0_173] : memref<576x64xbf16, #tpu.memory_space<vmem>>, vector<64x64xbf16>
    %264 = arith.truncf %262 : vector<1x64xf32> to vector<1x64xbf16>
    %cst_174 = arith.constant dense<0.000000e+00> : vector<1x64xf32>
    %265 = tpu.matmul %264, %263, %cst_174 {dimension_numbers = #tpu.dot_dimension_numbers<[1], [0], [0], [1], [0, 0, 1, 1], [], []>} : vector<1x64xbf16>, vector<64x64xbf16>, vector<1x64xf32> -> vector<1x64xf32>
    %266 = arith.addf %258, %265 : vector<1x64xf32>
    %267 = vector.extract_strided_slice %249 {offsets = [4, 0], sizes = [1, 64], strides = [1, 1]} : vector<41x64xf32> to vector<1x64xf32>
    %268 = arith.addf %267, %1 : vector<1x64xf32>
    %cst_175 = arith.constant 0.000000e+00 : f32
    %269 = vector.broadcast %cst_175 : f32 to vector<1x64xf32>
    %270 = arith.maximumf %268, %269 : vector<1x64xf32>
    %c128_176 = arith.constant 128 : index
    %c0_177 = arith.constant 0 : index
    %271 = vector.load %arg7[%c128_176, %c0_177] : memref<576x64xbf16, #tpu.memory_space<vmem>>, vector<64x64xbf16>
    %272 = arith.truncf %270 : vector<1x64xf32> to vector<1x64xbf16>
    %cst_178 = arith.constant dense<0.000000e+00> : vector<1x64xf32>
    %273 = tpu.matmul %272, %271, %cst_178 {dimension_numbers = #tpu.dot_dimension_numbers<[1], [0], [0], [1], [0, 0, 1, 1], [], []>} : vector<1x64xbf16>, vector<64x64xbf16>, vector<1x64xf32> -> vector<1x64xf32>
    %274 = arith.addf %266, %273 : vector<1x64xf32>
    %275 = vector.extract_strided_slice %249 {offsets = [18, 0], sizes = [1, 64], strides = [1, 1]} : vector<41x64xf32> to vector<1x64xf32>
    %276 = arith.addf %275, %1 : vector<1x64xf32>
    %cst_179 = arith.constant 0.000000e+00 : f32
    %277 = vector.broadcast %cst_179 : f32 to vector<1x64xf32>
    %278 = arith.maximumf %276, %277 : vector<1x64xf32>
    %c192_180 = arith.constant 192 : index
    %c0_181 = arith.constant 0 : index
    %279 = vector.load %arg7[%c192_180, %c0_181] : memref<576x64xbf16, #tpu.memory_space<vmem>>, vector<64x64xbf16>
    %280 = arith.truncf %278 : vector<1x64xf32> to vector<1x64xbf16>
    %cst_182 = arith.constant dense<0.000000e+00> : vector<1x64xf32>
    %281 = tpu.matmul %280, %279, %cst_182 {dimension_numbers = #tpu.dot_dimension_numbers<[1], [0], [0], [1], [0, 0, 1, 1], [], []>} : vector<1x64xbf16>, vector<64x64xbf16>, vector<1x64xf32> -> vector<1x64xf32>
    %282 = arith.addf %274, %281 : vector<1x64xf32>
    %283 = vector.extract_strided_slice %249 {offsets = [20, 0], sizes = [1, 64], strides = [1, 1]} : vector<41x64xf32> to vector<1x64xf32>
    %284 = arith.addf %283, %1 : vector<1x64xf32>
    %cst_183 = arith.constant 0.000000e+00 : f32
    %285 = vector.broadcast %cst_183 : f32 to vector<1x64xf32>
    %286 = arith.maximumf %284, %285 : vector<1x64xf32>
    %c256_184 = arith.constant 256 : index
    %c0_185 = arith.constant 0 : index
    %287 = vector.load %arg7[%c256_184, %c0_185] : memref<576x64xbf16, #tpu.memory_space<vmem>>, vector<64x64xbf16>
    %288 = arith.truncf %286 : vector<1x64xf32> to vector<1x64xbf16>
    %cst_186 = arith.constant dense<0.000000e+00> : vector<1x64xf32>
    %289 = tpu.matmul %288, %287, %cst_186 {dimension_numbers = #tpu.dot_dimension_numbers<[1], [0], [0], [1], [0, 0, 1, 1], [], []>} : vector<1x64xbf16>, vector<64x64xbf16>, vector<1x64xf32> -> vector<1x64xf32>
    %290 = arith.addf %282, %289 : vector<1x64xf32>
    %291 = vector.extract_strided_slice %249 {offsets = [22, 0], sizes = [1, 64], strides = [1, 1]} : vector<41x64xf32> to vector<1x64xf32>
    %292 = arith.addf %291, %1 : vector<1x64xf32>
    %cst_187 = arith.constant 0.000000e+00 : f32
    %293 = vector.broadcast %cst_187 : f32 to vector<1x64xf32>
    %294 = arith.maximumf %292, %293 : vector<1x64xf32>
    %c320_188 = arith.constant 320 : index
    %c0_189 = arith.constant 0 : index
    %295 = vector.load %arg7[%c320_188, %c0_189] : memref<576x64xbf16, #tpu.memory_space<vmem>>, vector<64x64xbf16>
    %296 = arith.truncf %294 : vector<1x64xf32> to vector<1x64xbf16>
    %cst_190 = arith.constant dense<0.000000e+00> : vector<1x64xf32>
    %297 = tpu.matmul %296, %295, %cst_190 {dimension_numbers = #tpu.dot_dimension_numbers<[1], [0], [0], [1], [0, 0, 1, 1], [], []>} : vector<1x64xbf16>, vector<64x64xbf16>, vector<1x64xf32> -> vector<1x64xf32>
    %298 = arith.addf %290, %297 : vector<1x64xf32>
    %299 = vector.extract_strided_slice %249 {offsets = [36, 0], sizes = [1, 64], strides = [1, 1]} : vector<41x64xf32> to vector<1x64xf32>
    %300 = arith.addf %299, %1 : vector<1x64xf32>
    %cst_191 = arith.constant 0.000000e+00 : f32
    %301 = vector.broadcast %cst_191 : f32 to vector<1x64xf32>
    %302 = arith.maximumf %300, %301 : vector<1x64xf32>
    %c384_192 = arith.constant 384 : index
    %c0_193 = arith.constant 0 : index
    %303 = vector.load %arg7[%c384_192, %c0_193] : memref<576x64xbf16, #tpu.memory_space<vmem>>, vector<64x64xbf16>
    %304 = arith.truncf %302 : vector<1x64xf32> to vector<1x64xbf16>
    %cst_194 = arith.constant dense<0.000000e+00> : vector<1x64xf32>
    %305 = tpu.matmul %304, %303, %cst_194 {dimension_numbers = #tpu.dot_dimension_numbers<[1], [0], [0], [1], [0, 0, 1, 1], [], []>} : vector<1x64xbf16>, vector<64x64xbf16>, vector<1x64xf32> -> vector<1x64xf32>
    %306 = arith.addf %298, %305 : vector<1x64xf32>
    %307 = vector.extract_strided_slice %249 {offsets = [38, 0], sizes = [1, 64], strides = [1, 1]} : vector<41x64xf32> to vector<1x64xf32>
    %308 = arith.addf %307, %1 : vector<1x64xf32>
    %cst_195 = arith.constant 0.000000e+00 : f32
    %309 = vector.broadcast %cst_195 : f32 to vector<1x64xf32>
    %310 = arith.maximumf %308, %309 : vector<1x64xf32>
    %c448_196 = arith.constant 448 : index
    %c0_197 = arith.constant 0 : index
    %311 = vector.load %arg7[%c448_196, %c0_197] : memref<576x64xbf16, #tpu.memory_space<vmem>>, vector<64x64xbf16>
    %312 = arith.truncf %310 : vector<1x64xf32> to vector<1x64xbf16>
    %cst_198 = arith.constant dense<0.000000e+00> : vector<1x64xf32>
    %313 = tpu.matmul %312, %311, %cst_198 {dimension_numbers = #tpu.dot_dimension_numbers<[1], [0], [0], [1], [0, 0, 1, 1], [], []>} : vector<1x64xbf16>, vector<64x64xbf16>, vector<1x64xf32> -> vector<1x64xf32>
    %314 = arith.addf %306, %313 : vector<1x64xf32>
    %315 = vector.extract_strided_slice %249 {offsets = [40, 0], sizes = [1, 64], strides = [1, 1]} : vector<41x64xf32> to vector<1x64xf32>
    %316 = arith.addf %315, %1 : vector<1x64xf32>
    %cst_199 = arith.constant 0.000000e+00 : f32
    %317 = vector.broadcast %cst_199 : f32 to vector<1x64xf32>
    %318 = arith.maximumf %316, %317 : vector<1x64xf32>
    %c512_200 = arith.constant 512 : index
    %c0_201 = arith.constant 0 : index
    %319 = vector.load %arg7[%c512_200, %c0_201] : memref<576x64xbf16, #tpu.memory_space<vmem>>, vector<64x64xbf16>
    %320 = arith.truncf %318 : vector<1x64xf32> to vector<1x64xbf16>
    %cst_202 = arith.constant dense<0.000000e+00> : vector<1x64xf32>
    %321 = tpu.matmul %320, %319, %cst_202 {dimension_numbers = #tpu.dot_dimension_numbers<[1], [0], [0], [1], [0, 0, 1, 1], [], []>} : vector<1x64xbf16>, vector<64x64xbf16>, vector<1x64xf32> -> vector<1x64xf32>
    %322 = arith.addf %314, %321 : vector<1x64xf32>
    %323 = arith.addf %322, %2 : vector<1x64xf32>
    %cst_203 = arith.constant 0.000000e+00 : f32
    %324 = vector.broadcast %cst_203 : f32 to vector<1x64xf32>
    %325 = arith.maximumf %323, %324 : vector<1x64xf32>
    %326 = arith.truncf %168 : vector<1x64xf32> to vector<1x64xbf16>
    %327 = arith.truncf %325 : vector<1x64xf32> to vector<1x64xbf16>
    %c0_204 = arith.constant 0 : index
    %c0_205 = arith.constant 0 : index
    %c0_206 = arith.constant 0 : index
    %328 = vector.load %arg2[%c0_204, %c0_205, %c0_206] : memref<1x1x128xbf16, #tpu.memory_space<vmem>>, vector<1x1x128xbf16>
    %329 = vector.shape_cast %328 : vector<1x1x128xbf16> to vector<1x128xbf16>
    %330 = tpu.concatenate %326, %327, %329 in 1 : vector<1x64xbf16>, vector<1x64xbf16>, vector<1x128xbf16> -> vector<1x256xbf16>
    %c0_207 = arith.constant 0 : index
    %c0_208 = arith.constant 0 : index
    %331 = vector.load %arg9[%c0_207, %c0_208] : memref<256x128xbf16, #tpu.memory_space<vmem>>, vector<256x128xbf16>
    %cst_209 = arith.constant dense<0.000000e+00> : vector<1x128xf32>
    %332 = tpu.matmul %330, %331, %cst_209 {dimension_numbers = #tpu.dot_dimension_numbers<[1], [0], [0], [1], [0, 0, 1, 1], [], []>} : vector<1x256xbf16>, vector<256x128xbf16>, vector<1x128xf32> -> vector<1x128xf32>
    %c0_210 = arith.constant 0 : index
    %c0_211 = arith.constant 0 : index
    %333 = vector.load %arg10[%c0_210, %c0_211] : memref<1x128xf32, #tpu.memory_space<vmem>>, vector<1x128xf32>
    %334 = arith.addf %332, %333 : vector<1x128xf32>
    %335 = tpu.concatenate %325, %334 in 1 : vector<1x64xf32>, vector<1x128xf32> -> vector<1x192xf32>
    %c0_212 = arith.constant 0 : index
    %c0_213 = arith.constant 0 : index
    %c0_214 = arith.constant 0 : index
    %336 = vector.load %arg11[%c0_212, %c0_213, %c0_214] : memref<1x1x192xf32, #tpu.memory_space<vmem>>, vector<1x1x192xf32>
    %337 = vector.shape_cast %336 : vector<1x1x192xf32> to vector<1x192xf32>
    %338 = vector.shape_cast %335 : vector<1x192xf32> to vector<1x1x192xf32>
    tpu.vector_store %arg11[%c0_212, %c0_213, %c0_214], %338 {strides = array<i32>} : memref<1x1x192xf32, #tpu.memory_space<vmem>>, vector<1x1x192xf32>,
    return
  }
  func.func @transform_0(%arg0: i32) -> (i32, i32, i32) {
    %c0_i32 = arith.constant 0 : i32
    %c0_i32_0 = arith.constant 0 : i32
    %c0_i32_1 = arith.constant 0 : i32
    return %arg0, %c0_i32, %c0_i32_0 : i32, i32, i32
  }
  func.func @transform_1(%arg0: i32) -> (i32, i32, i32) {
    %c0_i32 = arith.constant 0 : i32
    %c0_i32_0 = arith.constant 0 : i32
    %c0_i32_1 = arith.constant 0 : i32
    return %arg0, %c0_i32, %c0_i32_0 : i32, i32, i32
  }
  func.func @transform_2(%arg0: i32) -> (i32, i32) {
    %c0_i32 = arith.constant 0 : i32
    %c0_i32_0 = arith.constant 0 : i32
    %c0_i32_1 = arith.constant 0 : i32
    return %c0_i32, %c0_i32_0 : i32, i32
  }
  func.func @transform_3(%arg0: i32) -> (i32, i32) {
    %c0_i32 = arith.constant 0 : i32
    %c0_i32_0 = arith.constant 0 : i32
    %c0_i32_1 = arith.constant 0 : i32
    return %c0_i32, %c0_i32_0 : i32, i32
  }
  func.func @transform_4(%arg0: i32) -> (i32, i32) {
    %c0_i32 = arith.constant 0 : i32
    %c0_i32_0 = arith.constant 0 : i32
    %c0_i32_1 = arith.constant 0 : i32
    return %c0_i32, %c0_i32_0 : i32, i32
  }
  func.func @transform_5(%arg0: i32) -> (i32, i32) {
    %c0_i32 = arith.constant 0 : i32
    %c0_i32_0 = arith.constant 0 : i32
    %c0_i32_1 = arith.constant 0 : i32
    return %c0_i32, %c0_i32_0 : i32, i32
  }
  func.func @transform_6(%arg0: i32) -> (i32, i32) {
    %c0_i32 = arith.constant 0 : i32
    %c0_i32_0 = arith.constant 0 : i32
    %c0_i32_1 = arith.constant 0 : i32
    return %c0_i32, %c0_i32_0 : i32, i32
  }
  func.func @transform_7(%arg0: i32) -> (i32, i32) {
    %c0_i32 = arith.constant 0 : i32
    %c0_i32_0 = arith.constant 0 : i32
    %c0_i32_1 = arith.constant 0 : i32
    return %c0_i32, %c0_i32_0 : i32, i32
  }
  func.func @transform_8(%arg0: i32) -> (i32, i32) {
    %c0_i32 = arith.constant 0 : i32
    %c0_i32_0 = arith.constant 0 : i32
    %c0_i32_1 = arith.constant 0 : i32
    return %c0_i32, %c0_i32_0 : i32, i32
  }
  func.func @transform_9(%arg0: i32) -> (i32, i32) {
    %c0_i32 = arith.constant 0 : i32
    %c0_i32_0 = arith.constant 0 : i32
    %c0_i32_1 = arith.constant 0 : i32
    return %c0_i32, %c0_i32_0 : i32, i32
  }
  func.func @transform_10(%arg0: i32) -> (i32, i32, i32) {
    %c0_i32 = arith.constant 0 : i32
    %c0_i32_0 = arith.constant 0 : i32
    %c0_i32_1 = arith.constant 0 : i32
    return %arg0, %c0_i32, %c0_i32_0 : i32, i32, i32
  }
}

</mosaic_0001>

<bundles_post_ra>
// kernel: icm_forward.1
= control target key start
LH: loop header
LB: loop body
LE: loop exit
PB: predicated region body
PF: predicated region fallthrough
CT: control target
= control target key end

     0   :  { %s6657_s13 = smov 0   ;;  %s8074_s0 = inlined_call_operand.vmem [shape: bf16[4,162,256], index: 0, kind: input, shape index: {}]   ;;  %s8075_s1 = inlined_call_operand.vmem [shape: bf16[4,1,128], index: 1, kind: input, shape index: {}]   ;;  %s8076_s2 = inlined_call_operand.vmem [shape: bf16[256,32], index: 2, kind: input, shape index: {}]   ;;  %s8077_s3 = inlined_call_operand.vmem [shape: f32[1,32], index: 3, kind: input, shape index: {}]   ;;  %s8078_s4 = inlined_call_operand.vmem [shape: bf16[512,64], index: 4, kind: input, shape index: {}]   ;;  %s8079_s5 = inlined_call_operand.vmem [shape: f32[1,64], index: 5, kind: input, shape index: {}]   ;;  %s8080_s6 = inlined_call_operand.vmem [shape: bf16[576,64], index: 6, kind: input, shape index: {}]   ;;  %s8081_s7 = inlined_call_operand.vmem [shape: f32[1,64], index: 7, kind: input, shape index: {}]   ;;  %s8082_s8 = inlined_call_operand.vmem [shape: bf16[256,128], index: 8, kind: input, shape index: {}]   ;;  %s8083_s9 = inlined_call_operand.vmem [shape: f32[1,128], index: 9, kind: input, shape index: {}]   ;;  %s8084_s10 = inlined_call_operand.vmem [shape: f32[4,1,192], index: 10, kind: output, shape index: {}]  }
   0x1 LB: > { %s4911_s14 = sadd.s32 4294967295, %s6596_s13   ;;  %p4915_p0 = scmp.ge.s32.totalorder %s6596_s13, 1  ;;  %s6596_s13 = sphi %s6657_s13, %s20_s13  }
   0x2   : > { %p320_p1 = scmp.lt.s32.totalorder %s6596_s13, 5 }
   0x4   : > { %p321_p2 = pnand %p4915_p0, %p320_p1 }
   0x5   : > { %v6388_v0 = vld [vmem:[%s8076_s2 + $0x40] sm:$0xff] (!%p321_p2)   ;;  %v6390_v2 = vld [vmem:[%s8076_s2 + $0x48] sm:$0xff] (!%p321_p2)   ;;  %p360_p3 = scmp.lt.s32.totalorder (!%p321_p2), %s4911_s14, 3  ;;  %v6392_v4 = vld [vmem:[%s8076_s2 + $0x50] sm:$0xff] (!%p321_p2)   ;;  %v6598_v38 = vmov (!%p321_p2), 0.0   ;;  %vm6599_vm0 = vmmov (!%p321_p2), 0  }
   0x6   : > { %324 = sbr.rel (%p321_p2) target bundleno = 2375 (0x947), region = 60  ;;  %v6389_v1 = vld [vmem:[%s8076_s2] sm:$0xff] (!%p321_p2)   ;;  %5157 = vmatprep.subr.bf16.mxu0 (!%p321_p2), %v6388_v0  ;;  %6239 = vmatprep.subr.bf16.mxu1 (!%p321_p2), %v6388_v0  ;;  %v6391_v3 = vld [vmem:[%s8076_s2 + $0x8] sm:$0xff] (!%p321_p2)   ;;  %v6393_v5 = vld [vmem:[%s8076_s2 + $0x10] sm:$0xff] (!%p321_p2)   ;;  %vm779_vm1 = vcmask (!%p321_p2), 261120   ;;  %vm2336_vm2 = vcmask (!%p321_p2), 523264  }
   0x7   : > { %5158 = vmatpush3.bf16.msra.mxu0 (!%p321_p2), %v6389_v1  ;;  %6247 = vmatpush3.bf16.msra.mxu1 (!%p321_p2), %v6389_v1  ;;  %v6394_v6 = vld [vmem:[%s8076_s2 + $0x58] sm:$0xff] (!%p321_p2)   ;;  %v6396_v8 = vld [vmem:[%s8076_s2 + $0x60] sm:$0xff] (!%p321_p2)   ;;  %v6398_v10 = vld [vmem:[%s8076_s2 + $0x68] sm:$0xff] (!%p321_p2)   ;;  %s6600_s16 = smov (!%p321_p2), 64  }
   0x8   : > { %5159 = vmatprep.subr.bf16.mxu0 (!%p321_p2), %v6390_v2  ;;  %6240 = vmatprep.subr.bf16.mxu1 (!%p321_p2), %v6390_v2  ;;  %v6395_v7 = vld [vmem:[%s8076_s2 + $0x18] sm:$0xff] (!%p321_p2)   ;;  %v6397_v9 = vld [vmem:[%s8076_s2 + $0x20] sm:$0xff] (!%p321_p2)   ;;  %v6399_v12 = vld [vmem:[%s8076_s2 + $0x28] sm:$0xff] (!%p321_p2)  }
   0x9   : > { %v6400_v13 = vld [vmem:[%s8076_s2 + $0x70] sm:$0xff] (!%p321_p2)   ;;  %v6402_v15 = vld [vmem:[%s8076_s2 + $0x78] sm:$0xff] (!%p321_p2)   ;;  %v6760_v45 = vld [vmem:[%s8077_s3] ss:$0 sm:$0xff] (!%p321_p2) }
   0xa   : > { %v6401_v14 = vld [vmem:[%s8076_s2 + $0x30] sm:$0xff] (!%p321_p2)   ;;  %v6403_v17 = vld [vmem:[%s8076_s2 + $0x38] sm:$0xff] (!%p321_p2)  }
   0xb   : > { %5160 = vmatpush3.bf16.msra.mxu0 (!%p321_p2), %v6391_v3  ;;  %6248 = vmatpush3.bf16.msra.mxu1 (!%p321_p2), %v6391_v3  ;;  %v6433_v39 = vld [vmem:[%s8078_s4 + $0x10] sm:$0xff] (!%p321_p2)   ;;  %v6436_v43 = vld [vmem:[%s8078_s4 + $0x18] sm:$0xff] (!%p321_p2)  }
   0xc   : > { %5161 = vmatprep.subr.bf16.mxu0 (!%p321_p2), %v6392_v4  ;;  %6241 = vmatprep.subr.bf16.mxu1 (!%p321_p2), %v6392_v4 }
   0xd   : > { %s8086_s14 = smov (!%p360_p3, %s4911_s14), 3 }
   0xe   : > { %s6375_s29 = smul.u32 168, %s8086_s14  ;;  %s367_s11 = scalar_lea.vmem %s8075_s1, %s8086_s14 }
   0xf   : > { %5162 = vmatpush3.bf16.msra.mxu0 %v6393_v5  ;;  %6249 = vmatpush3.bf16.msra.mxu1 %v6393_v5 }
  0x10   : > { %5163 = vmatprep.subr.bf16.mxu0 %v6394_v6  ;;  %6242 = vmatprep.subr.bf16.mxu1 %v6394_v6  ;;  %s6698_s18 = scalar_lea.vmem %s8074_s0, %s6375_s29 }
  0x11   : > { %v6406_v11 = vld [vmem:[%s6698_s18 + $0x4] ss:$8 sps:$4 sm:$0xff]   ;;  %v6404_v18 = vld [vmem:[%s6698_s18] ss:$8 sps:$4 sm:$0xff]   ;;  %v6407_v19 = vld [vmem:[%s6698_s18 + $0x14] ss:$8 sps:$4 sm:$0xff]  }
  0x12   : > { %670 = vmatprep.mubr.bf16.mxu0 %v6406_v11  ;;  %v6427_v16 = vld [vmem:[%s6698_s18 + $0x84] ss:$8 sps:$4 sm:$0xff]   ;;  %v6425_v20 = vld [vmem:[%s6698_s18 + $0x80] ss:$8 sps:$4 sm:$0xff]   ;;  %v6409_v21 = vld [vmem:[%s6698_s18 + $0x10] ss:$8 sps:$4 sm:$0xff]  }
  0x13   : > { %5164 = vmatpush3.bf16.msra.mxu0 %v6395_v7  ;;  %6250 = vmatpush3.bf16.msra.mxu1 %v6395_v7  ;;  %v6410_v22 = vld [vmem:[%s6698_s18 + $0x24] ss:$8 sps:$4 sm:$0xff]   ;;  %v6412_v23 = vld [vmem:[%s6698_s18 + $0x20] ss:$8 sps:$4 sm:$0xff]   ;;  %v6413_v24 = vld [vmem:[%s6698_s18 + $0x34] ss:$8 sps:$4 sm:$0xff]  }
  0x14   : > { %5165 = vmatprep.subr.bf16.mxu0 %v6396_v8  ;;  %6243 = vmatprep.subr.bf16.mxu1 %v6396_v8  ;;  %v6415_v25 = vld [vmem:[%s6698_s18 + $0x30] ss:$8 sps:$4 sm:$0xff]   ;;  %v6416_v26 = vld [vmem:[%s6698_s18 + $0x44] ss:$8 sps:$4 sm:$0xff]   ;;  %v6418_v27 = vld [vmem:[%s6698_s18 + $0x40] ss:$8 sps:$4 sm:$0xff]  }
  0x15   : > { %734 = vmatprep.mubr.bf16.mxu1 %v6427_v16  ;;  %v6419_v28 = vld [vmem:[%s6698_s18 + $0x54] ss:$8 sps:$4 sm:$0xff]   ;;  %v6421_v29 = vld [vmem:[%s6698_s18 + $0x50] ss:$8 sps:$4 sm:$0xff]   ;;  %v6422_v30 = vld [vmem:[%s6698_s18 + $0x64] ss:$8 sps:$4 sm:$0xff]  }
  0x16   : > { %v6424_v31 = vld [vmem:[%s6698_s18 + $0x60] ss:$8 sps:$4 sm:$0xff]   ;;  %v6428_v32 = vld [vmem:[%s6698_s18 + $0x74] ss:$8 sps:$4 sm:$0xff]   ;;  %v6430_v33 = vld [vmem:[%s6698_s18 + $0x70] ss:$8 sps:$4 sm:$0xff]  }
  0x17   : > { %5166 = vmatpush3.bf16.msra.mxu0 %v6397_v9  ;;  %6251 = vmatpush3.bf16.msra.mxu1 %v6397_v9  ;;  %v394_v34 = vld [vmem:[%s6698_s18 + $0x90] sm:$0xff]  ;;  %v395_v35 = vld [vmem:[%s6698_s18 + $0x98] sm:$0xff]  ;;  %v396_v40 = vld [vmem:[%s6698_s18 + $0xa0] sm:$0x11] }
  0x18   : > { %5167 = vmatprep.subr.bf16.mxu0 %v6398_v10  ;;  %6244 = vmatprep.subr.bf16.mxu1 %v6398_v10  ;;  %v6431_v36 = vld [vmem:[%s6698_s18 + $0x94] ss:$8 sps:$4 sm:$0xff]   ;;  %v4937_v37 = vcombine.low %v394_v34, %v395_v35  ;;  %v4940_v41 = vcombine.high %v396_v40, %v396_v40  ;;  %v4939_v42 = vcombine.low %v396_v40, %v396_v40  ;;  %s4917_s18 = sshll.u32 %s8086_s14, 1 }
  0x19   : > { %s371_s22 = scalar_lea.vmem %s8084_s10, %s4917_s18 }
  0x1b   : > { %5168 = vmatpush3.bf16.msra.mxu0 %v6399_v12  ;;  %6252 = vmatpush3.bf16.msra.mxu1 %v6399_v12  ;;  %v6437_v12 = vld [vmem:[%s8078_s4] sm:$0xff]  }
  0x1c   : > { %5169 = vmatprep.subr.bf16.mxu0 %v6400_v13  ;;  %6245 = vmatprep.subr.bf16.mxu1 %v6400_v13 }
  0x1f   : > { %5170 = vmatpush3.bf16.msra.mxu0 %v6401_v14  ;;  %6253 = vmatpush3.bf16.msra.mxu1 %v6401_v14 }
  0x20   : > { %5171 = vmatprep.subr.bf16.mxu0 %v6402_v15  ;;  %6246 = vmatprep.subr.bf16.mxu1 %v6402_v15 }
  0x23   : > { %5172 = vmatpush3.bf16.msra.mxu0 %v6403_v17  ;;  %6254 = vmatpush3.bf16.msra.mxu1 %v6403_v17 }
  0x24   : > { %5511 = vmatprep.subr.bf16.mxu1 %v6598_v38  ;;  %5767 = vmatprep.subr.bf16.mxu0 %v6598_v38 }
  0x26   : > { %671 = vmatmul.mubr.bf16.vlgmr.msra.gmra.mrb[0].mxu0 %v6404_v18  ;;  %735 = vmatmul.mubr.bf16.vlgmr.msra.gmra.mrb[0].mxu1 %v6425_v20 }
  0x27   : > { %678 = vmatprep.mubr.bf16.mxu0 %v6407_v19  ;;  %742 = vmatprep.mubr.bf16.mxu1 %v6431_v36 }
  0x28   : > { %5512 = vmatpush3.bf16.msra.mxu1 %v6433_v39 }
  0x29   : > { %5513 = vmatprep.subr.bf16.mxu1 %v6598_v38 }
  0x2c   : > { %5514 = vmatpush3.bf16.msra.mxu1 %v6436_v43 }
  0x2d   : > { %5527 = vmatprep.subr.bf16.mxu1 %v6598_v38 }
  0x2e   : > { %679 = vmatmul.mubr.bf16.gmra.mrb[4].mxu0 %v6409_v21  ;;  %743 = vmatmul.mubr.bf16.gmra.mrb[4].mxu1 %v4937_v37 }
  0x2f   : > { %686 = vmatprep.mubr.bf16.mxu0 %v6410_v22  ;;  %750 = vmatprep.mubr.bf16.mxu1 %v4940_v41 }
  0x36   : > { %687 = vmatmul.mubr.bf16.gmra.mrb[8].mxu0 %v6412_v23  ;;  %751 = vmatmul.mubr.bf16.gmra.mrb[8].mxu1 %v4939_v42 }
  0x37   : > { %694 = vmatprep.mubr.bf16.mxu0 %v6413_v24  ;;  %5515 = vmatprep.mubr.msk.bf16.mxu1 %vm6599_vm0, %v6598_v38 }
  0x3e   : > { %695 = vmatmul.mubr.bf16.gmra.mrb[12].mxu0 %v6415_v25 }
  0x3f   : > { %702 = vmatprep.mubr.bf16.mxu0 %v6416_v26 }
  0x46   : > { %703 = vmatmul.mubr.bf16.gmra.mrb[16].mxu0 %v6418_v27  ;;  %v6438_v27 = vld [vmem:[%s8078_s4 + $0x8] sm:$0xff]  }
  0x47   : > { %710 = vmatprep.mubr.bf16.mxu0 %v6419_v28 }
  0x4e   : > { %711 = vmatmul.mubr.bf16.gmra.mrb[20].mxu0 %v6421_v29 }
  0x4f   : > { %718 = vmatprep.mubr.bf16.mxu0 %v6422_v30 }
  0x56   : > { %719 = vmatmul.mubr.bf16.gmra.mrb[24].mxu0 %v6424_v31 }
  0x57   : > { %726 = vmatprep.mubr.bf16.mxu0 %v6428_v32 }
  0x5e   : > { %727 = vmatmul.mubr.bf16.gmra.mrb[28].mxu0 %v6430_v33 }
  0x5f   : > { %5775 = vmatprep.mubr.msk.bf16.mxu0 %vm6599_vm0, %v6598_v38 }
  0xf9   : > { %v5173_v44 = vpop.f32.mrb[0].mxu0 }
  0xfa   : > { %v5174_v46 = vpop.f32.mrb[1].mxu0 }
  0xfb   : > { %v5175_v47 = vadd.f32 %v5174_v46, %v5173_v44  ;;  %v5176_v48 = vpop.f32.mrb[2].mxu0 }
  0xfc   : > { %v5177_v49 = vpop.f32.mrb[3].mxu0 }
  0xfd   : > { %v673_v50 = vadd.f32 %v5175_v47, %v6760_v45  ;;  %v5178_v51 = vadd.f32 %v5177_v49, %v5176_v48 }
  0xff   : > { %v758_v52 = vmax.f32 %v673_v50, 0.0  ;;  %v676_v53 = vadd.f32 %v5178_v51, %v6760_v45 }
 0x101   : > { %780 = vst.msk [vmem:[#allocation2] sm:$0xff] %vm779_vm1, %v758_v52  ;;  %v759_v54 = vmax.f32 %v676_v53, 0.0  ;;  %v5179_v55 = vpop.f32.mrb[4].mxu0 }
 0x102   : > { %v5180_v56 = vpop.f32.mrb[5].mxu0 }
 0x103   : > { %781 = vst.msk [vmem:[#allocation2 + $0x8] sm:$0xff] %vm779_vm1, %v759_v54  ;;  %v5181_v57 = vadd.f32 %v5180_v56, %v5179_v55  ;;  %v5182_v58 = vpop.f32.mrb[6].mxu0 }
 0x104   : > { %v5183_v59 = vpop.f32.mrb[7].mxu0 }
 0x105   : > { %v681_v60 = vadd.f32 %v5181_v57, %v6760_v45  ;;  %v5184_v61 = vadd.f32 %v5183_v59, %v5182_v58 }
 0x107   : > { %v760_v62 = vmax.f32 %v681_v60, 0.0  ;;  %v684_v63 = vadd.f32 %v5184_v61, %v6760_v45 }
 0x109   : > { %782 = vst.msk [vmem:[#allocation2 + $0x10] sm:$0xff] %vm779_vm1, %v760_v62  ;;  %v761_v0 = vmax.f32 %v684_v63, 0.0  ;;  %v5185_v1 = vpop.f32.mrb[8].mxu0 }
 0x10a   : > { %v5186_v2 = vpop.f32.mrb[9].mxu0  ;;  %v815_v10 = vld [vmem:[#allocation2 + $0x1] sm:$0xff] }
 0x10b   : > { %783 = vst.msk [vmem:[#allocation2 + $0x18] sm:$0xff] %vm779_vm1, %v761_v0  ;;  %v5187_v3 = vadd.f32 %v5186_v2, %v5185_v1  ;;  %v5188_v4 = vpop.f32.mrb[10].mxu0 }
 0x10c   : > { %v5189_v5 = vpop.f32.mrb[11].mxu0 }
 0x10d   : > { %v689_v6 = vadd.f32 %v5187_v3, %v6760_v45  ;;  %v5190_v7 = vadd.f32 %v5189_v5, %v5188_v4 }
 0x10f   : > { %v762_v8 = vmax.f32 %v689_v6, 0.0  ;;  %v692_v9 = vadd.f32 %v5190_v7, %v6760_v45 }
 0x110   : > { %v6772_v11 = vld [vmem:[#allocation2 + $0x9] sm:$0xff] }
 0x111   : > { %784 = vst.msk [vmem:[#allocation2 + $0x20] sm:$0xff] %vm779_vm1, %v762_v8  ;;  %v763_v13 = vmax.f32 %v692_v9, 0.0  ;;  %v5191_v14 = vpop.f32.mrb[12].mxu0  ;;  %v825_v15 = vpack.c.bf16 %v6772_v11, %v815_v10  ;;  %v6781_v18 = vld [vmem:[#allocation2 + $0xa] sm:$0xff]  ;;  %v802_v10 = vld [vmem:[#allocation2] sm:$0xff] }
 0x112   : > { %v5192_v16 = vpop.f32.mrb[13].mxu0  ;;  %v6779_v17 = vld [vmem:[#allocation2 + $0x11] sm:$0xff]  ;;  %v803_v8 = vld [vmem:[#allocation2 + $0x8] sm:$0xff] }
 0x113   : > { %v6783_v19 = vld [vmem:[#allocation2 + $0x12] sm:$0xff]  ;;  %785 = vst.msk [vmem:[#allocation2 + $0x28] sm:$0xff] %vm779_vm1, %v763_v13  ;;  %v5193_v20 = vadd.f32 %v5192_v16, %v5191_v14  ;;  %v5194_v21 = vpop.f32.mrb[14].mxu0  ;;  %5516 = vmatmul.mubr.msk.bf16.vlgmr.msra.gmra.mrb[12].mxu1 %vm779_vm1, %v825_v15  ;;  %v1176_v24 = vpack.c.bf16 %v6779_v17, %v6772_v11  ;;  %v812_v13 = vpack.c.bf16 %v803_v8, %v802_v10  ;;  %v6440_v14 = vld [vmem:[%s8078_s4 + $0x28] sm:$0xff]  }
 0x114   : > { %v6787_v22 = vld [vmem:[#allocation2 + $0xb] sm:$0xff]  ;;  %v6789_v23 = vld [vmem:[#allocation2 + $0x13] sm:$0xff]  ;;  %v1269_v25 = vpack.c.bf16 %v6783_v19, %v6781_v18  ;;  %v5195_v26 = vpop.f32.mrb[15].mxu0  ;;  %5528 = vmatpush3.bf16.msra.mxu1 %v6437_v12  ;;  %5519 = vmatprep.mubr.msk.bf16.mxu1 %vm6599_vm0, %v6598_v38  ;;  %v6439_v12 = vld [vmem:[%s8078_s4 + $0x20] sm:$0xff]  }
 0x115   : > { %v1362_v28 = vpack.c.bf16 %v6789_v23, %v6787_v22  ;;  %v697_v29 = vadd.f32 %v5193_v20, %v6760_v45  ;;  %v5196_v30 = vadd.f32 %v5195_v26, %v5194_v21  ;;  %5529 = vmatprep.subr.bf16.mxu1 %v6598_v38  ;;  %v6811_v37 = vld [vmem:[#allocation2 + $0x14] sm:$0xff] }
 0x116   : > { %v805_v15 = vld [vmem:[#allocation2 + $0x18] sm:$0xff]  ;;  %v804_v16 = vld [vmem:[#allocation2 + $0x10] sm:$0xff] }
 0x117   : > { %v764_v31 = vmax.f32 %v697_v29, 0.0  ;;  %v700_v32 = vadd.f32 %v5196_v30, %v6760_v45  ;;  %v813_v20 = vpack.c.bf16 %v805_v15, %v804_v16 }
 0x118   : > { %v6805_v33 = vld [vmem:[#allocation2 + $0x19] sm:$0xff]  ;;  %5530 = vmatpush3.bf16.msra.mxu1 %v6438_v27 }
 0x119   : > { %786 = vst.msk [vmem:[#allocation2 + $0x30] sm:$0xff] %vm779_vm1, %v764_v31  ;;  %v765_v34 = vmax.f32 %v700_v32, 0.0  ;;  %v826_v35 = vpack.c.bf16 %v6805_v33, %v6779_v17  ;;  %5543 = vmatprep.subr.bf16.mxu1 %v6598_v38  ;;  %v5197_v36 = vpop.f32.mrb[16].mxu0  ;;  %v6813_v39 = vld [vmem:[#allocation2 + $0x1c] sm:$0xff] }
 0x11a   : > { %v6815_v40 = vld [vmem:[#allocation2 + $0x21] sm:$0xff]  ;;  %v5198_v42 = vpop.f32.mrb[17].mxu0  ;;  %v1734_v43 = vpack.c.bf16 %v6813_v39, %v6811_v37  ;;  %v820_v56 = vld [vmem:[#allocation2 + $0x29] sm:$0x1] }
 0x11b   : > { %v6817_v41 = vld [vmem:[#allocation2 + $0x1a] sm:$0xff]  ;;  %787 = vst.msk [vmem:[#allocation2 + $0x38] sm:$0xff] %vm779_vm1, %v765_v34  ;;  %5520 = vmatmul.mubr.msk.bf16.gmra.mrb[16].mxu1 %vm779_vm1, %v826_v35  ;;  %v6823_v44 = vld [vmem:[#allocation2 + $0x22] sm:$0xff]  ;;  %v5199_v48 = vadd.f32 %v5198_v42, %v5197_v36  ;;  %v1177_v49 = vpack.c.bf16 %v6815_v40, %v6805_v33  ;;  %v827_v59 = vpack.c.bf16 %v820_v56, %v6815_v40  ;;  %v5200_v29 = vpop.f32.mrb[18].mxu0  ;;  %v6441_v34 = vld [vmem:[%s8078_s4 + $0x30] sm:$0xff]   ;;  %v5221_v42 = vpop.f32.mrb[0].mxu1 }
 0x11c   : > { %v6825_v46 = vld [vmem:[#allocation2 + $0x1b] sm:$0xff]  ;;  %v6827_v47 = vld [vmem:[#allocation2 + $0x23] sm:$0xff]  ;;  %5523 = vmatprep.mubr.msk.bf16.mxu1 %vm6599_vm0, %v6598_v38  ;;  %v1270_v50 = vpack.c.bf16 %v6823_v44, %v6817_v41  ;;  %v5201_v30 = vpop.f32.mrb[19].mxu0  ;;  %v6912_v29 = vpack.c.bf16 %v6817_v41, %v6783_v19 }
 0x11d   : > { %v6837_v51 = vpack.c.bf16 %v6827_v47, %v6825_v46  ;;  %v6839_v52 = vld [vmem:[#allocation2 + $0x1d] sm:$0xff]  ;;  %v6841_v53 = vld [vmem:[#allocation2 + $0x25] sm:$0xff]  ;;  %v705_v54 = vadd.f32 %v5199_v48, %v6760_v45 }
 0x11e   : > { %v2106_v55 = vpack.c.bf16 %v6841_v53, %v6839_v52  ;;  %v6854_v62 = vld [vmem:[#allocation2 + $0x24] sm:$0xff]  ;;  %v6442_v48 = vld [vmem:[%s8078_s4 + $0x38] sm:$0xff]  }
 0x11f   : > { %v766_v57 = vmax.f32 %v705_v54, 0.0  ;;  %v807_v21 = vld [vmem:[#allocation2 + $0x28] sm:$0x1]  ;;  %v806_v26 = vld [vmem:[#allocation2 + $0x20] sm:$0xff]  ;;  %v6450_v40 = vld [vmem:[%s8078_s4 + $0x78] sm:$0xff]  }
 0x120   : > { %v6846_v58 = vld [vmem:[#allocation2 + $0x2a] sm:$0xff]  ;;  %v814_v27 = vpack.c.bf16 %v807_v21, %v806_v26  ;;  %v980_v32 = vld [vmem:[#allocation2 + $0x2] sm:$0xff] }
 0x121   : > { %788 = vst.msk [vmem:[#allocation2 + $0x40] sm:$0xff] %vm779_vm1, %v766_v57  ;;  %v6850_v60 = vld [vmem:[#allocation2 + $0x2b] sm:$0xff]  ;;  %v1549_v61 = vpack.c.bf16 %v6846_v58, %v6823_v44  ;;  %v5203_v31 = vpop.f32.mrb[20].mxu0  ;;  %v990_v35 = vpack.c.bf16 %v6781_v18, %v980_v32  ;;  %v5222_v57 = vpop.f32.mrb[1].mxu1  ;;  %v6451_v41 = vld [vmem:[%s8078_s4 + $0x80] sm:$0xff]  }
 0x122   : > { %v6856_v63 = vld [vmem:[#allocation2 + $0x2c] sm:$0xff]  ;;  %v1642_v0 = vpack.c.bf16 %v6850_v60, %v6827_v47  ;;  %v6867_v3 = vld [vmem:[#allocation2 + $0x34] sm:$0xff]  ;;  %v5204_v36 = vpop.f32.mrb[21].mxu0  ;;  %v5223_v8 = vadd.f32 %v5222_v57, %v5221_v42  ;;  %v5224_v10 = vpop.f32.mrb[2].mxu1 }
 0x123   : > { %5524 = vmatmul.mubr.msk.bf16.gmra.mrb[20].mxu1 %vm779_vm1, %v827_v59  ;;  %v6861_v1 = vld [vmem:[#allocation2 + $0x33] sm:$0xff]  ;;  %v1735_v2 = vpack.c.bf16 %v6856_v63, %v6854_v62  ;;  %v2014_v7 = vpack.c.bf16 %v6867_v3, %v6856_v63  ;;  %v5205_v54 = vadd.f32 %v5204_v36, %v5203_v31  ;;  %v5206_v56 = vpop.f32.mrb[22].mxu0  ;;  %v1170_v11 = vld [vmem:[#allocation2 + $0x29] sm:$0xff]  ;;  %v1171_v17 = vld [vmem:[#allocation2 + $0x31] sm:$0x1] }
 0x124   : > { %5531 = vmatprep.mubr.msk.bf16.mxu1 %vm6599_vm0, %v6598_v38  ;;  %v1921_v4 = vpack.c.bf16 %v6861_v1, %v6850_v60  ;;  %v6871_v5 = vld [vmem:[#allocation2 + $0x2d] sm:$0xff]  ;;  %v6873_v6 = vld [vmem:[#allocation2 + $0x35] sm:$0xff]  ;;  %v5207_v59 = vpop.f32.mrb[23].mxu0  ;;  %v737_v16 = vadd.f32 %v5223_v8, %v6760_v45 }
 0x125   : > { %v2107_v9 = vpack.c.bf16 %v6873_v6, %v6871_v5  ;;  %v6448_v33 = vld [vmem:[%s8078_s4 + $0x68] sm:$0xff]   ;;  %v1264_v18 = vld [vmem:[#allocation2 + $0x32] sm:$0x1] }
 0x126   : > { %v774_v31 = vmax.f32 %v737_v16, 0.0  ;;  %v1271_v19 = vpack.c.bf16 %v1264_v18, %v6846_v58 }
 0x128   : > { %796 = vst.msk [vmem:[#allocation2 + $0x80] sm:$0xff] %vm779_vm1, %v774_v31 }
 0x12b   : > { %5532 = vmatmul.mubr.msk.bf16.vlgmr.msra.gmra.mrb[12].mxu1 %vm779_vm1, %v812_v13  ;;  %v5208_v13 = vadd.f32 %v5207_v59, %v5206_v56 }
 0x12c   : > { %5544 = vmatpush3.bf16.msra.mxu1 %v6439_v12  ;;  %5535 = vmatprep.mubr.msk.bf16.mxu1 %vm6599_vm0, %v6598_v38  ;;  %v713_v12 = vadd.f32 %v5205_v54, %v6760_v45 }
 0x12d   : > { %5545 = vmatprep.subr.bf16.mxu1 %v6598_v38  ;;  %v716_v21 = vadd.f32 %v5208_v13, %v6760_v45 }
 0x12f   : > { %v769_v32 = vmax.f32 %v716_v21, 0.0 }
 0x130   : > { %5546 = vmatpush3.bf16.msra.mxu1 %v6440_v14  ;;  %v5209_v14 = vpop.f32.mrb[24].mxu0 }
 0x131   : > { %5559 = vmatprep.subr.bf16.mxu1 %v6598_v38  ;;  %v5210_v15 = vpop.f32.mrb[25].mxu0  ;;  %791 = vst.msk [vmem:[#allocation2 + $0x58] sm:$0xff] %vm779_vm1, %v769_v32 }
 0x132   : > { %v5211_v26 = vadd.f32 %v5210_v15, %v5209_v14  ;;  %v985_v14 = vld [vmem:[#allocation2 + $0x2a] sm:$0x1] }
 0x133   : > { %5536 = vmatmul.mubr.msk.bf16.gmra.mrb[24].mxu1 %vm779_vm1, %v813_v20  ;;  %v768_v20 = vmax.f32 %v713_v12, 0.0  ;;  %v992_v32 = vpack.c.bf16 %v985_v14, %v6823_v44  ;;  %v6951_v14 = vpack.c.bf16 %v6825_v46, %v6789_v23  ;;  %v6456_v44 = vld [vmem:[%s8078_s4 + $0xa8] sm:$0xff]  }
 0x134   : > { %5539 = vmatprep.mubr.msk.bf16.mxu1 %vm6599_vm0, %v6598_v38 }
 0x135   : > { %790 = vst.msk [vmem:[#allocation2 + $0x50] sm:$0xff] %vm779_vm1, %v768_v20 }
 0x13b   : > { %5540 = vmatmul.mubr.msk.bf16.gmra.mrb[28].mxu1 %vm779_vm1, %v814_v27  ;;  %v5212_v27 = vpop.f32.mrb[26].mxu0 }
 0x13c   : > { %5547 = vmatprep.mubr.msk.bf16.mxu1 %vm6599_vm0, %v6598_v38  ;;  %v5213_v30 = vpop.f32.mrb[27].mxu0 }
 0x13d   : > { %v5215_v36 = vpop.f32.mrb[28].mxu0 }
 0x13e   : > { %v5216_v42 = vpop.f32.mrb[29].mxu0 }
 0x13f   : > { %v5217_v57 = vadd.f32 %v5216_v42, %v5215_v36  ;;  %v5218_v8 = vpop.f32.mrb[30].mxu0 }
 0x140   : > { %v5219_v13 = vpop.f32.mrb[31].mxu0 }
 0x141   : > { %v729_v16 = vadd.f32 %v5217_v57, %v6760_v45  ;;  %v5220_v21 = vadd.f32 %v5219_v13, %v5218_v8 }
 0x143   : > { %5548 = vmatmul.mubr.msk.bf16.vlgmr.msra.gmra.mrb[12].mxu1 %vm779_vm1, %v990_v35  ;;  %v5214_v35 = vadd.f32 %v5213_v30, %v5212_v27  ;;  %v772_v30 = vmax.f32 %v729_v16, 0.0 }
 0x144   : > { %5560 = vmatpush3.bf16.msra.mxu1 %v6441_v34  ;;  %5551 = vmatprep.mubr.msk.bf16.mxu1 %vm6599_vm0, %v6598_v38  ;;  %v721_v34 = vadd.f32 %v5211_v26, %v6760_v45 }
 0x145   : > { %5561 = vmatprep.subr.bf16.mxu1 %v6598_v38  ;;  %v724_v56 = vadd.f32 %v5214_v35, %v6760_v45  ;;  %794 = vst.msk [vmem:[#allocation2 + $0x70] sm:$0xff] %vm779_vm1, %v772_v30 }
 0x146   : > { %v770_v54 = vmax.f32 %v721_v34, 0.0 }
 0x147   : > { %v771_v15 = vmax.f32 %v724_v56, 0.0 }
 0x148   : > { %5562 = vmatpush3.bf16.msra.mxu1 %v6442_v48  ;;  %v5225_v48 = vpop.f32.mrb[3].mxu1  ;;  %792 = vst.msk [vmem:[#allocation2 + $0x60] sm:$0xff] %vm779_vm1, %v770_v54  ;;  %v1073_v54 = vld [vmem:[#allocation2 + $0x3] sm:$0xff] }
 0x149   : > { %5575 = vmatprep.subr.bf16.mxu1 %v6598_v38  ;;  %v5226_v59 = vadd.f32 %v5225_v48, %v5224_v10  ;;  %v5227_v12 = vpop.f32.mrb[4].mxu1  ;;  %793 = vst.msk [vmem:[#allocation2 + $0x68] sm:$0xff] %vm779_vm1, %v771_v15  ;;  %v732_v10 = vadd.f32 %v5220_v21, %v6760_v45  ;;  %v1083_v56 = vpack.c.bf16 %v6787_v22, %v1073_v54  ;;  %v1357_v22 = vld [vmem:[#allocation2 + $0x33] sm:$0x1] }
 0x14a   : > { %v5228_v26 = vpop.f32.mrb[5].mxu1  ;;  %v1364_v23 = vpack.c.bf16 %v1357_v22, %v6850_v60  ;;  %v6463_v60 = vld [vmem:[%s8078_s4 + $0xe0] sm:$0xff]  }
 0x14b   : > { %5552 = vmatmul.mubr.msk.bf16.gmra.mrb[32].mxu1 %vm779_vm1, %v6912_v29  ;;  %v740_v20 = vadd.f32 %v5226_v59, %v6760_v45  ;;  %v5229_v27 = vadd.f32 %v5228_v26, %v5227_v12  ;;  %v773_v35 = vmax.f32 %v732_v10, 0.0  ;;  %v5230_v42 = vpop.f32.mrb[6].mxu1  ;;  %v6444_v59 = vld [vmem:[%s8078_s4 + $0x48] sm:$0xff]  }
 0x14c   : > { %5555 = vmatprep.mubr.msk.bf16.mxu1 %vm6599_vm0, %v6598_v38  ;;  %v5231_v48 = vpop.f32.mrb[7].mxu1  ;;  %v7062_v42 = vpack.c.bf16 %v6854_v62, %v6813_v39  ;;  %v1729_v39 = vld [vmem:[#allocation2 + $0x3c] sm:$0x1] }
 0x14d   : > { %v775_v31 = vmax.f32 %v740_v20, 0.0  ;;  %v745_v34 = vadd.f32 %v5229_v27, %v6760_v45  ;;  %795 = vst.msk [vmem:[#allocation2 + $0x78] sm:$0xff] %vm779_vm1, %v773_v35  ;;  %v6443_v45 = vld [vmem:[%s8078_s4 + $0x40] sm:$0xff]   ;;  %v5233_v57 = vpop.f32.mrb[8].mxu1  ;;  %v1078_v20 = vld [vmem:[#allocation2 + $0x2b] sm:$0x1] }
 0x14e   : > { %v5234_v8 = vpop.f32.mrb[9].mxu1  ;;  %v1085_v10 = vpack.c.bf16 %v1078_v20, %v6827_v47  ;;  %v6446_v35 = vld [vmem:[%s8078_s4 + $0x58] sm:$0xff]   ;;  %v1450_v48 = vld [vmem:[#allocation2 + $0x34] sm:$0x1] }
 0x14f   : > { %797 = vst.msk [vmem:[#allocation2 + $0x88] sm:$0xff] %vm779_vm1, %v775_v31  ;;  %v776_v36 = vmax.f32 %v745_v34, 0.0  ;;  %v5236_v12 = vpop.f32.mrb[10].mxu1  ;;  %v6445_v34 = vld [vmem:[%s8078_s4 + $0x50] sm:$0xff]   ;;  %v1457_v54 = vpack.c.bf16 %v1450_v48, %v6856_v63  ;;  %v1543_v57 = vld [vmem:[#allocation2 + $0x3a] sm:$0x1] }
 0x150   : > { %v5237_v13 = vpop.f32.mrb[11].mxu1  ;;  %v6455_v8 = vld [vmem:[%s8078_s4 + $0xa0] sm:$0xff]   ;;  %v1636_v20 = vld [vmem:[#allocation2 + $0x3b] sm:$0x1]  ;;  %v6457_v47 = vld [vmem:[%s8078_s4 + $0xb0] sm:$0xff]  }
 0x151   : > { %798 = vst.msk [vmem:[#allocation2 + $0x90] sm:$0xff] %vm779_vm1, %v776_v36  ;;  %v6447_v36 = vld [vmem:[%s8078_s4 + $0x60] sm:$0xff]   ;;  %v1817_v62 = vld [vmem:[#allocation2 + $0x15] sm:$0xff] }
 0x152   : > { %v6465_v63 = vld [vmem:[%s8078_s4 + $0xf0] sm:$0xff]  }
 0x153   : > { %5556 = vmatmul.mubr.msk.bf16.gmra.mrb[36].mxu1 %vm779_vm1, %v992_v32 }
 0x154   : > { %5563 = vmatprep.mubr.msk.bf16.mxu1 %vm6599_vm0, %v6598_v38  ;;  %v6958_v15 = vld [vmem:[#allocation2 + $0x7c] sm:$0xff] }
 0x155   : > { %v6960_v16 = vld [vmem:[#allocation2 + $0x7d] sm:$0xff] }
 0x156   : > { %v6962_v21 = vld [vmem:[#allocation2 + $0x84] sm:$0xff] }
 0x157   : > { %v6964_v26 = vld [vmem:[#allocation2 + $0x85] sm:$0xff]  ;;  %v3921_v46 = vpack.c.bf16 %v6962_v21, %v6958_v15 }
 0x158   : > { %v6968_v27 = vld [vmem:[#allocation2 + $0x7e] sm:$0xff]  ;;  %v6970_v30 = vld [vmem:[#allocation2 + $0x86] sm:$0xff]  ;;  %v3998_v31 = vpack.c.bf16 %v6964_v26, %v6960_v16  ;;  %v6555_v16 = vld [vmem:[%s8078_s4 + $0xf0] sm:$0xff]  }
 0x159   : > { %v4075_v32 = vpack.c.bf16 %v6970_v30, %v6968_v27  ;;  %v6553_v15 = vld [vmem:[%s8078_s4 + $0xe0] sm:$0xff]   ;;  %v4145_v27 = vld [vmem:[#allocation2 + $0x6f] sm:$0xff]  ;;  %v4146_v30 = vld [vmem:[#allocation2 + $0x77] sm:$0xff] }
 0x15b   : > { %5564 = vmatmul.mubr.msk.bf16.vlgmr.msra.gmra.mrb[12].mxu1 %vm779_vm1, %v1083_v56  ;;  %v6454_v56 = vld [vmem:[%s8078_s4 + $0x98] sm:$0xff]  }
 0x15c   : > { %5576 = vmatpush3.bf16.msra.mxu1 %v6443_v45  ;;  %5567 = vmatprep.mubr.msk.bf16.mxu1 %vm6599_vm0, %v6598_v38  ;;  %v6453_v45 = vld [vmem:[%s8078_s4 + $0x90] sm:$0xff]  }
 0x15d   : > { %5577 = vmatprep.subr.bf16.mxu1 %v6598_v38 }
 0x160   : > { %5578 = vmatpush3.bf16.msra.mxu1 %v6444_v59 }
 0x161   : > { %5591 = vmatprep.subr.bf16.mxu1 %v6598_v38 }
 0x163   : > { %5568 = vmatmul.mubr.msk.bf16.gmra.mrb[40].mxu1 %vm779_vm1, %v6951_v14 }
 0x164   : > { %5571 = vmatprep.mubr.msk.bf16.mxu1 %vm6599_vm0, %v6598_v38 }
 0x16b   : > { %5572 = vmatmul.mubr.msk.bf16.gmra.mrb[44].mxu1 %vm779_vm1, %v1085_v10 }
 0x16c   : > { %5579 = vmatprep.mubr.msk.bf16.mxu1 %vm6599_vm0, %v6598_v38 }
 0x173   : > { %5580 = vmatmul.mubr.msk.bf16.vlgmr.msra.gmra.mrb[12].mxu1 %vm779_vm1, %v1176_v24  ;;  %v1178_v24 = vpack.c.bf16 %v1171_v17, %v1170_v11  ;;  %v1643_v11 = vpack.c.bf16 %v1636_v20, %v6861_v1  ;;  %v6464_v1 = vld [vmem:[%s8078_s4 + $0xe8] sm:$0xff]  }
 0x174   : > { %5592 = vmatpush3.bf16.msra.mxu1 %v6445_v34  ;;  %5583 = vmatprep.mubr.msk.bf16.mxu1 %vm6599_vm0, %v6598_v38 }
 0x175   : > { %5593 = vmatprep.subr.bf16.mxu1 %v6598_v38 }
 0x178   : > { %5594 = vmatpush3.bf16.msra.mxu1 %v6446_v35 }
 0x179   : > { %5607 = vmatprep.subr.bf16.mxu1 %v6598_v38 }
 0x17b   : > { %5584 = vmatmul.mubr.msk.bf16.gmra.mrb[48].mxu1 %vm779_vm1, %v1177_v49 }
 0x17c   : > { %5587 = vmatprep.mubr.msk.bf16.mxu1 %vm6599_vm0, %v6598_v38 }
 0x183   : > { %5588 = vmatmul.mubr.msk.bf16.gmra.mrb[52].mxu1 %vm779_vm1, %v1178_v24 }
 0x184   : > { %5595 = vmatprep.mubr.msk.bf16.mxu1 %vm6599_vm0, %v6598_v38 }
 0x18b   : > { %5596 = vmatmul.mubr.msk.bf16.vlgmr.msra.gmra.mrb[12].mxu1 %vm779_vm1, %v1269_v25  ;;  %v6449_v25 = vld [vmem:[%s8078_s4 + $0x70] sm:$0xff]  }
 0x18c   : > { %5608 = vmatpush3.bf16.msra.mxu1 %v6447_v36  ;;  %5599 = vmatprep.mubr.msk.bf16.mxu1 %vm6599_vm0, %v6598_v38 }
 0x18d   : > { %5609 = vmatprep.subr.bf16.mxu1 %v6598_v38 }
 0x190   : > { %5610 = vmatpush3.bf16.msra.mxu1 %v6448_v33 }
 0x191   : > { %5623 = vmatprep.subr.bf16.mxu1 %v6598_v38 }
 0x193   : > { %5600 = vmatmul.mubr.msk.bf16.gmra.mrb[56].mxu1 %vm779_vm1, %v1270_v50  ;;  %v6452_v50 = vld [vmem:[%s8078_s4 + $0x88] sm:$0xff]  }
 0x194   : > { %5603 = vmatprep.mubr.msk.bf16.mxu1 %vm6599_vm0, %v6598_v38 }
 0x19b   : > { %5604 = vmatmul.mubr.msk.bf16.gmra.mrb[60].mxu1 %vm779_vm1, %v1271_v19 }
 0x19c   : > { %5611 = vmatprep.mubr.msk.bf16.mxu1 %vm6599_vm0, %v6598_v38 }
 0x1a3   : > { %5612 = vmatmul.mubr.msk.bf16.vlgmr.msra.gmra.mrb[12].mxu1 %vm779_vm1, %v1362_v28  ;;  %v1445_v28 = vld [vmem:[#allocation2 + $0xc] sm:$0xff] }
 0x1a4   : > { %5624 = vmatpush3.bf16.msra.mxu1 %v6449_v25  ;;  %5615 = vmatprep.mubr.msk.bf16.mxu1 %vm6599_vm0, %v6598_v38  ;;  %v1455_v49 = vpack.c.bf16 %v6811_v37, %v1445_v28  ;;  %v1827_v28 = vpack.c.bf16 %v6839_v52, %v1817_v62 }
 0x1a5   : > { %5625 = vmatprep.subr.bf16.mxu1 %v6598_v38 }
 0x1a8   : > { %5626 = vmatpush3.bf16.msra.mxu1 %v6450_v40 }
 0x1a9   : > { %5639 = vmatprep.subr.bf16.mxu1 %v6598_v38 }
 0x1ab   : > { %5616 = vmatmul.mubr.msk.bf16.gmra.mrb[64].mxu1 %vm779_vm1, %v6837_v51 }
 0x1ac   : > { %5619 = vmatprep.mubr.msk.bf16.mxu1 %vm6599_vm0, %v6598_v38 }
 0x1b3   : > { %5620 = vmatmul.mubr.msk.bf16.gmra.mrb[68].mxu1 %vm779_vm1, %v1364_v23  ;;  %v1736_v23 = vpack.c.bf16 %v1729_v39, %v6867_v3  ;;  %v6466_v3 = vld [vmem:[%s8078_s4 + $0xf8] sm:$0xff]  }
 0x1b4   : > { %5627 = vmatprep.mubr.msk.bf16.mxu1 %vm6599_vm0, %v6598_v38 }
 0x1bb   : > { %5628 = vmatmul.mubr.msk.bf16.vlgmr.msra.gmra.mrb[12].mxu1 %vm779_vm1, %v1455_v49 }
 0x1bc   : > { %5640 = vmatpush3.bf16.msra.mxu1 %v6451_v41  ;;  %5631 = vmatprep.mubr.msk.bf16.mxu1 %vm6599_vm0, %v6598_v38  ;;  %v6460_v41 = vld [vmem:[%s8078_s4 + $0xc8] sm:$0xff]  }
 0x1bd   : > { %5641 = vmatprep.subr.bf16.mxu1 %v6598_v38 }
 0x1c0   : > { %5642 = vmatpush3.bf16.msra.mxu1 %v6452_v50 }
 0x1c1   : > { %5655 = vmatprep.subr.bf16.mxu1 %v6598_v38 }
 0x1c3   : > { %5632 = vmatmul.mubr.msk.bf16.gmra.mrb[72].mxu1 %vm779_vm1, %v7062_v42 }
 0x1c4   : > { %5635 = vmatprep.mubr.msk.bf16.mxu1 %vm6599_vm0, %v6598_v38 }
 0x1cb   : > { %5636 = vmatmul.mubr.msk.bf16.gmra.mrb[76].mxu1 %vm779_vm1, %v1457_v54 }
 0x1cc   : > { %5643 = vmatprep.mubr.msk.bf16.mxu1 %vm6599_vm0, %v6598_v38 }
 0x1d3   : > { %5644 = vmatmul.mubr.msk.bf16.vlgmr.msra.gmra.mrb[12].mxu1 %vm779_vm1, %v6912_v29  ;;  %v1542_v29 = vld [vmem:[#allocation2 + $0x32] sm:$0xff] }
 0x1d4   : > { %5656 = vmatpush3.bf16.msra.mxu1 %v6453_v45  ;;  %5647 = vmatprep.mubr.msk.bf16.mxu1 %vm6599_vm0, %v6598_v38  ;;  %v1550_v59 = vpack.c.bf16 %v1543_v57, %v1542_v29  ;;  %v1822_v57 = vld [vmem:[#allocation2 + $0x3d] sm:$0x1] }
 0x1d5   : > { %5657 = vmatprep.subr.bf16.mxu1 %v6598_v38 }
 0x1d8   : > { %5658 = vmatpush3.bf16.msra.mxu1 %v6454_v56  ;;  %v1828_v56 = vpack.c.bf16 %v6871_v5, %v6841_v53  ;;  %v2100_v53 = vld [vmem:[#allocation2 + $0x3d] sm:$0xff]  ;;  %v2190_v5 = vld [vmem:[#allocation2 + $0x26] sm:$0xff] }
 0x1d9   : > { %5671 = vmatprep.subr.bf16.mxu1 %v6598_v38 }
 0x1db   : > { %5648 = vmatmul.mubr.msk.bf16.gmra.mrb[80].mxu1 %vm779_vm1, %v1549_v61 }
 0x1dc   : > { %5651 = vmatprep.mubr.msk.bf16.mxu1 %vm6599_vm0, %v6598_v38 }
 0x1e3   : > { %5652 = vmatmul.mubr.msk.bf16.gmra.mrb[84].mxu1 %vm779_vm1, %v1550_v59 }
 0x1e4   : > { %5659 = vmatprep.mubr.msk.bf16.mxu1 %vm6599_vm0, %v6598_v38 }
 0x1eb   : > { %5660 = vmatmul.mubr.msk.bf16.vlgmr.msra.gmra.mrb[12].mxu1 %vm779_vm1, %v6951_v14 }
 0x1ec   : > { %5672 = vmatpush3.bf16.msra.mxu1 %v6455_v8  ;;  %5663 = vmatprep.mubr.msk.bf16.mxu1 %vm6599_vm0, %v6598_v38 }
 0x1ed   : > { %5673 = vmatprep.subr.bf16.mxu1 %v6598_v38 }
 0x1ee   : > { %v890_v58 = vpop.f32.mrb[16].mxu1 }
 0x1ef   : > { %v5521_v61 = vpop.f32.mrb[17].mxu1 }
 0x1f0   : > { %v893_v12 = vpop.f32.mrb[18].mxu1  ;;  %5674 = vmatpush3.bf16.msra.mxu1 %v6456_v44 }
 0x1f1   : > { %v5522_v13 = vpop.f32.mrb[19].mxu1  ;;  %5687 = vmatprep.subr.bf16.mxu1 %v6598_v38  ;;  %v1829_v12 = vpack.c.bf16 %v1822_v57, %v6873_v6  ;;  %v2189_v6 = vld [vmem:[#allocation2 + $0x1e] sm:$0xff] }
 0x1f2   : > { %v6461_v13 = vld [vmem:[%s8078_s4 + $0xd0] sm:$0xff]  }
 0x1f3   : > { %5664 = vmatmul.mubr.msk.bf16.gmra.mrb[88].mxu1 %vm779_vm1, %v1642_v0  ;;  %v6458_v0 = vld [vmem:[%s8078_s4 + $0xb8] sm:$0xff]  }
 0x1f4   : > { %5667 = vmatprep.mubr.msk.bf16.mxu1 %vm6599_vm0, %v6598_v38 }
 0x1f6   : > { %v897_v14 = vpop.f32.mrb[20].mxu1 }
 0x1f7   : > { %v5525_v10 = vpop.f32.mrb[21].mxu1 }
 0x1f8   : > { %v900_v34 = vpop.f32.mrb[22].mxu1 }
 0x1f9   : > { %v5526_v35 = vpop.f32.mrb[23].mxu1 }
 0x1fb   : > { %5668 = vmatmul.mubr.msk.bf16.gmra.mrb[92].mxu1 %vm779_vm1, %v1643_v11 }
 0x1fc   : > { %5675 = vmatprep.mubr.msk.bf16.mxu1 %vm6599_vm0, %v6598_v38 }
 0x203   : > { %5676 = vmatmul.mubr.msk.bf16.vlgmr.msra.gmra.mrb[12].mxu1 %vm779_vm1, %v1734_v43 }
 0x204   : > { %5688 = vmatpush3.bf16.msra.mxu1 %v6457_v47  ;;  %5679 = vmatprep.mubr.msk.bf16.mxu1 %vm6599_vm0, %v6598_v38  ;;  %v1914_v47 = vld [vmem:[#allocation2 + $0x3b] sm:$0xff] }
 0x205   : > { %5689 = vmatprep.subr.bf16.mxu1 %v6598_v38 }
 0x206   : > { %v966_v17 = vpop.f32.mrb[24].mxu1 }
 0x207   : > { %v967_v24 = vadd.f32 %v966_v17, %v890_v58  ;;  %v5537_v36 = vpop.f32.mrb[25].mxu1 }
 0x208   : > { %v969_v33 = vpop.f32.mrb[26].mxu1  ;;  %5690 = vmatpush3.bf16.msra.mxu1 %v6458_v0  ;;  %v1915_v0 = vld [vmem:[#allocation2 + $0x43] sm:$0x1] }
 0x209   : > { %v5538_v18 = vpop.f32.mrb[27].mxu1  ;;  %5703 = vmatprep.subr.bf16.mxu1 %v6598_v38 }
 0x20b   : > { %5680 = vmatmul.mubr.msk.bf16.gmra.mrb[96].mxu1 %vm779_vm1, %v1735_v2  ;;  %v6459_v2 = vld [vmem:[%s8078_s4 + $0xc0] sm:$0xff]  }
 0x20c   : > { %5683 = vmatprep.mubr.msk.bf16.mxu1 %vm6599_vm0, %v6598_v38 }
 0x20e   : > { %v973_v37 = vpop.f32.mrb[28].mxu1 }
 0x20f   : > { %v974_v43 = vadd.f32 %v973_v37, %v897_v14  ;;  %v5541_v19 = vpop.f32.mrb[29].mxu1  ;;  %v6462_v14 = vld [vmem:[%s8078_s4 + $0xd8] sm:$0xff]   ;;  %v1922_v37 = vpack.c.bf16 %v1915_v0, %v1914_v47 }
 0x210   : > { %v976_v25 = vpop.f32.mrb[30].mxu1 }
 0x211   : > { %v977_v40 = vadd.f32 %v976_v25, %v900_v34  ;;  %v5542_v22 = vpop.f32.mrb[31].mxu1 }
 0x212   : > { %v2008_v22 = vld [vmem:[#allocation2 + $0x44] sm:$0x1] }
 0x213   : > { %5684 = vmatmul.mubr.msk.bf16.gmra.mrb[100].mxu1 %vm779_vm1, %v1736_v23 }
 0x214   : > { %5691 = vmatprep.mubr.msk.bf16.mxu1 %vm6599_vm0, %v6598_v38 }
 0x21b   : > { %5692 = vmatmul.mubr.msk.bf16.vlgmr.msra.gmra.mrb[12].mxu1 %vm779_vm1, %v1827_v28 }
 0x21c   : > { %5704 = vmatpush3.bf16.msra.mxu1 %v6459_v2  ;;  %5695 = vmatprep.mubr.msk.bf16.mxu1 %vm6599_vm0, %v6598_v38 }
 0x21d   : > { %5705 = vmatprep.subr.bf16.mxu1 %v6598_v38 }
 0x21e   : > { %v1055_v49 = vpop.f32.mrb[32].mxu1 }
 0x21f   : > { %v1070_v50 = vadd.f32 %v1055_v49, %v967_v24  ;;  %v5553_v48 = vpop.f32.mrb[33].mxu1 }
 0x220   : > { %v1058_v54 = vpop.f32.mrb[34].mxu1  ;;  %5706 = vmatpush3.bf16.msra.mxu1 %v6460_v41 }
 0x221   : > { %v5554_v45 = vpop.f32.mrb[35].mxu1  ;;  %5719 = vmatprep.subr.bf16.mxu1 %v6598_v38 }
 0x223   : > { %5696 = vmatmul.mubr.msk.bf16.gmra.mrb[104].mxu1 %vm779_vm1, %v1828_v56 }
 0x224   : > { %5699 = vmatprep.mubr.msk.bf16.mxu1 %vm6599_vm0, %v6598_v38 }
 0x226   : > { %v1062_v29 = vpop.f32.mrb[36].mxu1 }
 0x227   : > { %v1071_v59 = vadd.f32 %v1062_v29, %v974_v43  ;;  %v5557_v8 = vpop.f32.mrb[37].mxu1 }
 0x228   : > { %v1065_v44 = vpop.f32.mrb[38].mxu1 }
 0x229   : > { %v1072_v58 = vadd.f32 %v1065_v44, %v977_v40  ;;  %v5558_v61 = vpop.f32.mrb[39].mxu1  ;;  %v2007_v40 = vld [vmem:[#allocation2 + $0x3c] sm:$0xff] }
 0x22a   : > { %v2015_v49 = vpack.c.bf16 %v2008_v22, %v2007_v40  ;;  %v2192_v61 = vld [vmem:[#allocation2 + $0x36] sm:$0xff] }
 0x22b   : > { %5700 = vmatmul.mubr.msk.bf16.gmra.mrb[108].mxu1 %vm779_vm1, %v1829_v12 }
 0x22c   : > { %5707 = vmatprep.mubr.msk.bf16.mxu1 %vm6599_vm0, %v6598_v38 }
 0x233   : > { %5708 = vmatmul.mubr.msk.bf16.vlgmr.msra.gmra.mrb[12].mxu1 %vm779_vm1, %v6837_v51 }
 0x234   : > { %5720 = vmatpush3.bf16.msra.mxu1 %v6461_v13  ;;  %5711 = vmatprep.mubr.msk.bf16.mxu1 %vm6599_vm0, %v6598_v38 }
 0x235   : > { %5721 = vmatprep.subr.bf16.mxu1 %v6598_v38 }
 0x236   : > { %v1148_v20 = vpop.f32.mrb[40].mxu1 }
 0x237   : > { %v1163_v10 = vadd.f32 %v1148_v20, %v1070_v50  ;;  %v5569_v34 = vpop.f32.mrb[41].mxu1  ;;  %v2191_v20 = vld [vmem:[#allocation2 + $0x2e] sm:$0xff] }
 0x238   : > { %v1151_v35 = vpop.f32.mrb[42].mxu1  ;;  %5722 = vmatpush3.bf16.msra.mxu1 %v6462_v14  ;;  %v2200_v34 = vpack.c.bf16 %v2192_v61, %v2191_v20 }
 0x239   : > { %v5570_v11 = vpop.f32.mrb[43].mxu1  ;;  %5735 = vmatprep.subr.bf16.mxu1 %v6598_v38 }
 0x23a   : > { %v2193_v11 = vld [vmem:[#allocation2 + $0x3e] sm:$0xff] }
 0x23b   : > { %5712 = vmatmul.mubr.msk.bf16.gmra.mrb[112].mxu1 %vm779_vm1, %v1921_v4 }
 0x23c   : > { %5715 = vmatprep.mubr.msk.bf16.mxu1 %vm6599_vm0, %v6598_v38 }
 0x23e   : > { %v1155_v51 = vpop.f32.mrb[44].mxu1 }
 0x23f   : > { %v1164_v17 = vadd.f32 %v1155_v51, %v1071_v59  ;;  %v5573_v24 = vpop.f32.mrb[45].mxu1  ;;  %v2194_v51 = vld [vmem:[#allocation2 + $0x46] sm:$0x1] }
 0x240   : > { %v1158_v36 = vpop.f32.mrb[46].mxu1 }
 0x241   : > { %v1165_v33 = vadd.f32 %v1158_v36, %v1072_v58  ;;  %v5574_v18 = vpop.f32.mrb[47].mxu1 }
 0x243   : > { %5716 = vmatmul.mubr.msk.bf16.gmra.mrb[116].mxu1 %vm779_vm1, %v1922_v37 }
 0x244   : > { %5723 = vmatprep.mubr.msk.bf16.mxu1 %vm6599_vm0, %v6598_v38 }
 0x24b   : > { %5724 = vmatmul.mubr.msk.bf16.vlgmr.msra.gmra.mrb[12].mxu1 %vm779_vm1, %v7062_v42 }
 0x24c   : > { %5736 = vmatpush3.bf16.msra.mxu1 %v6463_v60  ;;  %5727 = vmatprep.mubr.msk.bf16.mxu1 %vm6599_vm0, %v6598_v38 }
 0x24d   : > { %5737 = vmatprep.subr.bf16.mxu1 %v6598_v38 }
 0x24e   : > { %v1241_v4 = vpop.f32.mrb[48].mxu1 }
 0x24f   : > { %v1256_v39 = vadd.f32 %v1241_v4, %v1163_v10  ;;  %v5585_v43 = vpop.f32.mrb[49].mxu1 }
 0x250   : > { %v1244_v19 = vpop.f32.mrb[50].mxu1  ;;  %5738 = vmatpush3.bf16.msra.mxu1 %v6464_v1 }
 0x251   : > { %v5586_v25 = vpop.f32.mrb[51].mxu1  ;;  %5751 = vmatprep.subr.bf16.mxu1 %v6598_v38 }
 0x253   : > { %5728 = vmatmul.mubr.msk.bf16.gmra.mrb[120].mxu1 %vm779_vm1, %v2014_v7 }
 0x254   : > { %5731 = vmatprep.mubr.msk.bf16.mxu1 %vm6599_vm0, %v6598_v38 }
 0x256   : > { %v1248_v42 = vpop.f32.mrb[52].mxu1 }
 0x257   : > { %v1257_v23 = vadd.f32 %v1248_v42, %v1164_v17  ;;  %v5589_v62 = vpop.f32.mrb[53].mxu1 }
 0x258   : > { %v1251_v2 = vpop.f32.mrb[54].mxu1 }
 0x259   : > { %v1258_v28 = vadd.f32 %v1251_v2, %v1165_v33  ;;  %v5590_v41 = vpop.f32.mrb[55].mxu1  ;;  %v2201_v33 = vpack.c.bf16 %v2194_v51, %v2193_v11 }
 0x25b   : > { %5732 = vmatmul.mubr.msk.bf16.gmra.mrb[124].mxu1 %vm779_vm1, %v2015_v49 }
 0x25c   : > { %5739 = vmatprep.mubr.msk.bf16.mxu1 %vm6599_vm0, %v6598_v38 }
 0x263   : > { %5740 = vmatmul.mubr.msk.bf16.vlgmr.msra.gmra.mrb[12].mxu1 %vm779_vm1, %v2106_v55  ;;  %v2101_v55 = vld [vmem:[#allocation2 + $0x45] sm:$0x1] }
 0x264   : > { %5752 = vmatpush3.bf16.msra.mxu1 %v6465_v63  ;;  %5743 = vmatprep.mubr.msk.bf16.mxu1 %vm6599_vm0, %v6598_v38  ;;  %v2108_v44 = vpack.c.bf16 %v2101_v55, %v2100_v53  ;;  %v6469_v63 = vld [vmem:[%s8080_s6 + $0x30] sm:$0xff]  }
 0x265   : > { %5753 = vmatprep.subr.bf16.mxu1 %v6598_v38 }
 0x266   : > { %v1334_v7 = vpop.f32.mrb[56].mxu1 }
 0x267   : > { %v1349_v50 = vadd.f32 %v1334_v7, %v1256_v39  ;;  %v5601_v48 = vpop.f32.mrb[57].mxu1  ;;  %v6467_v39 = vld [vmem:[%s8080_s6 + $0x20] sm:$0xff]  }
 0x268   : > { %v1337_v54 = vpop.f32.mrb[58].mxu1  ;;  %5754 = vmatpush3.bf16.msra.mxu1 %v6466_v3  ;;  %5768 = vmatpush3.bf16.msra.mxu0 %v6467_v39 }
 0x269   : > { %v5602_v45 = vpop.f32.mrb[59].mxu1  ;;  %6131 = vmatprep.subr.bf16.mxu1 %v6598_v38  ;;  %5769 = vmatprep.subr.bf16.mxu0 %v6598_v38 }
 0x26b   : > { %5744 = vmatmul.mubr.msk.bf16.gmra.mrb[128].mxu1 %vm779_vm1, %v2107_v9  ;;  %v2199_v9 = vpack.c.bf16 %v2190_v5, %v2189_v6 }
 0x26c   : > { %5747 = vmatprep.mubr.msk.bf16.mxu1 %vm6599_vm0, %v6598_v38 }
 0x26e   : > { %v1341_v52 = vpop.f32.mrb[60].mxu1 }
 0x26f   : > { %v1350_v56 = vadd.f32 %v1341_v52, %v1257_v23  ;;  %v5605_v29 = vpop.f32.mrb[61].mxu1  ;;  %v6468_v23 = vld [vmem:[%s8080_s6 + $0x28] sm:$0xff]  }
 0x270   : > { %v1344_v57 = vpop.f32.mrb[62].mxu1  ;;  %5770 = vmatpush3.bf16.msra.mxu0 %v6468_v23 }
 0x271   : > { %v1351_v59 = vadd.f32 %v1344_v57, %v1258_v28  ;;  %v5606_v8 = vpop.f32.mrb[63].mxu1  ;;  %5771 = vmatprep.subr.bf16.mxu0 %v6598_v38  ;;  %v6470_v57 = vld [vmem:[%s8080_s6 + $0x38] sm:$0xff]  }
 0x273   : > { %5748 = vmatmul.mubr.msk.bf16.gmra.mrb[132].mxu1 %vm779_vm1, %v2108_v44 }
 0x274   : > { %5755 = vmatprep.mubr.msk.bf16.mxu1 %vm6599_vm0, %v6598_v38  ;;  %5772 = vmatpush3.bf16.msra.mxu0 %v6469_v63 }
 0x275   : > { %5773 = vmatprep.subr.bf16.mxu0 %v6598_v38 }
 0x278   : > { %5774 = vmatpush3.bf16.msra.mxu0 %v6470_v57 }
 0x279   : > { %5779 = vmatprep.subr.bf16.mxu0 %v6598_v38 }
 0x27b   : > { %5756 = vmatmul.mubr.msk.bf16.vlgmr.msra.gmra.mrb[12].mxu1 %vm779_vm1, %v2199_v9 }
 0x27c   : > { %5759 = vmatprep.mubr.msk.bf16.mxu1 %vm6599_vm0, %v6598_v38  ;;  %6132 = vmatpush3.bf16.msra.mxu1 %v6467_v39 }
 0x27d   : > { %6133 = vmatprep.subr.bf16.mxu1 %v6598_v38 }
 0x27e   : > { %v1427_v58 = vpop.f32.mrb[64].mxu1 }
 0x27f   : > { %v1442_v12 = vadd.f32 %v1427_v58, %v1349_v50  ;;  %v5617_v13 = vpop.f32.mrb[65].mxu1 }
 0x280   : > { %v1430_v14 = vpop.f32.mrb[66].mxu1  ;;  %6134 = vmatpush3.bf16.msra.mxu1 %v6468_v23 }
 0x281   : > { %v5618_v10 = vpop.f32.mrb[67].mxu1  ;;  %6135 = vmatprep.subr.bf16.mxu1 %v6598_v38 }
 0x283   : > { %5760 = vmatmul.mubr.msk.bf16.gmra.mrb[136].mxu1 %vm779_vm1, %v2200_v34 }
 0x284   : > { %5763 = vmatprep.mubr.msk.bf16.mxu1 %vm6599_vm0, %v6598_v38  ;;  %6136 = vmatpush3.bf16.msra.mxu1 %v6469_v63 }
 0x285   : > { %6137 = vmatprep.subr.bf16.mxu1 %v6598_v38 }
 0x286   : > { %v1434_v35 = vpop.f32.mrb[68].mxu1 }
 0x287   : > { %v1443_v47 = vadd.f32 %v1434_v35, %v1350_v56  ;;  %v5621_v0 = vpop.f32.mrb[69].mxu1 }
 0x288   : > { %v1437_v17 = vpop.f32.mrb[70].mxu1  ;;  %6138 = vmatpush3.bf16.msra.mxu1 %v6470_v57  ;;  %v2294_v57 = vlaneseq }
 0x289   : > { %v1444_v24 = vadd.f32 %v1437_v17, %v1351_v59  ;;  %v5622_v36 = vpop.f32.mrb[71].mxu1  ;;  %6143 = vmatprep.subr.bf16.mxu1 %v6598_v38 }
 0x28a   : > { %vm4846_vm3 = vcmp.lt.s32.totalorder %v2294_v57, 192 }
 0x28b   : > { %5764 = vmatmul.mubr.msk.bf16.gmra.mrb[140].mxu1 %vm779_vm1, %v2201_v33 }
 0x28c   : > { %6139 = vmatprep.mubr.msk.bf16.mxu1 %vm6599_vm0, %v6598_v38 }
 0x296   : > { %v1520_v18 = vpop.f32.mrb[72].mxu1 }
 0x297   : > { %v1535_v37 = vadd.f32 %v1520_v18, %v1442_v12  ;;  %v5633_v60 = vpop.f32.mrb[73].mxu1 }
 0x298   : > { %v1523_v1 = vpop.f32.mrb[74].mxu1 }
 0x299   : > { %v5634_v4 = vpop.f32.mrb[75].mxu1 }
 0x29e   : > { %v1527_v43 = vpop.f32.mrb[76].mxu1 }
 0x29f   : > { %v1536_v19 = vadd.f32 %v1527_v43, %v1443_v47  ;;  %v5637_v25 = vpop.f32.mrb[77].mxu1 }
 0x2a0   : > { %v1530_v42 = vpop.f32.mrb[78].mxu1 }
 0x2a1   : > { %v1537_v40 = vadd.f32 %v1530_v42, %v1444_v24  ;;  %v5638_v22 = vpop.f32.mrb[79].mxu1 }
 0x2ae   : > { %v1613_v62 = vpop.f32.mrb[80].mxu1 }
 0x2af   : > { %v1628_v2 = vadd.f32 %v1613_v62, %v1535_v37  ;;  %v5649_v28 = vpop.f32.mrb[81].mxu1 }
 0x2b0   : > { %v1616_v41 = vpop.f32.mrb[82].mxu1 }
 0x2b1   : > { %v5650_v49 = vpop.f32.mrb[83].mxu1 }
 0x2b6   : > { %v1620_v3 = vpop.f32.mrb[84].mxu1 }
 0x2b7   : > { %v1629_v7 = vadd.f32 %v1620_v3, %v1536_v19  ;;  %v5653_v50 = vpop.f32.mrb[85].mxu1 }
 0x2b8   : > { %v1623_v48 = vpop.f32.mrb[86].mxu1 }
 0x2b9   : > { %v1630_v54 = vadd.f32 %v1623_v48, %v1537_v40  ;;  %v5654_v45 = vpop.f32.mrb[87].mxu1 }
 0x2c6   : > { %v1706_v52 = vpop.f32.mrb[88].mxu1 }
 0x2c7   : > { %v1721_v53 = vadd.f32 %v1706_v52, %v1628_v2  ;;  %v5665_v55 = vpop.f32.mrb[89].mxu1 }
 0x2c8   : > { %v1709_v56 = vpop.f32.mrb[90].mxu1 }
 0x2c9   : > { %v5666_v29 = vpop.f32.mrb[91].mxu1 }
 0x2ce   : > { %v1713_v59 = vpop.f32.mrb[92].mxu1 }
 0x2cf   : > { %v1722_v8 = vadd.f32 %v1713_v59, %v1629_v7  ;;  %v5669_v44 = vpop.f32.mrb[93].mxu1 }
 0x2d0   : > { %v1716_v5 = vpop.f32.mrb[94].mxu1  ;;  %v7256_v44 = vshrl.u32 %v2294_v57, 7 }
 0x2d1   : > { %v1723_v6 = vadd.f32 %v1716_v5, %v1630_v54  ;;  %v5670_v9 = vpop.f32.mrb[95].mxu1 }
 0x2de   : > { %v1799_v58 = vpop.f32.mrb[96].mxu1 }
 0x2df   : > { %v1814_v61 = vadd.f32 %v1799_v58, %v1721_v53  ;;  %v5681_v12 = vpop.f32.mrb[97].mxu1  ;;  %v2296_v58 = vsub.s32 0, %v7256_v44 }
 0x2e0   : > { %v1802_v13 = vpop.f32.mrb[98].mxu1  ;;  %v7262_v12 = vld [vmem:[%s8079_s5] sm:$0x1] }
 0x2e1   : > { %v5682_v14 = vpop.f32.mrb[99].mxu1 }
 0x2e6   : > { %v1806_v20 = vpop.f32.mrb[100].mxu1 }
 0x2e7   : > { %v1815_v10 = vadd.f32 %v1806_v20, %v1722_v8  ;;  %v5685_v34 = vpop.f32.mrb[101].mxu1  ;;  %v7265_v20 = vrot.slane %v7262_v12, %v2296_v58  ;;  %v6477_v58 = vld [vmem:[%s8080_s6 + $0x50] sm:$0xff]  }
 0x2e8   : > { %v1809_v35 = vpop.f32.mrb[102].mxu1 }
 0x2e9   : > { %v1816_v11 = vadd.f32 %v1809_v35, %v1723_v6  ;;  %v5686_v51 = vpop.f32.mrb[103].mxu1 }
 0x2f6   : > { %v1892_v47 = vpop.f32.mrb[104].mxu1 }
 0x2f7   : > { %v1907_v0 = vadd.f32 %v1892_v47, %v1814_v61  ;;  %v5697_v17 = vpop.f32.mrb[105].mxu1 }
 0x2f8   : > { %v1895_v24 = vpop.f32.mrb[106].mxu1  ;;  %v6471_v17 = vld [vmem:[%s8080_s6] sm:$0xff]  }
 0x2f9   : > { %v5698_v36 = vpop.f32.mrb[107].mxu1 }
 0x2fe   : > { %v1899_v33 = vpop.f32.mrb[108].mxu1 }
 0x2ff   : > { %v1908_v18 = vadd.f32 %v1899_v33, %v1815_v10  ;;  %v5701_v37 = vpop.f32.mrb[109].mxu1 }
 0x300   : > { %v1902_v60 = vpop.f32.mrb[110].mxu1 }
 0x301   : > { %v1909_v1 = vadd.f32 %v1902_v60, %v1816_v11  ;;  %v5702_v4 = vpop.f32.mrb[111].mxu1  ;;  %v6472_v60 = vld [vmem:[%s8080_s6 + $0x8] sm:$0xff]  }
 0x302   : > { %v7284_v4 = vld [vmem:[#allocation2 + $0x62] sm:$0xff] }
 0x30e   : > { %v1985_v39 = vpop.f32.mrb[112].mxu1 }
 0x30f   : > { %v2000_v43 = vadd.f32 %v1985_v39, %v1907_v0  ;;  %v5713_v19 = vpop.f32.mrb[113].mxu1 }
 0x310   : > { %v1988_v25 = vpop.f32.mrb[114].mxu1  ;;  %v7289_v19 = vld [vmem:[#allocation2 + $0x5b] sm:$0xff] }
 0x311   : > { %v5714_v42 = vpop.f32.mrb[115].mxu1  ;;  %v7291_v25 = vld [vmem:[#allocation2 + $0x63] sm:$0xff] }
 0x312   : > { %v7293_v42 = vld [vmem:[#allocation2 + $0x5c] sm:$0xff] }
 0x316   : > { %v1992_v40 = vpop.f32.mrb[116].mxu1 }
 0x317   : > { %v2001_v22 = vadd.f32 %v1992_v40, %v1908_v18  ;;  %v5717_v23 = vpop.f32.mrb[117].mxu1  ;;  %v7295_v40 = vld [vmem:[#allocation2 + $0x64] sm:$0xff] }
 0x318   : > { %v1995_v62 = vpop.f32.mrb[118].mxu1  ;;  %v6473_v23 = vld [vmem:[%s8080_s6 + $0x10] sm:$0xff]  }
 0x319   : > { %v2002_v2 = vadd.f32 %v1995_v62, %v1909_v1  ;;  %v5718_v28 = vpop.f32.mrb[119].mxu1  ;;  %v7282_v1 = vld [vmem:[#allocation2 + $0x5a] sm:$0xff]  ;;  %v3458_v62 = vpack.c.bf16 %v7295_v40, %v7293_v42 }
 0x326   : > { %v2078_v41 = vpop.f32.mrb[120].mxu1 }
 0x327   : > { %v2093_v49 = vadd.f32 %v2078_v41, %v2000_v43  ;;  %v5729_v63 = vpop.f32.mrb[121].mxu1  ;;  %v3304_v43 = vpack.c.bf16 %v7284_v4, %v7282_v1 }
 0x328   : > { %v2081_v3 = vpop.f32.mrb[122].mxu1 }
 0x329   : > { %v5730_v7 = vpop.f32.mrb[123].mxu1  ;;  %v6474_v3 = vld [vmem:[%s8080_s6 + $0x18] sm:$0xff]  }
 0x32a   : > { %v7311_v7 = vld [vmem:[#allocation2 + $0x6a] sm:$0xff] }
 0x32e   : > { %v2085_v50 = vpop.f32.mrb[124].mxu1 }
 0x32f   : > { %v2094_v48 = vadd.f32 %v2085_v50, %v2001_v22  ;;  %v5733_v54 = vpop.f32.mrb[125].mxu1  ;;  %v3381_v22 = vpack.c.bf16 %v7291_v25, %v7289_v19  ;;  %v7313_v50 = vld [vmem:[#allocation2 + $0x72] sm:$0xff] }
 0x330   : > { %v2088_v45 = vpop.f32.mrb[126].mxu1 }
 0x331   : > { %v2095_v52 = vadd.f32 %v2088_v45, %v2002_v2  ;;  %v5734_v53 = vpop.f32.mrb[127].mxu1 }
 0x332   : > { %v7320_v53 = vld [vmem:[#allocation2 + $0x6d] sm:$0xff] }
 0x33e   : > { %v2171_v55 = vpop.f32.mrb[128].mxu1 }
 0x33f   : > { %v2186_v56 = vadd.f32 %v2171_v55, %v2093_v49  ;;  %v5745_v29 = vpop.f32.mrb[129].mxu1  ;;  %v7322_v55 = vld [vmem:[#allocation2 + $0x6e] sm:$0xff] }
 0x340   : > { %v2174_v59 = vpop.f32.mrb[130].mxu1  ;;  %v7326_v29 = vld [vmem:[#allocation2 + $0x76] sm:$0xff] }
 0x341   : > { %v5746_v8 = vpop.f32.mrb[131].mxu1  ;;  %v6475_v59 = vld [vmem:[%s8080_s6 + $0x40] sm:$0xff]  }
 0x346   : > { %v2178_v5 = vpop.f32.mrb[132].mxu1 }
 0x347   : > { %v2187_v6 = vadd.f32 %v2178_v5, %v2094_v48  ;;  %v5749_v9 = vpop.f32.mrb[133].mxu1  ;;  %v4074_v5 = vpack.c.bf16 %v7326_v29, %v7322_v55 }
 0x348   : > { %v2181_v61 = vpop.f32.mrb[134].mxu1  ;;  %v6476_v9 = vld [vmem:[%s8080_s6 + $0x48] sm:$0xff]  }
 0x349   : > { %v2188_v13 = vadd.f32 %v2181_v61, %v2095_v52  ;;  %v5750_v14 = vpop.f32.mrb[135].mxu1  ;;  %v3305_v52 = vpack.c.bf16 %v7313_v50, %v7311_v7  ;;  %v6478_v61 = vld [vmem:[%s8080_s6 + $0x58] sm:$0xff]  }
 0x34e   : > { %v2257_v10 = vpop.f32.mrb[12].mxu1 }
 0x34f   : > { %v2299_v34 = vadd.f32 %v7265_v20, %v2257_v10  ;;  %v5757_v35 = vpop.f32.mrb[13].mxu1  ;;  %v2282_v2 = vadd.f32 %v2257_v10, %v7262_v12  ;;  %v6480_v10 = vld [vmem:[%s8080_s6 + $0x68] sm:$0xff]  }
 0x350   : > { %v2260_v11 = vpop.f32.mrb[14].mxu1  ;;  %v6481_v35 = vld [vmem:[%s8080_s6 + $0x70] sm:$0xff]  }
 0x351   : > { %v2300_v51 = vmax.f32 %v2299_v34, 0.0  ;;  %v5758_v47 = vpop.f32.mrb[15].mxu1  ;;  %v2283_v48 = vmax.f32 %v2282_v2, 0.0  ;;  %v6491_v2 = vld [vmem:[%s8080_s6 + $0xc0] sm:$0xff]  }
 0x353   : > { %v7268_v0 = vpack.c.bf16 %v2300_v51, %v2300_v51  ;;  %v6482_v51 = vld [vmem:[%s8080_s6 + $0x78] sm:$0xff]  }
 0x355   : > { %v2311_v24 = vrot.slane %v7268_v0, 1  ;;  %v2455_v14 = vrot.slane %v7268_v0, 2  ;;  %v6483_v0 = vld [vmem:[%s8080_s6 + $0x80] sm:$0xff]  }
 0x356   : > { %v2264_v36 = vpop.f32.mrb[136].mxu1 }
 0x357   : > { %v7274_v33 = vadd.f32 %v2264_v36, %v2186_v56  ;;  %v5761_v18 = vpop.f32.mrb[137].mxu1  ;;  %5776 = vmatmul.mubr.msk.bf16.vlgmr.msra.gmra.mrb[32].mxu0 %vm2336_vm2, %v2311_v24  ;;  %v7324_v56 = vld [vmem:[#allocation2 + $0x65] sm:$0xff]  ;;  %v6485_v36 = vld [vmem:[%s8080_s6 + $0x90] sm:$0xff]  }
 0x358   : > { %5780 = vmatpush3.bf16.msra.mxu0 %v6471_v17  ;;  %v2267_v37 = vpop.f32.mrb[138].mxu1  ;;  %5787 = vmatprep.mubr.msk.bf16.mxu0 %vm6599_vm0, %v6598_v38  ;;  %v3766_v8 = vpack.c.bf16 %v7320_v53, %v7324_v56  ;;  %v6484_v24 = vld [vmem:[%s8080_s6 + $0x88] sm:$0xff]   ;;  %v6487_v18 = vld [vmem:[%s8080_s6 + $0xa0] sm:$0xff]  }
 0x359   : > { %v5762_v39 = vpop.f32.mrb[139].mxu1  ;;  %5781 = vmatprep.subr.bf16.mxu0 %v6598_v38  ;;  %v2524_v34 = vadd.f32 %v7265_v20, %v7274_v33  ;;  %v6486_v33 = vld [vmem:[%s8080_s6 + $0x98] sm:$0xff]  }
 0x35a   : > { %v6489_v39 = vld [vmem:[%s8080_s6 + $0xb0] sm:$0xff]  }
 0x35b   : > { %v2525_v11 = vmax.f32 %v2524_v34, 0.0  ;;  %v6501_v34 = vld [vmem:[%s8080_s6 + $0x110] sm:$0xff]  }
 0x35c   : > { %5782 = vmatpush3.bf16.msra.mxu0 %v6472_v60  ;;  %v6488_v60 = vld [vmem:[%s8080_s6 + $0xa8] sm:$0xff]  }
 0x35d   : > { %5783 = vmatprep.subr.bf16.mxu0 %v6598_v38  ;;  %v2534_v47 = vpack.c.bf16 %v2525_v11, %v2525_v11  ;;  %v6502_v11 = vld [vmem:[%s8080_s6 + $0x118] sm:$0xff]  }
 0x35e   : > { %v2271_v28 = vpop.f32.mrb[140].mxu1 }
 0x35f   : > { %v7306_v41 = vadd.f32 %v2271_v28, %v2187_v6  ;;  %v5765_v49 = vpop.f32.mrb[141].mxu1  ;;  %v2292_v6 = vpack.c.bf16 %v2283_v48, %v2283_v48  ;;  %v2536_v17 = vrot.slane %v2534_v47, 1  ;;  %v2613_v37 = vrot.slane %v2534_v47, 2 }
 0x360   : > { %5784 = vmatpush3.bf16.msra.mxu0 %v6473_v23  ;;  %v2274_v63 = vpop.f32.mrb[142].mxu1  ;;  %v6490_v23 = vld [vmem:[%s8080_s6 + $0xb8] sm:$0xff]   ;;  %v2690_v28 = vrot.slane %v2534_v47, 3  ;;  %v6492_v49 = vld [vmem:[%s8080_s6 + $0xc8] sm:$0xff]  }
 0x361   : > { %v7315_v54 = vadd.f32 %v2274_v63, %v2188_v13  ;;  %v5766_v45 = vpop.f32.mrb[143].mxu1  ;;  %5785 = vmatprep.subr.bf16.mxu0 %v6598_v38  ;;  %v6479_v13 = vld [vmem:[%s8080_s6 + $0x60] sm:$0xff]   ;;  %v2759_v63 = vadd.f32 %v7265_v20, %v7306_v41 }
 0x362   : > { %v6494_v45 = vld [vmem:[%s8080_s6 + $0xd8] sm:$0xff]   ;;  %v6495_v41 = vld [vmem:[%s8080_s6 + $0xe0] sm:$0xff]  }
 0x363   : > { %v2760_v48 = vmax.f32 %v2759_v63, 0.0  ;;  %v6524_v63 = vld [vmem:[%s8078_s4 + $0x28] sm:$0xff]  }
 0x364   : > { %5786 = vmatpush3.bf16.msra.mxu0 %v6474_v3  ;;  %v6493_v3 = vld [vmem:[%s8080_s6 + $0xd0] sm:$0xff]  }
 0x365   : > { %5791 = vmatprep.subr.bf16.mxu0 %v6598_v38 }
 0x367   : > { %5788 = vmatmul.mubr.msk.bf16.vlgmr.msra.gmra.mrb[36].mxu0 %vm2336_vm2, %v2292_v6 }
 0x368   : > { %5792 = vmatpush3.bf16.msra.mxu0 %v6475_v59  ;;  %5799 = vmatprep.mubr.msk.bf16.mxu0 %vm6599_vm0, %v6598_v38  ;;  %v2769_v59 = vpack.c.bf16 %v2760_v48, %v2760_v48  ;;  %v3002_v48 = vld [vmem:[#allocation2 + $0x71] sm:$0xff] }
 0x369   : > { %5793 = vmatprep.subr.bf16.mxu0 %v6598_v38 }
 0x36a   : > { %v2771_v6 = vrot.slane %v2769_v59, 2 }
 0x36c   : > { %5794 = vmatpush3.bf16.msra.mxu0 %v6476_v9  ;;  %v6496_v9 = vld [vmem:[%s8080_s6 + $0xe8] sm:$0xff]  }
 0x36d   : > { %5795 = vmatprep.subr.bf16.mxu0 %v6598_v38 }
 0x370   : > { %5796 = vmatpush3.bf16.msra.mxu0 %v6477_v58  ;;  %v6497_v58 = vld [vmem:[%s8080_s6 + $0xf0] sm:$0xff]  }
 0x371   : > { %5797 = vmatprep.subr.bf16.mxu0 %v6598_v38 }
 0x374   : > { %5798 = vmatpush3.bf16.msra.mxu0 %v6478_v61  ;;  %v6498_v61 = vld [vmem:[%s8080_s6 + $0xf8] sm:$0xff]  }
 0x375   : > { %5803 = vmatprep.subr.bf16.mxu0 %v6598_v38 }
 0x377   : > { %5800 = vmatmul.mubr.msk.bf16.vlgmr.msra.gmra.mrb[40].mxu0 %vm2336_vm2, %v2455_v14  ;;  %v2848_v14 = vrot.slane %v2769_v59, 3 }
 0x378   : > { %5804 = vmatpush3.bf16.msra.mxu0 %v6479_v13  ;;  %5811 = vmatprep.mubr.msk.bf16.mxu0 %vm6599_vm0, %v6598_v38  ;;  %v6499_v13 = vld [vmem:[%s8080_s6 + $0x100] sm:$0xff]  }
 0x379   : > { %5805 = vmatprep.subr.bf16.mxu0 %v6598_v38 }
 0x37c   : > { %5806 = vmatpush3.bf16.msra.mxu0 %v6480_v10  ;;  %v6500_v10 = vld [vmem:[%s8080_s6 + $0x108] sm:$0xff]  }
 0x37d   : > { %5807 = vmatprep.subr.bf16.mxu0 %v6598_v38 }
 0x380   : > { %5808 = vmatpush3.bf16.msra.mxu0 %v6481_v35  ;;  %v2917_v35 = vadd.f32 %v7315_v54, %v7262_v12  ;;  %v6519_v12 = vld [vmem:[%s8078_s4 + $0x10] sm:$0xff]  }
 0x381   : > { %5809 = vmatprep.subr.bf16.mxu0 %v6598_v38  ;;  %v3007_v54 = vld [vmem:[#allocation2 + $0x52] sm:$0xff] }
 0x384   : > { %5810 = vmatpush3.bf16.msra.mxu0 %v6482_v51  ;;  %v2918_v51 = vmax.f32 %v2917_v35, 0.0  ;;  %v3221_v35 = vld [vmem:[#allocation2 + $0x54] sm:$0xff] }
 0x385   : > { %5815 = vmatprep.subr.bf16.mxu0 %v6598_v38 }
 0x386   : > { %v2927_v47 = vpack.c.bf16 %v2918_v51, %v2918_v51  ;;  %v6527_v51 = vld [vmem:[%s8078_s4 + $0x40] sm:$0xff]  }
 0x387   : > { %5812 = vmatmul.mubr.msk.bf16.vlgmr.msra.gmra.mrb[44].mxu0 %vm2336_vm2, %v2536_v17  ;;  %v3013_v17 = vpack.c.bf16 %v7282_v1, %v3007_v54 }
 0x388   : > { %5816 = vmatpush3.bf16.msra.mxu0 %v6483_v0  ;;  %5823 = vmatprep.mubr.msk.bf16.mxu0 %vm6599_vm0, %v6598_v38  ;;  %v6520_v0 = vld [vmem:[%s8078_s4 + $0x18] sm:$0xff]  }
 0x389   : > { %5817 = vmatprep.subr.bf16.mxu0 %v6598_v38 }
 0x38c   : > { %5818 = vmatpush3.bf16.msra.mxu0 %v6484_v24  ;;  %v6521_v24 = vld [vmem:[%s8078_s4] sm:$0xff]  }
 0x38d   : > { %5819 = vmatprep.subr.bf16.mxu0 %v6598_v38 }
 0x390   : > { %5820 = vmatpush3.bf16.msra.mxu0 %v6485_v36  ;;  %v6522_v36 = vld [vmem:[%s8078_s4 + $0x8] sm:$0xff]  }
 0x391   : > { %5821 = vmatprep.subr.bf16.mxu0 %v6598_v38 }
 0x394   : > { %5822 = vmatpush3.bf16.msra.mxu0 %v6486_v33  ;;  %v3014_v33 = vpack.c.bf16 %v7311_v7, %v7284_v4  ;;  %v3302_v4 = vld [vmem:[#allocation2 + $0x7a] sm:$0xff] }
 0x395   : > { %5827 = vmatprep.subr.bf16.mxu0 %v6598_v38  ;;  %v6531_v7 = vld [vmem:[%s8078_s4 + $0x60] sm:$0xff]  }
 0x397   : > { %5824 = vmatmul.mubr.msk.bf16.vlgmr.msra.gmra.mrb[48].mxu0 %vm2336_vm2, %v2613_v37 }
 0x398   : > { %5828 = vmatpush3.bf16.msra.mxu0 %v6487_v18  ;;  %5835 = vmatprep.mubr.msk.bf16.mxu0 %vm6599_vm0, %v6598_v38  ;;  %v3012_v18 = vld [vmem:[#allocation2 + $0x7a] sm:$0x1] }
 0x399   : > { %5829 = vmatprep.subr.bf16.mxu0 %v6598_v38  ;;  %v3015_v37 = vpack.c.bf16 %v3012_v18, %v7313_v50  ;;  %v7572_v18 = vld [vmem:[#allocation2 + $0x74] sm:$0xff] }
 0x39c   : > { %5830 = vmatpush3.bf16.msra.mxu0 %v6488_v60  ;;  %v2998_v60 = vld [vmem:[#allocation2 + $0x51] sm:$0xff] }
 0x39d   : > { %5831 = vmatprep.subr.bf16.mxu0 %v6598_v38 }
 0x3a0   : > { %5832 = vmatpush3.bf16.msra.mxu0 %v6489_v39  ;;  %v2999_v39 = vld [vmem:[#allocation2 + $0x59] sm:$0xff] }
 0x3a1   : > { %5833 = vmatprep.subr.bf16.mxu0 %v6598_v38 }
 0x3a4   : > { %5834 = vmatpush3.bf16.msra.mxu0 %v6490_v23  ;;  %v3004_v23 = vpack.c.bf16 %v2999_v39, %v2998_v60 }
 0x3a5   : > { %5839 = vmatprep.subr.bf16.mxu0 %v6598_v38 }
 0x3a7   : > { %5836 = vmatmul.mubr.msk.bf16.vlgmr.msra.gmra.mrb[52].mxu0 %vm2336_vm2, %v2690_v28  ;;  %v3000_v28 = vld [vmem:[#allocation2 + $0x61] sm:$0xff] }
 0x3a8   : > { %5840 = vmatpush3.bf16.msra.mxu0 %v6491_v2  ;;  %5847 = vmatprep.mubr.msk.bf16.mxu0 %vm6599_vm0, %v6598_v38  ;;  %v6523_v2 = vld [vmem:[%s8078_s4 + $0x20] sm:$0xff]  }
 0x3a9   : > { %5841 = vmatprep.subr.bf16.mxu0 %v6598_v38 }
 0x3ac   : > { %5842 = vmatpush3.bf16.msra.mxu0 %v6492_v49  ;;  %v3001_v49 = vld [vmem:[#allocation2 + $0x69] sm:$0xff] }
 0x3ad   : > { %5843 = vmatprep.subr.bf16.mxu0 %v6598_v38 }
 0x3b0   : > { %5844 = vmatpush3.bf16.msra.mxu0 %v6493_v3  ;;  %v3005_v3 = vpack.c.bf16 %v3001_v49, %v3000_v28  ;;  %v6529_v49 = vld [vmem:[%s8078_s4 + $0x50] sm:$0xff]  }
 0x3b1   : > { %5845 = vmatprep.subr.bf16.mxu0 %v6598_v38 }
 0x3b4   : > { %5846 = vmatpush3.bf16.msra.mxu0 %v6494_v45  ;;  %v3003_v45 = vld [vmem:[#allocation2 + $0x79] sm:$0x1] }
 0x3b5   : > { %5851 = vmatprep.subr.bf16.mxu0 %v6598_v38  ;;  %v3006_v59 = vpack.c.bf16 %v3003_v45, %v3002_v48 }
 0x3b7   : > { %5848 = vmatmul.mubr.msk.bf16.vlgmr.msra.gmra.mrb[56].mxu0 %vm2336_vm2, %v2771_v6 }
 0x3b8   : > { %5852 = vmatpush3.bf16.msra.mxu0 %v6495_v41  ;;  %5859 = vmatprep.mubr.msk.bf16.mxu0 %vm6599_vm0, %v6598_v38  ;;  %v3144_v41 = vld [vmem:[#allocation2 + $0x53] sm:$0xff] }
 0x3b9   : > { %5853 = vmatprep.subr.bf16.mxu0 %v6598_v38  ;;  %v3150_v6 = vpack.c.bf16 %v7289_v19, %v3144_v41  ;;  %v6532_v19 = vld [vmem:[%s8078_s4 + $0x68] sm:$0xff]  }
 0x3bc   : > { %5854 = vmatpush3.bf16.msra.mxu0 %v6496_v9  ;;  %v6525_v9 = vld [vmem:[%s8078_s4 + $0x30] sm:$0xff]  }
 0x3bd   : > { %5855 = vmatprep.subr.bf16.mxu0 %v6598_v38 }
 0x3c0   : > { %5856 = vmatpush3.bf16.msra.mxu0 %v6497_v58  ;;  %v7530_v58 = vld [vmem:[#allocation2 + $0x6b] sm:$0xff] }
 0x3c1   : > { %5857 = vmatprep.subr.bf16.mxu0 %v6598_v38 }
 0x3c4   : > { %5858 = vmatpush3.bf16.msra.mxu0 %v6498_v61  ;;  %v6526_v61 = vld [vmem:[%s8078_s4 + $0x38] sm:$0xff]  }
 0x3c5   : > { %5863 = vmatprep.subr.bf16.mxu0 %v6598_v38 }
 0x3c7   : > { %5860 = vmatmul.mubr.msk.bf16.vlgmr.msra.gmra.mrb[60].mxu0 %vm2336_vm2, %v2848_v14  ;;  %v3149_v14 = vld [vmem:[#allocation2 + $0x7b] sm:$0x1] }
 0x3c8   : > { %5864 = vmatpush3.bf16.msra.mxu0 %v6499_v13  ;;  %5871 = vmatprep.mubr.msk.bf16.mxu0 %vm6599_vm0, %v6598_v38  ;;  %v7537_v13 = vpack.c.bf16 %v7530_v58, %v7291_v25 }
 0x3c9   : > { %5865 = vmatprep.subr.bf16.mxu0 %v6598_v38 }
 0x3cc   : > { %5866 = vmatpush3.bf16.msra.mxu0 %v6500_v10  ;;  %v7544_v10 = vld [vmem:[#allocation2 + $0x73] sm:$0xff] }
 0x3cd   : > { %5867 = vmatprep.subr.bf16.mxu0 %v6598_v38 }
 0x3d0   : > { %5868 = vmatpush3.bf16.msra.mxu0 %v6501_v34  ;;  %v3152_v34 = vpack.c.bf16 %v3149_v14, %v7544_v10  ;;  %v3380_v14 = vld [vmem:[#allocation2 + $0x83] sm:$0x1] }
 0x3d1   : > { %5869 = vmatprep.subr.bf16.mxu0 %v6598_v38 }
 0x3d4   : > { %5870 = vmatpush3.bf16.msra.mxu0 %v6502_v11  ;;  %v3227_v11 = vpack.c.bf16 %v7293_v42, %v3221_v35 }
 0x3d5   : > { %5875 = vmatprep.subr.bf16.mxu0 %v6598_v38 }
 0x3d7   : > { %5872 = vmatmul.mubr.msk.bf16.vlgmr.msra.gmra.mrb[64].mxu0 %vm2336_vm2, %v2927_v47 }
 0x3d8   : > { %5876 = vmatpush3.bf16.msra.mxu0 %v6519_v12  ;;  %5879 = vmatprep.mubr.msk.bf16.mxu0 %vm6599_vm0, %v6598_v38  ;;  %v7558_v12 = vld [vmem:[#allocation2 + $0x6c] sm:$0xff] }
 0x3d9   : > { %5877 = vmatprep.subr.bf16.mxu0 %v6598_v38  ;;  %v7641_v42 = vpack.c.bf16 %v7572_v18, %v7558_v12 }
 0x3dc   : > { %5878 = vmatpush3.bf16.msra.mxu0 %v6520_v0 }
 0x3dd   : > { %5891 = vmatprep.subr.bf16.mxu0 %v6598_v38 }
 0x3df   : > { %5880 = vmatmul.mubr.msk.bf16.vlgmr.msra.gmra.mrb[68].mxu0 %vm779_vm1, %v3013_v17  ;;  %v6528_v17 = vld [vmem:[%s8078_s4 + $0x48] sm:$0xff]  }
 0x3e0   : > { %5892 = vmatpush3.bf16.msra.mxu0 %v6521_v24  ;;  %5883 = vmatprep.mubr.msk.bf16.mxu0 %vm6599_vm0, %v6598_v38 }
 0x3e1   : > { %5893 = vmatprep.subr.bf16.mxu0 %v6598_v38 }
 0x3e4   : > { %5894 = vmatpush3.bf16.msra.mxu0 %v6522_v36  ;;  %v7565_v36 = vpack.c.bf16 %v7558_v12, %v7295_v40  ;;  %v3529_v12 = vld [vmem:[#allocation2 + $0x5d] sm:$0xff] }
 0x3e5   : > { %5907 = vmatprep.subr.bf16.mxu0 %v6598_v38 }
 0x3e7   : > { %5884 = vmatmul.mubr.msk.bf16.gmra.mrb[72].mxu0 %vm779_vm1, %v3014_v33  ;;  %v3226_v33 = vld [vmem:[#allocation2 + $0x7c] sm:$0x1] }
 0x3e8   : > { %5887 = vmatprep.mubr.msk.bf16.mxu0 %vm6599_vm0, %v6598_v38 }
 0x3ef   : > { %5888 = vmatmul.mubr.msk.bf16.gmra.mrb[76].mxu0 %vm779_vm1, %v3015_v37  ;;  %v3229_v37 = vpack.c.bf16 %v3226_v33, %v7572_v18 }
 0x3f0   : > { %5895 = vmatprep.mubr.msk.bf16.mxu0 %vm6599_vm0, %v6598_v38 }
 0x3f7   : > { %5896 = vmatmul.mubr.msk.bf16.vlgmr.msra.gmra.mrb[68].mxu0 %vm779_vm1, %v3004_v23 }
 0x3f8   : > { %5908 = vmatpush3.bf16.msra.mxu0 %v6523_v2  ;;  %5899 = vmatprep.mubr.msk.bf16.mxu0 %vm6599_vm0, %v6598_v38 }
 0x3f9   : > { %5909 = vmatprep.subr.bf16.mxu0 %v6598_v38 }
 0x3fc   : > { %5910 = vmatpush3.bf16.msra.mxu0 %v6524_v63  ;;  %v6530_v63 = vld [vmem:[%s8078_s4 + $0x58] sm:$0xff]  }
 0x3fd   : > { %5923 = vmatprep.subr.bf16.mxu0 %v6598_v38 }
 0x3ff   : > { %5900 = vmatmul.mubr.msk.bf16.gmra.mrb[80].mxu0 %vm779_vm1, %v3005_v3 }
 0x400   : > { %5903 = vmatprep.mubr.msk.bf16.mxu0 %vm6599_vm0, %v6598_v38 }
 0x407   : > { %5904 = vmatmul.mubr.msk.bf16.gmra.mrb[84].mxu0 %vm779_vm1, %v3006_v59 }
 0x408   : > { %5911 = vmatprep.mubr.msk.bf16.mxu0 %vm6599_vm0, %v6598_v38 }
 0x40f   : > { %5912 = vmatmul.mubr.msk.bf16.vlgmr.msra.gmra.mrb[68].mxu0 %vm779_vm1, %v3150_v6 }
 0x410   : > { %5924 = vmatpush3.bf16.msra.mxu0 %v6525_v9  ;;  %5915 = vmatprep.mubr.msk.bf16.mxu0 %vm6599_vm0, %v6598_v38 }
 0x411   : > { %5925 = vmatprep.subr.bf16.mxu0 %v6598_v38 }
 0x414   : > { %5926 = vmatpush3.bf16.msra.mxu0 %v6526_v61  ;;  %v7620_v61 = vld [vmem:[#allocation2 + $0x7b] sm:$0xff] }
 0x415   : > { %5939 = vmatprep.subr.bf16.mxu0 %v6598_v38 }
 0x417   : > { %5916 = vmatmul.mubr.msk.bf16.gmra.mrb[88].mxu0 %vm779_vm1, %v7537_v13 }
 0x418   : > { %5919 = vmatprep.mubr.msk.bf16.mxu0 %vm6599_vm0, %v6598_v38 }
 0x41f   : > { %5920 = vmatmul.mubr.msk.bf16.gmra.mrb[92].mxu0 %vm779_vm1, %v3152_v34  ;;  %v3383_v34 = vpack.c.bf16 %v3380_v14, %v7620_v61  ;;  %v3610_v14 = vld [vmem:[#allocation2 + $0x83] sm:$0xff] }
 0x420   : > { %5927 = vmatprep.mubr.msk.bf16.mxu0 %vm6599_vm0, %v6598_v38 }
 0x427   : > { %5928 = vmatmul.mubr.msk.bf16.vlgmr.msra.gmra.mrb[68].mxu0 %vm779_vm1, %v3227_v11 }
 0x428   : > { %5940 = vmatpush3.bf16.msra.mxu0 %v6527_v51  ;;  %5931 = vmatprep.mubr.msk.bf16.mxu0 %vm6599_vm0, %v6598_v38 }
 0x429   : > { %5941 = vmatprep.subr.bf16.mxu0 %v6598_v38 }
 0x42a   : > { %v2374_v47 = vpop.f32.mrb[32].mxu0 }
 0x42b   : > { %v5777_v54 = vpop.f32.mrb[33].mxu0 }
 0x42c   : > { %v2377_v0 = vpop.f32.mrb[34].mxu0  ;;  %5942 = vmatpush3.bf16.msra.mxu0 %v6528_v17  ;;  %v6533_v54 = vld [vmem:[%s8078_s4 + $0x70] sm:$0xff]  }
 0x42d   : > { %v5778_v24 = vpop.f32.mrb[35].mxu0  ;;  %5955 = vmatprep.subr.bf16.mxu0 %v6598_v38  ;;  %v6534_v0 = vld [vmem:[%s8078_s4 + $0x78] sm:$0xff]  }
 0x42f   : > { %5932 = vmatmul.mubr.msk.bf16.gmra.mrb[96].mxu0 %vm779_vm1, %v7565_v36 }
 0x430   : > { %5935 = vmatprep.mubr.msk.bf16.mxu0 %vm6599_vm0, %v6598_v38 }
 0x437   : > { %5936 = vmatmul.mubr.msk.bf16.gmra.mrb[100].mxu0 %vm779_vm1, %v3229_v37 }
 0x438   : > { %5943 = vmatprep.mubr.msk.bf16.mxu0 %vm6599_vm0, %v6598_v38 }
 0x43a   : > { %v2441_v60 = vpop.f32.mrb[36].mxu0 }
 0x43b   : > { %v2442_v39 = vadd.f32 %v2441_v60, %v2374_v47  ;;  %v5789_v23 = vpop.f32.mrb[37].mxu0  ;;  %v7648_v60 = vld [vmem:[#allocation2 + $0x7c] sm:$0xff] }
 0x43c   : > { %v2444_v2 = vpop.f32.mrb[38].mxu0  ;;  %v3535_v23 = vpack.c.bf16 %v7324_v56, %v3529_v12  ;;  %v6543_v12 = vld [vmem:[#allocation2 + $0x84] sm:$0xff] }
 0x43d   : > { %v5790_v28 = vpop.f32.mrb[39].mxu0  ;;  %v6536_v2 = vld [vmem:[%s8078_s4 + $0x80] sm:$0xff]  }
 0x43f   : > { %5944 = vmatmul.mubr.msk.bf16.vlgmr.msra.gmra.mrb[68].mxu0 %vm779_vm1, %v3304_v43  ;;  %v3303_v43 = vld [vmem:[#allocation2 + $0x82] sm:$0x1] }
 0x440   : > { %5956 = vmatpush3.bf16.msra.mxu0 %v6529_v49  ;;  %5947 = vmatprep.mubr.msk.bf16.mxu0 %vm6599_vm0, %v6598_v38  ;;  %v3306_v41 = vpack.c.bf16 %v3303_v43, %v3302_v4  ;;  %v7662_v4 = vld [vmem:[#allocation2 + $0x75] sm:$0xff]  ;;  %v6537_v43 = vld [vmem:[%s8078_s4 + $0x88] sm:$0xff]  }
 0x441   : > { %5957 = vmatprep.subr.bf16.mxu0 %v6598_v38 }
 0x444   : > { %5958 = vmatpush3.bf16.msra.mxu0 %v6530_v63 }
 0x445   : > { %5971 = vmatprep.subr.bf16.mxu0 %v6598_v38 }
 0x447   : > { %5948 = vmatmul.mubr.msk.bf16.gmra.mrb[104].mxu0 %vm779_vm1, %v3305_v52 }
 0x448   : > { %5951 = vmatprep.mubr.msk.bf16.mxu0 %vm6599_vm0, %v6598_v38 }
 0x44a   : > { %v2517_v1 = vpop.f32.mrb[40].mxu0 }
 0x44b   : > { %v2523_v3 = vadd.f32 %v2517_v1, %v2442_v39  ;;  %v5801_v48 = vpop.f32.mrb[41].mxu0 }
 0x44c   : > { %v2520_v45 = vpop.f32.mrb[42].mxu0  ;;  %v7669_v48 = vpack.c.bf16 %v7662_v4, %v7320_v53  ;;  %v6545_v53 = vld [vmem:[%s8078_s4 + $0xb8] sm:$0xff]  }
 0x44d   : > { %v5802_v59 = vpop.f32.mrb[43].mxu0  ;;  %v3534_v45 = vld [vmem:[#allocation2 + $0x85] sm:$0x1] }
 0x44e   : > { %v7676_v59 = vld [vmem:[#allocation2 + $0x7d] sm:$0xff] }
 0x44f   : > { %5952 = vmatmul.mubr.msk.bf16.gmra.mrb[108].mxu0 %vm779_vm1, %v3306_v41  ;;  %v3537_v41 = vpack.c.bf16 %v3534_v45, %v7676_v59 }
 0x450   : > { %5959 = vmatprep.mubr.msk.bf16.mxu0 %vm6599_vm0, %v6598_v38 }
 0x457   : > { %5960 = vmatmul.mubr.msk.bf16.vlgmr.msra.gmra.mrb[68].mxu0 %vm779_vm1, %v3381_v22  ;;  %v3382_v22 = vpack.c.bf16 %v7544_v10, %v7530_v58 }
 0x458   : > { %5972 = vmatpush3.bf16.msra.mxu0 %v6531_v7  ;;  %5963 = vmatprep.mubr.msk.bf16.mxu0 %vm6599_vm0, %v6598_v38 }
 0x459   : > { %5973 = vmatprep.subr.bf16.mxu0 %v6598_v38 }
 0x45a   : > { %v2598_v50 = vpop.f32.mrb[44].mxu0 }
 0x45b   : > { %v2604_v52 = vadd.f32 %v2598_v50, %v2523_v3  ;;  %v5813_v6 = vpop.f32.mrb[45].mxu0 }
 0x45c   : > { %v2601_v9 = vpop.f32.mrb[46].mxu0  ;;  %5974 = vmatpush3.bf16.msra.mxu0 %v6532_v19  ;;  %v6539_v19 = vld [vmem:[%s8078_s4 + $0x90] sm:$0xff]  }
 0x45d   : > { %v5814_v25 = vpop.f32.mrb[47].mxu0  ;;  %5987 = vmatprep.subr.bf16.mxu0 %v6598_v38 }
 0x45e   : > { %v6540_v25 = vld [vmem:[%s8078_s4 + $0x98] sm:$0xff]  }
 0x45f   : > { %5964 = vmatmul.mubr.msk.bf16.gmra.mrb[112].mxu0 %vm779_vm1, %v3382_v22  ;;  %v3613_v22 = vpack.c.bf16 %v7620_v61, %v7544_v10  ;;  %v6541_v10 = vld [vmem:[%s8078_s4 + $0xa0] sm:$0xff]  }
 0x460   : > { %5967 = vmatprep.mubr.msk.bf16.mxu0 %vm6599_vm0, %v6598_v38 }
 0x467   : > { %5968 = vmatmul.mubr.msk.bf16.gmra.mrb[116].mxu0 %vm779_vm1, %v3383_v34  ;;  %v3611_v34 = vld [vmem:[#allocation2 + $0x8b] sm:$0x1] }
 0x468   : > { %5975 = vmatprep.mubr.msk.bf16.mxu0 %vm6599_vm0, %v6598_v38 }
 0x46a   : > { %v2675_v35 = vpop.f32.mrb[48].mxu0 }
 0x46b   : > { %v2681_v11 = vadd.f32 %v2675_v35, %v2604_v52  ;;  %v5825_v58 = vpop.f32.mrb[49].mxu0 }
 0x46c   : > { %v2678_v51 = vpop.f32.mrb[50].mxu0 }
 0x46d   : > { %v5826_v47 = vpop.f32.mrb[51].mxu0 }
 0x46e   : > { %v3614_v47 = vpack.c.bf16 %v3611_v34, %v3610_v14  ;;  %v6549_v34 = vld [vmem:[#allocation2 + $0x7e] sm:$0xff] }
 0x46f   : > { %5976 = vmatmul.mubr.msk.bf16.vlgmr.msra.gmra.mrb[68].mxu0 %vm779_vm1, %v3458_v62  ;;  %v3457_v62 = vld [vmem:[#allocation2 + $0x84] sm:$0x1] }
 0x470   : > { %5988 = vmatpush3.bf16.msra.mxu0 %v6533_v54  ;;  %5979 = vmatprep.mubr.msk.bf16.mxu0 %vm6599_vm0, %v6598_v38  ;;  %v3460_v39 = vpack.c.bf16 %v3457_v62, %v7648_v60 }
 0x471   : > { %5989 = vmatprep.subr.bf16.mxu0 %v6598_v38 }
 0x474   : > { %5990 = vmatpush3.bf16.msra.mxu0 %v6534_v0 }
 0x475   : > { %6003 = vmatprep.subr.bf16.mxu0 %v6598_v38 }
 0x477   : > { %5980 = vmatmul.mubr.msk.bf16.gmra.mrb[120].mxu0 %vm779_vm1, %v7641_v42 }
 0x478   : > { %5983 = vmatprep.mubr.msk.bf16.mxu0 %vm6599_vm0, %v6598_v38 }
 0x47a   : > { %v2752_v40 = vpop.f32.mrb[52].mxu0 }
 0x47b   : > { %v2758_v17 = vadd.f32 %v2752_v40, %v2681_v11  ;;  %v5837_v24 = vpop.f32.mrb[53].mxu0  ;;  %v6542_v40 = vld [vmem:[%s8078_s4 + $0xa8] sm:$0xff]  }
 0x47c   : > { %v2755_v33 = vpop.f32.mrb[54].mxu0  ;;  %v3688_v24 = vld [vmem:[#allocation2 + $0x8c] sm:$0x1] }
 0x47d   : > { %v5838_v37 = vpop.f32.mrb[55].mxu0 }
 0x47f   : > { %5984 = vmatmul.mubr.msk.bf16.gmra.mrb[124].mxu0 %vm779_vm1, %v3460_v39 }
 0x480   : > { %5991 = vmatprep.mubr.msk.bf16.mxu0 %vm6599_vm0, %v6598_v38 }
 0x487   : > { %5992 = vmatmul.mubr.msk.bf16.vlgmr.msra.gmra.mrb[68].mxu0 %vm779_vm1, %v3535_v23  ;;  %v3691_v23 = vpack.c.bf16 %v3688_v24, %v6543_v12 }
 0x488   : > { %6004 = vmatpush3.bf16.msra.mxu0 %v6536_v2  ;;  %5995 = vmatprep.mubr.msk.bf16.mxu0 %vm6599_vm0, %v6598_v38 }
 0x489   : > { %6005 = vmatprep.subr.bf16.mxu0 %v6598_v38 }
 0x48a   : > { %v2833_v28 = vpop.f32.mrb[56].mxu0 }
 0x48b   : > { %v2839_v49 = vadd.f32 %v2833_v28, %v2758_v17  ;;  %v5849_v63 = vpop.f32.mrb[57].mxu0 }
 0x48c   : > { %v2836_v1 = vpop.f32.mrb[58].mxu0  ;;  %6006 = vmatpush3.bf16.msra.mxu0 %v6537_v43 }
 0x48d   : > { %v5850_v3 = vpop.f32.mrb[59].mxu0  ;;  %6019 = vmatprep.subr.bf16.mxu0 %v6598_v38  ;;  %v3765_v1 = vld [vmem:[#allocation2 + $0x8d] sm:$0x1] }
 0x48f   : > { %5996 = vmatmul.mubr.msk.bf16.gmra.mrb[128].mxu0 %vm779_vm1, %v7669_v48 }
 0x490   : > { %5999 = vmatprep.mubr.msk.bf16.mxu0 %vm6599_vm0, %v6598_v38 }
 0x497   : > { %6000 = vmatmul.mubr.msk.bf16.gmra.mrb[132].mxu0 %vm779_vm1, %v3537_v41 }
 0x498   : > { %6007 = vmatprep.mubr.msk.bf16.mxu0 %vm6599_vm0, %v6598_v38 }
 0x49a   : > { %v2910_v7 = vpop.f32.mrb[60].mxu0 }
 0x49b   : > { %v2916_v50 = vadd.f32 %v2910_v7, %v2839_v49  ;;  %v5861_v52 = vpop.f32.mrb[61].mxu0 }
 0x49c   : > { %v2913_v6 = vpop.f32.mrb[62].mxu0 }
 0x49d   : > { %v5862_v9 = vpop.f32.mrb[63].mxu0  ;;  %v6547_v6 = vld [vmem:[%s8078_s4 + $0xc0] sm:$0xff]  }
 0x49f   : > { %6008 = vmatmul.mubr.msk.bf16.vlgmr.msra.gmra.mrb[68].mxu0 %vm779_vm1, %v7537_v13 }
 0x4a0   : > { %6020 = vmatpush3.bf16.msra.mxu0 %v6539_v19  ;;  %6011 = vmatprep.mubr.msk.bf16.mxu0 %vm6599_vm0, %v6598_v38 }
 0x4a1   : > { %6021 = vmatprep.subr.bf16.mxu0 %v6598_v38 }
 0x4a4   : > { %6022 = vmatpush3.bf16.msra.mxu0 %v6540_v25 }
 0x4a5   : > { %6035 = vmatprep.subr.bf16.mxu0 %v6598_v38 }
 0x4a7   : > { %6012 = vmatmul.mubr.msk.bf16.gmra.mrb[136].mxu0 %vm779_vm1, %v3613_v22 }
 0x4a8   : > { %6015 = vmatprep.mubr.msk.bf16.mxu0 %vm6599_vm0, %v6598_v38 }
 0x4aa   : > { %v2989_v13 = vpop.f32.mrb[64].mxu0 }
 0x4ab   : > { %v7699_v35 = vadd.f32 %v2989_v13, %v2916_v50  ;;  %v5873_v11 = vpop.f32.mrb[65].mxu0  ;;  %v6546_v50 = vld [vmem:[#allocation2 + $0x85] sm:$0xff] }
 0x4ac   : > { %v2992_v58 = vpop.f32.mrb[66].mxu0  ;;  %v3768_v52 = vpack.c.bf16 %v3765_v1, %v6546_v50  ;;  %v6548_v13 = vld [vmem:[%s8078_s4 + $0xc8] sm:$0xff]   ;;  %v3844_v11 = vpack.c.bf16 %v6549_v34, %v7326_v29 }
 0x4ad   : > { %v5874_v51 = vpop.f32.mrb[67].mxu0  ;;  %v6554_v1 = vld [vmem:[%s8078_s4 + $0xe8] sm:$0xff]  }
 0x4ae   : > { %v3842_v51 = vld [vmem:[#allocation2 + $0x8e] sm:$0x1] }
 0x4af   : > { %6016 = vmatmul.mubr.msk.bf16.gmra.mrb[140].mxu0 %vm779_vm1, %v3614_v47 }
 0x4b0   : > { %6023 = vmatprep.mubr.msk.bf16.mxu0 %vm6599_vm0, %v6598_v38 }
 0x4b7   : > { %6024 = vmatmul.mubr.msk.bf16.vlgmr.msra.gmra.mrb[68].mxu0 %vm779_vm1, %v7565_v36  ;;  %v3690_v36 = vpack.c.bf16 %v7648_v60, %v7572_v18  ;;  %v6544_v18 = vld [vmem:[%s8078_s4 + $0xb0] sm:$0xff]  }
 0x4b8   : > { %6036 = vmatpush3.bf16.msra.mxu0 %v6541_v10  ;;  %6027 = vmatprep.mubr.msk.bf16.mxu0 %vm6599_vm0, %v6598_v38 }
 0x4b9   : > { %6037 = vmatprep.subr.bf16.mxu0 %v6598_v38 }
 0x4ba   : > { %v3066_v61 = vpop.f32.mrb[72].mxu0 }
 0x4bb   : > { %v5885_v54 = vpop.f32.mrb[73].mxu0 }
 0x4bc   : > { %v3069_v0 = vpop.f32.mrb[74].mxu0  ;;  %6038 = vmatpush3.bf16.msra.mxu0 %v6542_v40  ;;  %v6550_v40 = vld [vmem:[#allocation2 + $0x86] sm:$0xff] }
 0x4bd   : > { %v5886_v62 = vpop.f32.mrb[75].mxu0  ;;  %6051 = vmatprep.subr.bf16.mxu0 %v6598_v38 }
 0x4be   : > { %v3845_v62 = vpack.c.bf16 %v3842_v51, %v6550_v40 }
 0x4bf   : > { %6028 = vmatmul.mubr.msk.bf16.gmra.mrb[144].mxu0 %vm779_vm1, %v3690_v36  ;;  %v6551_v36 = vld [vmem:[%s8078_s4 + $0xd0] sm:$0xff]  }
 0x4c0   : > { %6031 = vmatprep.mubr.msk.bf16.mxu0 %vm6599_vm0, %v6598_v38 }
 0x4c2   : > { %v3073_v17 = vpop.f32.mrb[76].mxu0 }
 0x4c3   : > { %v5889_v33 = vpop.f32.mrb[77].mxu0 }
 0x4c4   : > { %v3076_v37 = vpop.f32.mrb[78].mxu0 }
 0x4c5   : > { %v5890_v39 = vpop.f32.mrb[79].mxu0 }
 0x4c6   : > { %v6552_v39 = vld [vmem:[%s8078_s4 + $0xd8] sm:$0xff]  }
 0x4c7   : > { %6032 = vmatmul.mubr.msk.bf16.gmra.mrb[148].mxu0 %vm779_vm1, %v3691_v23  ;;  %v3918_v23 = vld [vmem:[#allocation2 + $0x8c] sm:$0xff] }
 0x4c8   : > { %6039 = vmatprep.mubr.msk.bf16.mxu0 %vm6599_vm0, %v6598_v38 }
 0x4cf   : > { %6040 = vmatmul.mubr.msk.bf16.vlgmr.msra.gmra.mrb[68].mxu0 %vm779_vm1, %v3766_v8  ;;  %v3767_v8 = vpack.c.bf16 %v7676_v59, %v7662_v4  ;;  %v3837_v4 = vld [vmem:[#allocation2 + $0x66] sm:$0xff] }
 0x4d0   : > { %6052 = vmatpush3.bf16.msra.mxu0 %v6544_v18  ;;  %6043 = vmatprep.mubr.msk.bf16.mxu0 %vm6599_vm0, %v6598_v38  ;;  %v3843_v59 = vpack.c.bf16 %v7322_v55, %v3837_v4  ;;  %v3919_v18 = vld [vmem:[#allocation2 + $0x94] sm:$0x1]  ;;  %v6556_v55 = vld [vmem:[%s8078_s4 + $0xf8] sm:$0xff]  }
 0x4d1   : > { %6053 = vmatprep.subr.bf16.mxu0 %v6598_v38 }
 0x4d2   : > { %v3130_v60 = vpop.f32.mrb[80].mxu0 }
 0x4d3   : > { %v3131_v2 = vadd.f32 %v3130_v60, %v3066_v61  ;;  %v5901_v28 = vpop.f32.mrb[81].mxu0 }
 0x4d4   : > { %v3133_v49 = vpop.f32.mrb[82].mxu0  ;;  %6054 = vmatpush3.bf16.msra.mxu0 %v6545_v53 }
 0x4d5   : > { %v5902_v56 = vpop.f32.mrb[83].mxu0  ;;  %6067 = vmatprep.subr.bf16.mxu0 %v6598_v38 }
 0x4d6   : > { %v3922_v56 = vpack.c.bf16 %v3919_v18, %v3918_v23 }
 0x4d7   : > { %6044 = vmatmul.mubr.msk.bf16.gmra.mrb[152].mxu0 %vm779_vm1, %v3767_v8 }
 0x4d8   : > { %6047 = vmatprep.mubr.msk.bf16.mxu0 %vm6599_vm0, %v6598_v38 }
 0x4da   : > { %v3137_v63 = vpop.f32.mrb[84].mxu0 }
 0x4db   : > { %v3138_v43 = vadd.f32 %v3137_v63, %v3073_v17  ;;  %v5905_v3 = vpop.f32.mrb[85].mxu0 }
 0x4dc   : > { %v3140_v45 = vpop.f32.mrb[86].mxu0  ;;  %v3995_v3 = vld [vmem:[#allocation2 + $0x8d] sm:$0xff] }
 0x4dd   : > { %v3141_v41 = vadd.f32 %v3140_v45, %v3076_v37  ;;  %v5906_v7 = vpop.f32.mrb[87].mxu0  ;;  %v3996_v45 = vld [vmem:[#allocation2 + $0x95] sm:$0x1] }
 0x4df   : > { %6048 = vmatmul.mubr.msk.bf16.gmra.mrb[156].mxu0 %vm779_vm1, %v3768_v52 }
 0x4e0   : > { %6055 = vmatprep.mubr.msk.bf16.mxu0 %vm6599_vm0, %v6598_v38 }
 0x4e7   : > { %6056 = vmatmul.mubr.msk.bf16.vlgmr.msra.gmra.mrb[68].mxu0 %vm779_vm1, %v3843_v59  ;;  %v3999_v59 = vpack.c.bf16 %v3996_v45, %v3995_v3 }
 0x4e8   : > { %6068 = vmatpush3.bf16.msra.mxu0 %v6547_v6  ;;  %6059 = vmatprep.mubr.msk.bf16.mxu0 %vm6599_vm0, %v6598_v38 }
 0x4e9   : > { %6069 = vmatprep.subr.bf16.mxu0 %v6598_v38 }
 0x4ea   : > { %v3203_v9 = vpop.f32.mrb[88].mxu0 }
 0x4eb   : > { %v3218_v19 = vadd.f32 %v3203_v9, %v3131_v2  ;;  %v5917_v25 = vpop.f32.mrb[89].mxu0 }
 0x4ec   : > { %v3206_v22 = vpop.f32.mrb[90].mxu0  ;;  %6070 = vmatpush3.bf16.msra.mxu0 %v6548_v13  ;;  %v4073_v25 = vld [vmem:[#allocation2 + $0x96] sm:$0x1] }
 0x4ed   : > { %v5918_v14 = vpop.f32.mrb[91].mxu0  ;;  %6083 = vmatprep.subr.bf16.mxu0 %v6598_v38 }
 0x4ef   : > { %6060 = vmatmul.mubr.msk.bf16.gmra.mrb[160].mxu0 %vm779_vm1, %v3844_v11 }
 0x4f0   : > { %6063 = vmatprep.mubr.msk.bf16.mxu0 %vm6599_vm0, %v6598_v38 }
 0x4f2   : > { %v3210_v58 = vpop.f32.mrb[92].mxu0 }
 0x4f3   : > { %v3219_v47 = vadd.f32 %v3210_v58, %v3138_v43  ;;  %v5921_v10 = vpop.f32.mrb[93].mxu0 }
 0x4f4   : > { %v3213_v61 = vpop.f32.mrb[94].mxu0  ;;  %v4148_v10 = vld [vmem:[#allocation2 + $0x87] sm:$0xff] }
 0x4f5   : > { %v3220_v54 = vadd.f32 %v3213_v61, %v3141_v41  ;;  %v5922_v0 = vpop.f32.mrb[95].mxu0 }
 0x4f7   : > { %6064 = vmatmul.mubr.msk.bf16.gmra.mrb[164].mxu0 %vm779_vm1, %v3845_v62 }
 0x4f8   : > { %6071 = vmatprep.mubr.msk.bf16.mxu0 %vm6599_vm0, %v6598_v38 }
 0x4ff   : > { %6072 = vmatmul.mubr.msk.bf16.vlgmr.msra.gmra.mrb[68].mxu0 %vm779_vm1, %v7641_v42 }
 0x500   : > { %6084 = vmatpush3.bf16.msra.mxu0 %v6551_v36  ;;  %6075 = vmatprep.mubr.msk.bf16.mxu0 %vm6599_vm0, %v6598_v38 }
 0x501   : > { %6085 = vmatprep.subr.bf16.mxu0 %v6598_v38 }
 0x502   : > { %v3280_v17 = vpop.f32.mrb[96].mxu0 }
 0x503   : > { %v3295_v24 = vadd.f32 %v3280_v17, %v3218_v19  ;;  %v5933_v33 = vpop.f32.mrb[97].mxu0  ;;  %v4072_v19 = vld [vmem:[#allocation2 + $0x8e] sm:$0xff] }
 0x504   : > { %v3283_v37 = vpop.f32.mrb[98].mxu0  ;;  %6086 = vmatpush3.bf16.msra.mxu0 %v6552_v39  ;;  %v4076_v58 = vpack.c.bf16 %v4073_v25, %v4072_v19  ;;  %v4149_v17 = vld [vmem:[#allocation2 + $0x8f] sm:$0xff] }
 0x505   : > { %v5934_v42 = vpop.f32.mrb[99].mxu0  ;;  %6099 = vmatprep.subr.bf16.mxu0 %v6598_v38 }
 0x507   : > { %6076 = vmatmul.mubr.msk.bf16.gmra.mrb[168].mxu0 %vm779_vm1, %v3921_v46 }
 0x508   : > { %6079 = vmatprep.mubr.msk.bf16.mxu0 %vm6599_vm0, %v6598_v38 }
 0x50a   : > { %v3287_v12 = vpop.f32.mrb[100].mxu0 }
 0x50b   : > { %v3296_v60 = vadd.f32 %v3287_v12, %v3219_v47  ;;  %v5937_v2 = vpop.f32.mrb[101].mxu0  ;;  %v4147_v47 = vld [vmem:[#allocation2 + $0x7f] sm:$0xff] }
 0x50c   : > { %v3290_v28 = vpop.f32.mrb[102].mxu0  ;;  %v4152_v62 = vpack.c.bf16 %v4148_v10, %v4147_v47 }
 0x50d   : > { %v3297_v49 = vadd.f32 %v3290_v28, %v3220_v54  ;;  %v5938_v53 = vpop.f32.mrb[103].mxu0 }
 0x50f   : > { %6080 = vmatmul.mubr.msk.bf16.gmra.mrb[172].mxu0 %vm779_vm1, %v3922_v56 }
 0x510   : > { %6087 = vmatprep.mubr.msk.bf16.mxu0 %vm6599_vm0, %v6598_v38 }
 0x517   : > { %6088 = vmatmul.mubr.msk.bf16.vlgmr.msra.gmra.mrb[68].mxu0 %vm779_vm1, %v7669_v48 }
 0x518   : > { %6100 = vmatpush3.bf16.msra.mxu0 %v6553_v15  ;;  %6091 = vmatprep.mubr.msk.bf16.mxu0 %vm6599_vm0, %v6598_v38 }
 0x519   : > { %6101 = vmatprep.subr.bf16.mxu0 %v6598_v38 }
 0x51a   : > { %v3357_v21 = vpop.f32.mrb[104].mxu0 }
 0x51b   : > { %v3372_v46 = vadd.f32 %v3357_v21, %v3295_v24  ;;  %v5949_v8 = vpop.f32.mrb[105].mxu0  ;;  %v4150_v24 = vld [vmem:[#allocation2 + $0x97] sm:$0x1] }
 0x51c   : > { %v3360_v63 = vpop.f32.mrb[106].mxu0  ;;  %6102 = vmatpush3.bf16.msra.mxu0 %v6554_v1  ;;  %v4153_v23 = vpack.c.bf16 %v4150_v24, %v4149_v17 }
 0x51d   : > { %v5950_v48 = vpop.f32.mrb[107].mxu0  ;;  %6115 = vmatprep.subr.bf16.mxu0 %v6598_v38 }
 0x51f   : > { %6092 = vmatmul.mubr.msk.bf16.gmra.mrb[176].mxu0 %vm779_vm1, %v3998_v31 }
 0x520   : > { %6095 = vmatprep.mubr.msk.bf16.mxu0 %vm6599_vm0, %v6598_v38 }
 0x522   : > { %v3364_v43 = vpop.f32.mrb[108].mxu0 }
 0x523   : > { %v3373_v41 = vadd.f32 %v3364_v43, %v3296_v60  ;;  %v5953_v7 = vpop.f32.mrb[109].mxu0 }
 0x524   : > { %v3367_v50 = vpop.f32.mrb[110].mxu0 }
 0x525   : > { %v3374_v52 = vadd.f32 %v3367_v50, %v3297_v49  ;;  %v5954_v4 = vpop.f32.mrb[111].mxu0 }
 0x527   : > { %6096 = vmatmul.mubr.msk.bf16.gmra.mrb[180].mxu0 %vm779_vm1, %v3999_v59 }
 0x528   : > { %6103 = vmatprep.mubr.msk.bf16.mxu0 %vm6599_vm0, %v6598_v38 }
 0x52f   : > { %6104 = vmatmul.mubr.msk.bf16.vlgmr.msra.gmra.mrb[68].mxu0 %vm779_vm1, %v4074_v5 }
 0x530   : > { %6116 = vmatpush3.bf16.msra.mxu0 %v6555_v16  ;;  %6107 = vmatprep.mubr.msk.bf16.mxu0 %vm6599_vm0, %v6598_v38 }
 0x531   : > { %6117 = vmatprep.subr.bf16.mxu0 %v6598_v38 }
 0x532   : > { %v3434_v26 = vpop.f32.mrb[112].mxu0 }
 0x533   : > { %v3449_v31 = vadd.f32 %v3434_v26, %v3372_v46  ;;  %v5965_v6 = vpop.f32.mrb[113].mxu0 }
 0x534   : > { %v3437_v9 = vpop.f32.mrb[114].mxu0  ;;  %6118 = vmatpush3.bf16.msra.mxu0 %v6556_v55 }
 0x535   : > { %v5966_v29 = vpop.f32.mrb[115].mxu0 }
 0x537   : > { %6108 = vmatmul.mubr.msk.bf16.gmra.mrb[184].mxu0 %vm779_vm1, %v4075_v32  ;;  %v4151_v32 = vpack.c.bf16 %v4146_v30, %v4145_v27 }
 0x538   : > { %6111 = vmatprep.mubr.msk.bf16.mxu0 %vm6599_vm0, %v6598_v38 }
 0x53a   : > { %v3441_v5 = vpop.f32.mrb[116].mxu0 }
 0x53b   : > { %v3450_v22 = vadd.f32 %v3441_v5, %v3373_v41  ;;  %v5969_v13 = vpop.f32.mrb[117].mxu0 }
 0x53c   : > { %v3444_v14 = vpop.f32.mrb[118].mxu0 }
 0x53d   : > { %v3451_v34 = vadd.f32 %v3444_v14, %v3374_v52  ;;  %v5970_v11 = vpop.f32.mrb[119].mxu0 }
 0x53f   : > { %6112 = vmatmul.mubr.msk.bf16.gmra.mrb[188].mxu0 %vm779_vm1, %v4076_v58 }
 0x540   : > { %6119 = vmatprep.mubr.msk.bf16.mxu0 %vm6599_vm0, %v6598_v38 }
 0x547   : > { %6120 = vmatmul.mubr.msk.bf16.vlgmr.msra.gmra.mrb[68].mxu0 %vm779_vm1, %v4151_v32 }
 0x548   : > { %6123 = vmatprep.mubr.msk.bf16.mxu0 %vm6599_vm0, %v6598_v38 }
 0x54a   : > { %v3511_v51 = vpop.f32.mrb[120].mxu0 }
 0x54b   : > { %v3526_v61 = vadd.f32 %v3511_v51, %v3449_v31  ;;  %v5981_v54 = vpop.f32.mrb[121].mxu0 }
 0x54c   : > { %v3514_v0 = vpop.f32.mrb[122].mxu0 }
 0x54d   : > { %v5982_v40 = vpop.f32.mrb[123].mxu0 }
 0x54f   : > { %6124 = vmatmul.mubr.msk.bf16.gmra.mrb[192].mxu0 %vm779_vm1, %v4152_v62 }
 0x550   : > { %6127 = vmatprep.mubr.msk.bf16.mxu0 %vm6599_vm0, %v6598_v38 }
 0x552   : > { %v3518_v36 = vpop.f32.mrb[124].mxu0 }
 0x553   : > { %v3527_v33 = vadd.f32 %v3518_v36, %v3450_v22  ;;  %v5985_v37 = vpop.f32.mrb[125].mxu0 }
 0x554   : > { %v3521_v39 = vpop.f32.mrb[126].mxu0 }
 0x555   : > { %v3528_v42 = vadd.f32 %v3521_v39, %v3451_v34  ;;  %v5986_v12 = vpop.f32.mrb[127].mxu0 }
 0x557   : > { %6128 = vmatmul.mubr.msk.bf16.gmra.mrb[196].mxu0 %vm779_vm1, %v4153_v23 }
 0x562   : > { %v3588_v18 = vpop.f32.mrb[128].mxu0 }
 0x563   : > { %v3603_v60 = vadd.f32 %v3588_v18, %v3526_v61  ;;  %v5997_v2 = vpop.f32.mrb[129].mxu0 }
 0x564   : > { %v3591_v28 = vpop.f32.mrb[130].mxu0 }
 0x565   : > { %v5998_v49 = vpop.f32.mrb[131].mxu0 }
 0x56a   : > { %v3595_v53 = vpop.f32.mrb[132].mxu0 }
 0x56b   : > { %v3604_v56 = vadd.f32 %v3595_v53, %v3527_v33  ;;  %v6001_v15 = vpop.f32.mrb[133].mxu0 }
 0x56c   : > { %v3598_v21 = vpop.f32.mrb[134].mxu0 }
 0x56d   : > { %v3605_v46 = vadd.f32 %v3598_v21, %v3528_v42  ;;  %v6002_v8 = vpop.f32.mrb[135].mxu0 }
 0x57a   : > { %v3665_v63 = vpop.f32.mrb[136].mxu0 }
 0x57b   : > { %v3680_v1 = vadd.f32 %v3665_v63, %v3603_v60  ;;  %v6013_v48 = vpop.f32.mrb[137].mxu0 }
 0x57c   : > { %v3668_v43 = vpop.f32.mrb[138].mxu0 }
 0x57d   : > { %v6014_v3 = vpop.f32.mrb[139].mxu0 }
 0x582   : > { %v3672_v45 = vpop.f32.mrb[140].mxu0 }
 0x583   : > { %v3681_v41 = vadd.f32 %v3672_v45, %v3604_v56  ;;  %v6017_v7 = vpop.f32.mrb[141].mxu0 }
 0x584   : > { %v3675_v50 = vpop.f32.mrb[142].mxu0 }
 0x585   : > { %v3682_v52 = vadd.f32 %v3675_v50, %v3605_v46  ;;  %v6018_v4 = vpop.f32.mrb[143].mxu0 }
 0x592   : > { %v3742_v59 = vpop.f32.mrb[144].mxu0 }
 0x593   : > { %v3757_v16 = vadd.f32 %v3742_v59, %v3680_v1  ;;  %v6029_v26 = vpop.f32.mrb[145].mxu0 }
 0x594   : > { %v3745_v31 = vpop.f32.mrb[146].mxu0 }
 0x595   : > { %v6030_v6 = vpop.f32.mrb[147].mxu0 }
 0x59a   : > { %v3749_v9 = vpop.f32.mrb[148].mxu0 }
 0x59b   : > { %v3758_v55 = vadd.f32 %v3749_v9, %v3681_v41  ;;  %v6033_v29 = vpop.f32.mrb[149].mxu0 }
 0x59c   : > { %v3752_v5 = vpop.f32.mrb[150].mxu0 }
 0x59d   : > { %v3759_v19 = vadd.f32 %v3752_v5, %v3682_v52  ;;  %v6034_v25 = vpop.f32.mrb[151].mxu0 }
 0x5aa   : > { %v3819_v22 = vpop.f32.mrb[152].mxu0 }
 0x5ab   : > { %v3834_v13 = vadd.f32 %v3819_v22, %v3757_v16  ;;  %v6045_v14 = vpop.f32.mrb[153].mxu0 }
 0x5ac   : > { %v3822_v34 = vpop.f32.mrb[154].mxu0 }
 0x5ad   : > { %v6046_v11 = vpop.f32.mrb[155].mxu0 }
 0x5b2   : > { %v3826_v58 = vpop.f32.mrb[156].mxu0 }
 0x5b3   : > { %v3835_v27 = vadd.f32 %v3826_v58, %v3758_v55  ;;  %v6049_v30 = vpop.f32.mrb[157].mxu0 }
 0x5b4   : > { %v3829_v32 = vpop.f32.mrb[158].mxu0  ;;  %v6557_v30 = vld [vmem:[%s8080_s6] sm:$0xff]  }
 0x5b5   : > { %v3836_v51 = vadd.f32 %v3829_v32, %v3759_v19  ;;  %v6050_v47 = vpop.f32.mrb[159].mxu0 }
 0x5b6   : > { %v6558_v47 = vld [vmem:[%s8080_s6 + $0x8] sm:$0xff]  }
 0x5c2   : > { %v3896_v10 = vpop.f32.mrb[160].mxu0 }
 0x5c3   : > { %v3911_v61 = vadd.f32 %v3896_v10, %v3834_v13  ;;  %v6061_v54 = vpop.f32.mrb[161].mxu0  ;;  %v7850_v10 = vld [vmem:[%s8079_s5] sm:$0x1] }
 0x5c4   : > { %v3899_v0 = vpop.f32.mrb[162].mxu0 }
 0x5c5   : > { %v6062_v40 = vpop.f32.mrb[163].mxu0 }
 0x5ca   : > { %v3903_v62 = vpop.f32.mrb[164].mxu0 }
 0x5cb   : > { %v3912_v36 = vadd.f32 %v3903_v62, %v3835_v27  ;;  %v6065_v17 = vpop.f32.mrb[165].mxu0  ;;  %v6560_v62 = vld [vmem:[%s8080_s6 + $0x10] sm:$0xff]  }
 0x5cc   : > { %v3906_v24 = vpop.f32.mrb[166].mxu0 }
 0x5cd   : > { %v3913_v33 = vadd.f32 %v3906_v24, %v3836_v51  ;;  %v6066_v37 = vpop.f32.mrb[167].mxu0 }
 0x5ce   : > { %v6561_v37 = vld [vmem:[%s8080_s6 + $0x18] sm:$0xff]  }
 0x5da   : > { %v3973_v39 = vpop.f32.mrb[168].mxu0 }
 0x5db   : > { %v3988_v42 = vadd.f32 %v3973_v39, %v3911_v61  ;;  %v6077_v12 = vpop.f32.mrb[169].mxu0 }
 0x5dc   : > { %v3976_v23 = vpop.f32.mrb[170].mxu0  ;;  %v6563_v12 = vld [vmem:[%s8080_s6 + $0x48] sm:$0xff]  }
 0x5dd   : > { %v6078_v18 = vpop.f32.mrb[171].mxu0  ;;  %v6564_v23 = vld [vmem:[%s8080_s6 + $0x50] sm:$0xff]  }
 0x5de   : > { %v6565_v18 = vld [vmem:[%s8080_s6 + $0x58] sm:$0xff]  }
 0x5e2   : > { %v3980_v60 = vpop.f32.mrb[172].mxu0 }
 0x5e3   : > { %v3989_v2 = vadd.f32 %v3980_v60, %v3912_v36  ;;  %v6081_v28 = vpop.f32.mrb[173].mxu0 }
 0x5e4   : > { %v3983_v49 = vpop.f32.mrb[174].mxu0 }
 0x5e5   : > { %v3990_v53 = vadd.f32 %v3983_v49, %v3913_v33  ;;  %v6082_v56 = vpop.f32.mrb[175].mxu0  ;;  %v6567_v49 = vld [vmem:[%s8080_s6 + $0x68] sm:$0xff]  }
 0x5e6   : > { %v6568_v56 = vld [vmem:[%s8080_s6 + $0x70] sm:$0xff]  }
 0x5f2   : > { %v4050_v15 = vpop.f32.mrb[176].mxu0 }
 0x5f3   : > { %v4065_v21 = vadd.f32 %v4050_v15, %v3988_v42  ;;  %v6093_v46 = vpop.f32.mrb[177].mxu0  ;;  %v6562_v42 = vld [vmem:[%s8080_s6 + $0x40] sm:$0xff]  }
 0x5f4   : > { %v4053_v8 = vpop.f32.mrb[178].mxu0 }
 0x5f5   : > { %v6094_v63 = vpop.f32.mrb[179].mxu0  ;;  %v6570_v8 = vld [vmem:[%s8080_s6 + $0x80] sm:$0xff]  }
 0x5f6   : > { %v6571_v63 = vld [vmem:[%s8080_s6 + $0x88] sm:$0xff]  }
 0x5fa   : > { %v4057_v1 = vpop.f32.mrb[180].mxu0 }
 0x5fb   : > { %v4066_v48 = vadd.f32 %v4057_v1, %v3989_v2  ;;  %v6097_v43 = vpop.f32.mrb[181].mxu0  ;;  %v6566_v2 = vld [vmem:[%s8080_s6 + $0x60] sm:$0xff]   ;;  %v6572_v1 = vld [vmem:[%s8080_s6 + $0x90] sm:$0xff]  }
 0x5fc   : > { %v4060_v3 = vpop.f32.mrb[182].mxu0 }
 0x5fd   : > { %v4067_v45 = vadd.f32 %v4060_v3, %v3990_v53  ;;  %v6098_v41 = vpop.f32.mrb[183].mxu0  ;;  %v6574_v3 = vld [vmem:[%s8080_s6 + $0xa0] sm:$0xff]  }
 0x5fe   : > { %v6576_v41 = vld [vmem:[%s8080_s6 + $0xb0] sm:$0xff]  }
 0x60a   : > { %v4127_v7 = vpop.f32.mrb[184].mxu0 }
 0x60b   : > { %v4142_v50 = vadd.f32 %v4127_v7, %v4065_v21  ;;  %v6109_v52 = vpop.f32.mrb[185].mxu0  ;;  %v6569_v21 = vld [vmem:[%s8080_s6 + $0x78] sm:$0xff]  }
 0x60c   : > { %v4130_v4 = vpop.f32.mrb[186].mxu0  ;;  %v6577_v7 = vld [vmem:[%s8080_s6 + $0xb8] sm:$0xff]   ;;  %v6578_v52 = vld [vmem:[%s8080_s6 + $0xc0] sm:$0xff]  }
 0x60d   : > { %v6110_v59 = vpop.f32.mrb[187].mxu0 }
 0x60e   : > { %v6579_v59 = vld [vmem:[%s8080_s6 + $0xc8] sm:$0xff]  }
 0x612   : > { %v4134_v16 = vpop.f32.mrb[188].mxu0 }
 0x613   : > { %v4143_v26 = vadd.f32 %v4134_v16, %v4066_v48  ;;  %v6113_v31 = vpop.f32.mrb[189].mxu0  ;;  %v6573_v48 = vld [vmem:[%s8080_s6 + $0x98] sm:$0xff]  }
 0x614   : > { %v4137_v6 = vpop.f32.mrb[190].mxu0 }
 0x615   : > { %v4144_v9 = vadd.f32 %v4137_v6, %v4067_v45  ;;  %v6114_v55 = vpop.f32.mrb[191].mxu0  ;;  %v6575_v45 = vld [vmem:[%s8080_s6 + $0xa8] sm:$0xff]  }
 0x616   : > { %v6583_v55 = vld [vmem:[%s8080_s6 + $0xe8] sm:$0xff]  }
 0x61a   : > { %v4197_v29 = vpop.f32.mrb[68].mxu0 }
 0x61b   : > { %v4225_v5 = vadd.f32 %v4197_v29, %v7265_v20  ;;  %v6121_v19 = vpop.f32.mrb[69].mxu0  ;;  %v4222_v61 = vadd.f32 %v7850_v10, %v4197_v29  ;;  %v6584_v29 = vld [vmem:[%s8080_s6 + $0xf0] sm:$0xff]  }
 0x61c   : > { %v4200_v25 = vpop.f32.mrb[70].mxu0 }
 0x61d   : > { %v4226_v22 = vmax.f32 %v4225_v5, 0.0  ;;  %v6122_v13 = vpop.f32.mrb[71].mxu0  ;;  %v4223_v17 = vmax.f32 %v4222_v61, 0.0  ;;  %v6585_v5 = vld [vmem:[%s8080_s6 + $0xf8] sm:$0xff]   ;;  %v6586_v25 = vld [vmem:[%s8080_s6 + $0x100] sm:$0xff]   ;;  %v6506_v61 = vld [vmem:[%s8082_s8 + $0x8] sm:$0xff]  }
 0x61f   : > { %v4227_v14 = vpack.c.bf16 %v4226_v22, %v4226_v22  ;;  %v4224_v39 = vpack.c.bf16 %v4223_v17, %v4223_v17  ;;  %v6587_v22 = vld [vmem:[%s8080_s6 + $0x108] sm:$0xff]   ;;  %v6509_v17 = vld [vmem:[%s8082_s8 + $0x58] sm:$0xff]  }
 0x621   : > { %v4229_v34 = vrot.slane %v4227_v14, 1  ;;  %v4316_v60 = vrot.slane %v4227_v14, 2  ;;  %v6588_v14 = vld [vmem:[%s8080_s6 + $0x110] sm:$0xff]  }
 0x622   : > { %v4204_v11 = vpop.f32.mrb[192].mxu0 }
 0x623   : > { %v4219_v58 = vadd.f32 %v4204_v11, %v4142_v50  ;;  %v6125_v27 = vpop.f32.mrb[193].mxu0  ;;  %6140 = vmatmul.mubr.msk.bf16.vlgmr.msra.gmra.mrb[144].mxu1 %vm2336_vm2, %v4229_v34  ;;  %v6589_v11 = vld [vmem:[%s8080_s6 + $0x118] sm:$0xff]  }
 0x624   : > { %6144 = vmatpush3.bf16.msra.mxu1 %v6557_v30  ;;  %v4207_v32 = vpop.f32.mrb[194].mxu0  ;;  %6151 = vmatprep.mubr.msk.bf16.mxu1 %vm6599_vm0, %v6598_v38 }
 0x625   : > { %v6126_v51 = vpop.f32.mrb[195].mxu0  ;;  %6145 = vmatprep.subr.bf16.mxu1 %v6598_v38  ;;  %v4361_v28 = vadd.f32 %v4219_v58, %v7265_v20 }
 0x627   : > { %v4362_v53 = vmax.f32 %v4361_v28, 0.0 }
 0x628   : > { %6146 = vmatpush3.bf16.msra.mxu1 %v6558_v47  ;;  %v6503_v47 = vld [vmem:[%s8082_s8 + $0x40] sm:$0xff]  }
 0x629   : > { %6147 = vmatprep.subr.bf16.mxu1 %v6598_v38  ;;  %v4363_v15 = vpack.c.bf16 %v4362_v53, %v4362_v53  ;;  %v6517_v53 = vld [vmem:[%s8082_s8 + $0x78] sm:$0xff]  }
 0x62a   : > { %v4211_v54 = vpop.f32.mrb[196].mxu0 }
 0x62b   : > { %v7854_v0 = vadd.f32 %v4211_v54, %v4143_v26  ;;  %v6129_v40 = vpop.f32.mrb[197].mxu0  ;;  %v4365_v46 = vrot.slane %v4363_v15, 1  ;;  %v4410_v43 = vrot.slane %v4363_v15, 2  ;;  %v4455_v50 = vrot.slane %v4363_v15, 3  ;;  %v6580_v26 = vld [vmem:[%s8080_s6 + $0xd0] sm:$0xff]  }
 0x62c   : > { %6148 = vmatpush3.bf16.msra.mxu1 %v6560_v62  ;;  %v4214_v36 = vpop.f32.mrb[198].mxu0  ;;  %v6507_v54 = vld [vmem:[%s8082_s8 + $0x50] sm:$0xff]  }
 0x62d   : > { %v7859_v24 = vadd.f32 %v4214_v36, %v4144_v9  ;;  %v6130_v33 = vpop.f32.mrb[199].mxu0  ;;  %6149 = vmatprep.subr.bf16.mxu1 %v6598_v38  ;;  %v4500_v4 = vadd.f32 %v7854_v0, %v7265_v20  ;;  %v6581_v20 = vld [vmem:[%s8080_s6 + $0xd8] sm:$0xff]   ;;  %v6582_v9 = vld [vmem:[%s8080_s6 + $0xe0] sm:$0xff]   ;;  %v6508_v40 = vld [vmem:[%s8082_s8 + $0x10] sm:$0xff]  }
 0x62f   : > { %v4501_v16 = vmax.f32 %v4500_v4, 0.0  ;;  %v4594_v13 = vadd.f32 %v7850_v10, %v7859_v24  ;;  %v6505_v10 = vld [vmem:[%s8082_s8 + $0x48] sm:$0xff]  }
 0x630   : > { %6150 = vmatpush3.bf16.msra.mxu1 %v6561_v37  ;;  %v6510_v37 = vld [vmem:[%s8082_s8 + $0x18] sm:$0xff]  }
 0x631   : > { %6155 = vmatprep.subr.bf16.mxu1 %v6598_v38  ;;  %v4502_v31 = vpack.c.bf16 %v4501_v16, %v4501_v16  ;;  %v4595_v34 = vmax.f32 %v4594_v13, 0.0 }
 0x633   : > { %6152 = vmatmul.mubr.msk.bf16.vlgmr.msra.gmra.mrb[148].mxu1 %vm2336_vm2, %v4224_v39  ;;  %v4504_v6 = vrot.slane %v4502_v31, 2  ;;  %v4549_v19 = vrot.slane %v4502_v31, 3  ;;  %v4596_v58 = vpack.c.bf16 %v4595_v34, %v4595_v34  ;;  %v6511_v39 = vld [vmem:[%s8082_s8 + $0x60] sm:$0xff]  }
 0x634   : > { %6156 = vmatpush3.bf16.msra.mxu1 %v6562_v42  ;;  %6163 = vmatprep.mubr.msk.bf16.mxu1 %vm6599_vm0, %v6598_v38  ;;  %v6512_v42 = vld [vmem:[%s8082_s8 + $0x20] sm:$0xff]  }
 0x635   : > { %6157 = vmatprep.subr.bf16.mxu1 %v6598_v38 }
 0x638   : > { %6158 = vmatpush3.bf16.msra.mxu1 %v6563_v12  ;;  %v6513_v12 = vld [vmem:[%s8082_s8 + $0x68] sm:$0xff]  }
 0x639   : > { %6159 = vmatprep.subr.bf16.mxu1 %v6598_v38 }
 0x63c   : > { %6160 = vmatpush3.bf16.msra.mxu1 %v6564_v23  ;;  %v6514_v23 = vld [vmem:[%s8082_s8 + $0x28] sm:$0xff]  }
 0x63d   : > { %6161 = vmatprep.subr.bf16.mxu1 %v6598_v38 }
 0x640   : > { %6162 = vmatpush3.bf16.msra.mxu1 %v6565_v18  ;;  %v6515_v18 = vld [vmem:[%s8082_s8 + $0x70] sm:$0xff]  }
 0x641   : > { %6167 = vmatprep.subr.bf16.mxu1 %v6598_v38 }
 0x643   : > { %6164 = vmatmul.mubr.msk.bf16.vlgmr.msra.gmra.mrb[152].mxu1 %vm2336_vm2, %v4316_v60 }
 0x644   : > { %6168 = vmatpush3.bf16.msra.mxu1 %v6566_v2  ;;  %6175 = vmatprep.mubr.msk.bf16.mxu1 %vm6599_vm0, %v6598_v38  ;;  %v6516_v2 = vld [vmem:[%s8082_s8 + $0x30] sm:$0xff]  }
 0x645   : > { %6169 = vmatprep.subr.bf16.mxu1 %v6598_v38 }
 0x648   : > { %6170 = vmatpush3.bf16.msra.mxu1 %v6567_v49 }
 0x649   : > { %6171 = vmatprep.subr.bf16.mxu1 %v6598_v38 }
 0x64c   : > { %6172 = vmatpush3.bf16.msra.mxu1 %v6568_v56 }
 0x64d   : > { %6173 = vmatprep.subr.bf16.mxu1 %v6598_v38 }
 0x650   : > { %6174 = vmatpush3.bf16.msra.mxu1 %v6569_v21  ;;  %v6518_v21 = vld [vmem:[%s8082_s8 + $0x38] sm:$0xff]  }
 0x651   : > { %6179 = vmatprep.subr.bf16.mxu1 %v6598_v38 }
 0x653   : > { %6176 = vmatmul.mubr.msk.bf16.vlgmr.msra.gmra.mrb[156].mxu1 %vm2336_vm2, %v4365_v46 }
 0x654   : > { %6180 = vmatpush3.bf16.msra.mxu1 %v6570_v8  ;;  %6187 = vmatprep.mubr.msk.bf16.mxu1 %vm6599_vm0, %v6598_v38 }
 0x655   : > { %6181 = vmatprep.subr.bf16.mxu1 %v6598_v38 }
 0x658   : > { %6182 = vmatpush3.bf16.msra.mxu1 %v6571_v63 }
 0x659   : > { %6183 = vmatprep.subr.bf16.mxu1 %v6598_v38 }
 0x65c   : > { %6184 = vmatpush3.bf16.msra.mxu1 %v6572_v1 }
 0x65d   : > { %6185 = vmatprep.subr.bf16.mxu1 %v6598_v38 }
 0x660   : > { %6186 = vmatpush3.bf16.msra.mxu1 %v6573_v48 }
 0x661   : > { %6191 = vmatprep.subr.bf16.mxu1 %v6598_v38 }
 0x663   : > { %6188 = vmatmul.mubr.msk.bf16.vlgmr.msra.gmra.mrb[160].mxu1 %vm2336_vm2, %v4410_v43 }
 0x664   : > { %6192 = vmatpush3.bf16.msra.mxu1 %v6574_v3  ;;  %6199 = vmatprep.mubr.msk.bf16.mxu1 %vm6599_vm0, %v6598_v38 }
 0x665   : > { %6193 = vmatprep.subr.bf16.mxu1 %v6598_v38 }
 0x668   : > { %6194 = vmatpush3.bf16.msra.mxu1 %v6575_v45 }
 0x669   : > { %6195 = vmatprep.subr.bf16.mxu1 %v6598_v38 }
 0x66c   : > { %6196 = vmatpush3.bf16.msra.mxu1 %v6576_v41 }
 0x66d   : > { %6197 = vmatprep.subr.bf16.mxu1 %v6598_v38 }
 0x670   : > { %6198 = vmatpush3.bf16.msra.mxu1 %v6577_v7 }
 0x671   : > { %6203 = vmatprep.subr.bf16.mxu1 %v6598_v38 }
 0x673   : > { %6200 = vmatmul.mubr.msk.bf16.vlgmr.msra.gmra.mrb[164].mxu1 %vm2336_vm2, %v4455_v50 }
 0x674   : > { %6204 = vmatpush3.bf16.msra.mxu1 %v6578_v52  ;;  %6211 = vmatprep.mubr.msk.bf16.mxu1 %vm6599_vm0, %v6598_v38 }
 0x675   : > { %6205 = vmatprep.subr.bf16.mxu1 %v6598_v38 }
 0x678   : > { %6206 = vmatpush3.bf16.msra.mxu1 %v6579_v59 }
 0x679   : > { %6207 = vmatprep.subr.bf16.mxu1 %v6598_v38 }
 0x67c   : > { %6208 = vmatpush3.bf16.msra.mxu1 %v6580_v26 }
 0x67d   : > { %6209 = vmatprep.subr.bf16.mxu1 %v6598_v38 }
 0x680   : > { %6210 = vmatpush3.bf16.msra.mxu1 %v6581_v20 }
 0x681   : > { %6215 = vmatprep.subr.bf16.mxu1 %v6598_v38 }
 0x683   : > { %6212 = vmatmul.mubr.msk.bf16.vlgmr.msra.gmra.mrb[168].mxu1 %vm2336_vm2, %v4504_v6 }
 0x684   : > { %6216 = vmatpush3.bf16.msra.mxu1 %v6582_v9  ;;  %6223 = vmatprep.mubr.msk.bf16.mxu1 %vm6599_vm0, %v6598_v38 }
 0x685   : > { %6217 = vmatprep.subr.bf16.mxu1 %v6598_v38 }
 0x688   : > { %6218 = vmatpush3.bf16.msra.mxu1 %v6583_v55 }
 0x689   : > { %6219 = vmatprep.subr.bf16.mxu1 %v6598_v38 }
 0x68c   : > { %6220 = vmatpush3.bf16.msra.mxu1 %v6584_v29 }
 0x68d   : > { %6221 = vmatprep.subr.bf16.mxu1 %v6598_v38 }
 0x690   : > { %6222 = vmatpush3.bf16.msra.mxu1 %v6585_v5 }
 0x691   : > { %6227 = vmatprep.subr.bf16.mxu1 %v6598_v38 }
 0x693   : > { %6224 = vmatmul.mubr.msk.bf16.vlgmr.msra.gmra.mrb[172].mxu1 %vm2336_vm2, %v4549_v19 }
 0x694   : > { %6228 = vmatpush3.bf16.msra.mxu1 %v6586_v25  ;;  %6235 = vmatprep.mubr.msk.bf16.mxu1 %vm6599_vm0, %v6598_v38 }
 0x695   : > { %6229 = vmatprep.subr.bf16.mxu1 %v6598_v38 }
 0x698   : > { %6230 = vmatpush3.bf16.msra.mxu1 %v6587_v22  ;;  %v4645_v22 = vld [vmem:[%s367_s11] sm:$0x1] }
 0x699   : > { %6231 = vmatprep.subr.bf16.mxu1 %v6598_v38 }
 0x69c   : > { %6232 = vmatpush3.bf16.msra.mxu1 %v6588_v14 }
 0x69d   : > { %6233 = vmatprep.subr.bf16.mxu1 %v6598_v38  ;;  %v6504_v38 = vld [vmem:[%s8082_s8] sm:$0xff]  }
 0x6a0   : > { %6234 = vmatpush3.bf16.msra.mxu1 %v6589_v11  ;;  %v375_v11 = vld [vmem:[%s8081_s7] sm:$0x1] }
 0x6a1   : > { %5489 = vmatprep.subr.bf16.mxu1 %v6503_v47  ;;  %v2996_v47 = vadd.f32 %v7699_v35, %v375_v11 }
 0x6a3   : > { %6236 = vmatmul.mubr.msk.bf16.vlgmr.msra.gmra.mrb[176].mxu1 %vm2336_vm2, %v4596_v58 }
 0x6a4   : > { %5490 = vmatpush3.bf16.msra.mxu1 %v6504_v38  ;;  %4814 = vmatprep.mubr.bf16.mxu1 %v4645_v22  ;;  %v2997_v38 = vmax.f32 %v2996_v47, 0.0 }
 0x6a5   : > { %5491 = vmatprep.subr.bf16.mxu1 %v6505_v10 }
 0x6a6   : > { %v4643_v10 = vpack.c.bf16 %v2997_v38, %v2997_v38 }
 0x6a8   : > { %5492 = vmatpush3.bf16.msra.mxu1 %v6506_v61 }
 0x6a9   : > { %5493 = vmatprep.subr.bf16.mxu1 %v6507_v54 }
 0x6ac   : > { %5494 = vmatpush3.bf16.msra.mxu1 %v6508_v40  ;;  %v4685_v40 = vld [vmem:[%s8083_s9] sm:$0x1] }
 0x6ad   : > { %5495 = vmatprep.subr.bf16.mxu1 %v6509_v17 }
 0x6b0   : > { %5496 = vmatpush3.bf16.msra.mxu1 %v6510_v37  ;;  %v6601_v37 = vmov 1966171168  }
 0x6b1   : > { %5497 = vmatprep.subr.bf16.mxu1 %v6511_v39  ;;  %v4830_v35 = vunpack.c.l.s4 %v6601_v37 }
 0x6b3   : > { %v4831_v39 = vunpack.c.0.s8 %v4830_v35 }
 0x6b4   : > { %5498 = vmatpush3.bf16.msra.mxu1 %v6512_v42 }
 0x6b5   : > { %5499 = vmatprep.subr.bf16.mxu1 %v6513_v12  ;;  %v4834_v42 = vsub.s32 %v4831_v39, %v7256_v44 }
 0x6b8   : > { %5500 = vmatpush3.bf16.msra.mxu1 %v6514_v23 }
 0x6b9   : > { %5501 = vmatprep.subr.bf16.mxu1 %v6515_v18 }
 0x6bc   : > { %5502 = vmatpush3.bf16.msra.mxu1 %v6516_v2 }
 0x6bd   : > { %5503 = vmatprep.subr.bf16.mxu1 %v6517_v53 }
 0x6c0   : > { %5504 = vmatpush3.bf16.msra.mxu1 %v6518_v21 }
 0x6f6   : > { %v4267_v27 = vpop.f32.mrb[144].mxu1 }
 0x6f7   : > { %v6141_v30 = vpop.f32.mrb[145].mxu1 }
 0x6f8   : > { %v4270_v32 = vpop.f32.mrb[146].mxu1 }
 0x6f9   : > { %v6142_v51 = vpop.f32.mrb[147].mxu1 }
 0x706   : > { %v4310_v0 = vpop.f32.mrb[148].mxu1 }
 0x707   : > { %v4311_v62 = vadd.f32 %v4310_v0, %v4267_v27  ;;  %v6153_v36 = vpop.f32.mrb[149].mxu1 }
 0x708   : > { %v4313_v24 = vpop.f32.mrb[150].mxu1 }
 0x709   : > { %v6154_v33 = vpop.f32.mrb[151].mxu1 }
 0x716   : > { %v4354_v60 = vpop.f32.mrb[152].mxu1 }
 0x717   : > { %v4360_v28 = vadd.f32 %v4354_v60, %v4311_v62  ;;  %v6165_v49 = vpop.f32.mrb[153].mxu1 }
 0x718   : > { %v4357_v56 = vpop.f32.mrb[154].mxu1 }
 0x719   : > { %v6166_v15 = vpop.f32.mrb[155].mxu1 }
 0x726   : > { %v4403_v46 = vpop.f32.mrb[156].mxu1 }
 0x727   : > { %v4409_v8 = vadd.f32 %v4403_v46, %v4360_v28  ;;  %v6177_v63 = vpop.f32.mrb[157].mxu1 }
 0x728   : > { %v4406_v1 = vpop.f32.mrb[158].mxu1 }
 0x729   : > { %v6178_v48 = vpop.f32.mrb[159].mxu1 }
 0x736   : > { %v4448_v43 = vpop.f32.mrb[160].mxu1 }
 0x737   : > { %v4454_v3 = vadd.f32 %v4448_v43, %v4409_v8  ;;  %v6189_v45 = vpop.f32.mrb[161].mxu1 }
 0x738   : > { %v4451_v41 = vpop.f32.mrb[162].mxu1 }
 0x739   : > { %v6190_v7 = vpop.f32.mrb[163].mxu1 }
 0x746   : > { %v4493_v50 = vpop.f32.mrb[164].mxu1 }
 0x747   : > { %v4499_v52 = vadd.f32 %v4493_v50, %v4454_v3  ;;  %v6201_v4 = vpop.f32.mrb[165].mxu1 }
 0x748   : > { %v4496_v59 = vpop.f32.mrb[166].mxu1 }
 0x749   : > { %v6202_v16 = vpop.f32.mrb[167].mxu1 }
 0x756   : > { %v4542_v26 = vpop.f32.mrb[168].mxu1 }
 0x757   : > { %v4548_v31 = vadd.f32 %v4542_v26, %v4499_v52  ;;  %v6213_v20 = vpop.f32.mrb[169].mxu1 }
 0x758   : > { %v4545_v6 = vpop.f32.mrb[170].mxu1 }
 0x759   : > { %v6214_v9 = vpop.f32.mrb[171].mxu1 }
 0x766   : > { %v4587_v55 = vpop.f32.mrb[172].mxu1 }
 0x767   : > { %v4593_v29 = vadd.f32 %v4587_v55, %v4548_v31  ;;  %v6225_v5 = vpop.f32.mrb[173].mxu1 }
 0x768   : > { %v4590_v19 = vpop.f32.mrb[174].mxu1 }
 0x769   : > { %v6226_v25 = vpop.f32.mrb[175].mxu1 }
 0x776   : > { %v4634_v13 = vpop.f32.mrb[176].mxu1 }
 0x777   : > { %v4640_v14 = vadd.f32 %v4634_v13, %v4593_v29  ;;  %v6237_v34 = vpop.f32.mrb[177].mxu1 }
 0x778   : > { %v4637_v58 = vpop.f32.mrb[178].mxu1 }
 0x779   : > { %v4641_v27 = vadd.f32 %v4640_v14, %v375_v11  ;;  %v6238_v30 = vpop.f32.mrb[179].mxu1 }
 0x77b   : > { %v4642_v32 = vmax.f32 %v4641_v27, 0.0 }
 0x77d   : > { %v4644_v51 = vpack.c.bf16 %v4642_v32, %v4642_v32 }
 0x77f   : > { %4647 = vrot.lane.b32.xlu0 %v4644_v51, %s6600_s16 }
 0x7f1   : > { %v4648_v61 = vpop.permute.xlu0 %4647 }
 0x7f2   : > { %v4651_v54 = vsel %vm2336_vm2, %v4643_v10, %v4648_v61 }
 0x7f3   : > { %4815 = vmatmul.mubr.bf16.vlgmr.msra.gmra.mrb[180].mxu1 %v4651_v54 }
 0x8c6   : > { %v5505_v0 = vpop.f32.mrb[180].mxu1 }
 0x8c7   : > { %v5506_v62 = vpop.f32.mrb[181].mxu1 }
 0x8c8   : > { %v5507_v36 = vadd.f32 %v5506_v62, %v5505_v0  ;;  %v5508_v17 = vpop.f32.mrb[182].mxu1 }
 0x8c9   : > { %v5509_v24 = vpop.f32.mrb[183].mxu1 }
 0x8ca   : > { %v4817_v33 = vadd.f32 %v5507_v36, %v4685_v40 }
 0x8cc   : > { %4823 = vrot.lane.b32.xlu0 %v4817_v33, %s6600_s16 }
 0x93e   : > { %v4824_v12 = vpop.permute.xlu0 %4823 }
 0x93f   : > { %v4826_v23 = vsel %vm2336_vm2, %v4642_v32, %v4824_v12 }
 0x940   : > { %v4828_v18 = vcombine.low %v4826_v23, %v4824_v12 }
 0x942   : > { %v4835_v60 = vrot.slane %v4828_v18, %v4834_v42 }
 0x944   : > { %v4842_v2 = vrot.slane %v4835_v60, %v4834_v42 }
 0x946   : > { %4848 = vst.msk [vmem:[%s371_s22] sm:$0x3] %vm4846_vm3, %v4842_v2 }
 0x947 PF: > { %s20_s13 = sadd.s32 1, %s6596_s13  }
 0x948   : > { %p17_p4 = scmp.ge.s32.totalorder %s20_s13, 6  }
 0x94a   :  { %19 = sbr.rel (!%p17_p4) target bundleno = 1 (0x1), region = 93 }

</bundles_post_ra>
